<compile_context>
chip_gen: v7x
topology: tpu7x:2x2x1
jax: 0.10.0
libtpu: 0.0.40
codegen_flags: <defaults>
</compile_context>

<pallas_src>
import functools

import numpy as np
import jax
import jax.numpy as jnp
from jax.experimental import pallas as pl
from jax.experimental.pallas import tpu as pltpu

LRELU_SLOPE = 0.2
BN_EPS = 1e-5

# (kernel, stride) for the 7 convs of MOD.FE; padding=1 everywhere.
LAYER_DEFS = ((3, 1), (4, 2), (3, 1), (4, 2), (3, 1), (3, 1), (3, 1))


def _round_up(x, m):
    return ((x + m - 1) // m) * m


def _pick_tm(m):
    # f32 rows -> multiples of 8 sublanes (no bf16 packing constraint anymore).
    return min(128, _round_up(m, 8))


def _leaky(x, alpha):
    return jnp.where(x >= 0.0, x, alpha * x)


# ----------------------------------------------------------------------------
# Kernel 1: fused 7-conv feature extractor (one image per grid step).
# ----------------------------------------------------------------------------
def _conv_stack_kernel(*refs, taps, alpha):
    # refs = [x, (S, Wcol, bias_row) * n_layers, out]
    x_ref = refs[0]
    o_ref = refs[-1]
    act = x_ref[...]  # (H, W*Cin) f32, whole image resident in vregs
    r = 1
    for k in taps:
        s_ref, w_ref, b_ref = refs[r], refs[r + 1], refs[r + 2]
        r += 3
        acc = None
        for dy in range(k):
            rows = jnp.dot(s_ref[dy], act, preferred_element_type=jnp.float32)
            part = jnp.dot(rows, w_ref[dy], preferred_element_type=jnp.float32)
            acc = part if acc is None else acc + part
        acc = acc + b_ref[...]
        act = _leaky(acc, alpha)
    o_ref[...] = act.astype(o_ref.dtype)


def _row_select(h_out, h_in, k, stride):
    """S[dy, i, r] = 1 where r = stride*i - 1 + dy (padding rows dropped)."""
    s = np.zeros((k, h_out, h_in), np.float32)
    for dy in range(k):
        for i in range(h_out):
            rr = stride * i - 1 + dy
            if 0 <= rr < h_in:
                s[dy, i, rr] = 1.0
    return jnp.asarray(s)


def _col_weights(w_oihw, bn_scale, w_out, w_in, stride):
    """Wcol[dy]: (W_in*Cin, W_out*Cout) — width taps, stride, pad, BN scale folded."""
    co, ci, k, _ = w_oihw.shape
    w = jnp.transpose(w_oihw, (2, 3, 1, 0)).astype(jnp.float32)  # (k, k, Cin, Cout)
    if bn_scale is not None:
        w = w * bn_scale[None, None, None, :]
    mats = []
    for dy in range(k):
        m = jnp.zeros((w_in * ci, w_out * co), jnp.float32)
        for dx in range(k):
            a = np.zeros((w_in, w_out), np.float32)
            for j in range(w_out):
                cc = stride * j - 1 + dx
                if 0 <= cc < w_in:
                    a[cc, j] = 1.0
            m = m + jnp.kron(jnp.asarray(a), w[dy, dx])
        mats.append(m)
    return jnp.stack(mats, axis=0)  # (k, W_in*Cin, W_out*Cout)


def conv_stack(x2d, layer_ops):
    """x2d: (B, H, W*Cin); layer_ops: [(S, Wcol, bias_row)] * 7. One pallas_call."""
    B, H, WC = x2d.shape
    out_h = layer_ops[-1][0].shape[1]
    out_wc = layer_ops[-1][2].shape[1]

    def _const_map(nd):
        return lambda b: (0,) * nd

    in_specs = [pl.BlockSpec((None, H, WC), lambda b: (b, 0, 0))]
    args = [x2d]
    for s_mat, w_mat, b_row in layer_ops:
        for a in (s_mat, w_mat, b_row):
            in_specs.append(pl.BlockSpec(a.shape, _const_map(a.ndim)))
            args.append(a)

    taps = tuple(s.shape[0] for s, _, _ in layer_ops)
    return pl.pallas_call(
        functools.partial(_conv_stack_kernel, taps=taps, alpha=LRELU_SLOPE),
        out_shape=jax.ShapeDtypeStruct((B, out_h, out_wc), jnp.float32),
        grid=(B,),
        in_specs=in_specs,
        out_specs=pl.BlockSpec((None, out_h, out_wc), lambda b: (b, 0, 0)),
        compiler_params=pltpu.CompilerParams(dimension_semantics=("parallel",)),
    )(*args)


# ----------------------------------------------------------------------------
# Kernel 2: fused tail — routing softmax + orthonet + expert classifier + select.
# ----------------------------------------------------------------------------
def _tail_kernel(x_ref, wg_ref, rext_ref, wo_ref, bo_ref, w1_ref, b1_ref,
                 w2_ref, b2_ref, r_ref, f_ref, o_ref, *,
                 num_expert, alpha, external_routing):
    x = x_ref[...]  # (tm, C) f32

    if external_routing:
        r = rext_ref[...]
    else:
        logits = jnp.dot(x, wg_ref[...], preferred_element_type=jnp.float32)
        m = jnp.max(logits, axis=-1, keepdims=True)
        e = jnp.exp(logits - m)
        denom = jnp.sum(e, axis=-1, keepdims=True)
        r = e * pl.reciprocal(denom, approx=True)
    r_ref[...] = r.astype(r_ref.dtype)

    # First-max expert index per row (matches the torch argmax / where-chain).
    rmax = jnp.max(r, axis=-1, keepdims=True)
    lane = jax.lax.broadcasted_iota(jnp.int32, r.shape, dimension=1)
    idx = jnp.min(jnp.where(r == rmax, lane, num_expert), axis=-1, keepdims=True)

    sel = jnp.zeros((x.shape[0], wo_ref.shape[-1]), jnp.float32)
    for ei in range(num_expert):
        fe = jnp.dot(x, wo_ref[ei], preferred_element_type=jnp.float32) + bo_ref[ei]
        fe = _leaky(fe, alpha)
        f_ref[ei] = fe.astype(f_ref.dtype)
        sel = sel + jnp.where(idx == ei, fe, 0.0)

    # Shared 2-layer expert classifier on the selected expert's feature.
    h = jnp.dot(sel, w1_ref[...], preferred_element_type=jnp.float32) + b1_ref[...]
    h = _leaky(h, alpha)
    y = jnp.sum(h * w2_ref[...], axis=-1, keepdims=True) + b2_ref[...]
    o_ref[...] = y.astype(o_ref.dtype)


def tail_fused(flat, wg, routing_ext, wo_stack, bo_stack, w1, b1, w2, b2, *,
               num_expert, alpha=LRELU_SLOPE):
    M, C = flat.shape
    E = num_expert
    H2 = w1.shape[1]
    tm = _pick_tm(M)
    external = routing_ext is not None
    rext = routing_ext if external else jnp.zeros((M, E), jnp.float32)
    return pl.pallas_call(
        functools.partial(_tail_kernel, num_expert=E, alpha=alpha,
                          external_routing=external),
        out_shape=(jax.ShapeDtypeStruct((M, E), jnp.float32),
                   jax.ShapeDtypeStruct((E, M, C), jnp.float32),
                   jax.ShapeDtypeStruct((M, 1), jnp.float32)),
        grid=(pl.cdiv(M, tm),),
        in_specs=[
            pl.BlockSpec((tm, C), lambda i: (i, 0)),
            pl.BlockSpec((C, E), lambda i: (0, 0)),
            pl.BlockSpec((tm, E), lambda i: (i, 0)),
            pl.BlockSpec((E, C, C), lambda i: (0, 0, 0)),
            pl.BlockSpec((E, 1, C), lambda i: (0, 0, 0)),
            pl.BlockSpec((C, H2), lambda i: (0, 0)),
            pl.BlockSpec((1, H2), lambda i: (0, 0)),
            pl.BlockSpec((1, H2), lambda i: (0, 0)),
            pl.BlockSpec((1, 1), lambda i: (0, 0)),
        ],
        out_specs=(
            pl.BlockSpec((tm, E), lambda i: (i, 0)),
            pl.BlockSpec((E, tm, C), lambda i: (0, i, 0)),
            pl.BlockSpec((tm, 1), lambda i: (i, 0)),
        ),
        compiler_params=pltpu.CompilerParams(dimension_semantics=("parallel",)),
    )(flat.astype(jnp.float32), wg.astype(jnp.float32), rext.astype(jnp.float32),
      wo_stack.astype(jnp.float32), bo_stack.astype(jnp.float32),
      w1.astype(jnp.float32), b1.astype(jnp.float32),
      w2.astype(jnp.float32), b2.astype(jnp.float32))


# ----------------------------------------------------------------------------
# Parameters (deterministic, shapes from MOD.__init__)
# ----------------------------------------------------------------------------
def init_params(key, num_feat=8, num_expert=12):
    nf = num_feat

    def nrm(k, shape, s=0.05):
        return s * jax.random.normal(k, shape, jnp.float32)

    keys = jax.random.split(key, 16)
    p = {}
    conv_defs = [  # (cin, cout, kernel)
        (3, nf, 3), (nf, nf, 4), (nf, 2 * nf, 3), (2 * nf, 2 * nf, 4),
        (2 * nf, 4 * nf, 3), (4 * nf, 4 * nf, 3), (4 * nf, 4 * nf, 3),
    ]
    p["conv_w"] = [nrm(keys[i], (co, ci, kk, kk)) for i, (ci, co, kk) in enumerate(conv_defs)]
    p["conv1_b"] = nrm(keys[7], (nf,))
    # TODO(synk): BatchNorm modeled in eval mode with PyTorch-default running
    # stats (gamma=1, beta=0, mean=0, var=1); training-mode batch stats are not modeled.
    p["bn"] = [(jnp.ones((c,)), jnp.zeros((c,)), jnp.zeros((c,)), jnp.ones((c,)))
               for c in [nf, 2 * nf, 2 * nf, 4 * nf, 4 * nf, 4 * nf]]
    C = 4 * nf
    p["w_gating1"] = jax.random.normal(keys[8], (C, num_expert), jnp.float32)
    # classifier (shared by all experts — the ModuleList holds the SAME module)
    p["cls_w1"] = nrm(keys[9], (nf // 2, C))
    p["cls_b1"] = nrm(keys[10], (nf // 2,))
    p["cls_w2"] = nrm(keys[11], (1, nf // 2))
    p["cls_b2"] = nrm(keys[12], (1,))
    # TODO(synk): CodeReduction's source is not in the provided snippet; modeled
    # as Linear(C, C*num_expert) + LeakyReLU(0.2), with the linear weight
    # reshaped to (num_expert, C, C) returned as ortho_weight.
    p["ortho_w"] = nrm(keys[13], (C * num_expert, C))
    p["ortho_b"] = nrm(keys[14], (C * num_expert,))
    return p


# ----------------------------------------------------------------------------
# MOD.forward
# ----------------------------------------------------------------------------
def mod_forward(params, x_nchw, num_feat=8, num_expert=12, routing=None):
    E = num_expert
    B, cin, H, W = x_nchw.shape
    x2d = jnp.transpose(x_nchw, (0, 2, 3, 1)).astype(jnp.float32).reshape(B, H, W * cin)

    # Precompute per-layer row-selection / column-weight / bias-row operands
    # (all tiny; the conv taps, stride, padding and BN fold live here).
    layer_ops = []
    h_in, w_in = H, W
    for li, (k, stride) in enumerate(LAYER_DEFS):
        w_oihw = params["conv_w"][li]
        co = w_oihw.shape[0]
        h_out = (h_in + 2 - k) // stride + 1
        w_out = (w_in + 2 - k) // stride + 1
        if li == 0:
            scale, shift = None, params["conv1_b"]
        else:
            gamma, beta, mean, var = params["bn"][li - 1]
            scale = gamma * jax.lax.rsqrt(var + BN_EPS)
            shift = beta - mean * scale
        s_mat = _row_select(h_out, h_in, k, stride)
        w_mat = _col_weights(w_oihw, scale, w_out, w_in, stride)
        b_row = jnp.tile(shift.astype(jnp.float32), (w_out,)).reshape(1, w_out * co)
        layer_ops.append((s_mat, w_mat, b_row))
        h_in, w_in = h_out, w_out

    # One kernel for all 7 convs.
    feat2d = conv_stack(x2d, layer_ops)                 # (B, Hf, Wf*C)
    C = params["conv_w"][-1].shape[0]
    ntok = h_in * w_in
    # (B, Hf, Wf*C) row-major == NCHW view(B, C, H*W).permute(0, 2, 1) token layout.
    flat = feat2d.reshape(B * ntok, C)

    wo_stack = params["ortho_w"].reshape(E, C, C).transpose(0, 2, 1)  # x @ wo_stack[e]
    bo_stack = params["ortho_b"].reshape(E, 1, C)
    w1 = params["cls_w1"].T
    b1 = params["cls_b1"].reshape(1, -1)
    w2 = params["cls_w2"].reshape(1, -1)
    b2 = params["cls_b2"].reshape(1, 1)

    routing_ext = None if routing is None else routing.reshape(B * ntok, E)
    r_flat, f_stack, out_flat = tail_fused(
        flat, params["w_gating1"], routing_ext, wo_stack, bo_stack,
        w1, b1, w2, b2, num_expert=E)

    routing_out = r_flat.reshape(B, ntok, E)
    output = out_flat.reshape(B, ntok, 1)
    chunks = tuple(f_stack[e].reshape(B, ntok, C) for e in range(E))
    ortho_weight = params["ortho_w"].reshape(E, C, C)
    return output, routing_out, chunks, ortho_weight


if __name__ == "__main__":
    key = jax.random.PRNGKey(0)
    kp, kx = jax.random.split(key)
    num_feat, num_expert = 8, 12
    params = init_params(kp, num_feat, num_expert)
    x = jax.random.normal(kx, (2, 3, 16, 16), jnp.float32)  # NCHW, like PyTorch

    fwd = jax.jit(functools.partial(mod_forward, num_feat=num_feat,
                                    num_expert=num_expert))
    output, routing, feats, ortho_w = fwd(params, x)
    jax.block_until_ready(output)
    jax.block_until_ready(routing)

    assert output.shape == (2, 16, 1)              # (B, H/4*W/4, 1)
    assert routing.shape == (2, 16, num_expert)
    assert len(feats) == num_expert and feats[0].shape == (2, 16, 4 * num_feat)
    assert ortho_w.shape == (num_expert, 4 * num_feat, 4 * num_feat)
    print("KERNEL_OK")
</pallas_src>

<mosaic_0001>
module attributes {stable_mosaic.version = 11 : i64} {
  func.func @_conv_stack_kernel(%arg0: i32, %arg1: memref<1x16x48xf32, #tpu.memory_space<vmem>>, %arg2: memref<3x16x16xf32, #tpu.memory_space<vmem>>, %arg3: memref<3x48x128xf32, #tpu.memory_space<vmem>>, %arg4: memref<1x128xf32, #tpu.memory_space<vmem>>, %arg5: memref<4x8x16xf32, #tpu.memory_space<vmem>>, %arg6: memref<4x128x64xf32, #tpu.memory_space<vmem>>, %arg7: memref<1x64xf32, #tpu.memory_space<vmem>>, %arg8: memref<3x8x8xf32, #tpu.memory_space<vmem>>, %arg9: memref<3x64x128xf32, #tpu.memory_space<vmem>>, %arg10: memref<1x128xf32, #tpu.memory_space<vmem>>, %arg11: memref<4x4x8xf32, #tpu.memory_space<vmem>>, %arg12: memref<4x128x64xf32, #tpu.memory_space<vmem>>, %arg13: memref<1x64xf32, #tpu.memory_space<vmem>>, %arg14: memref<3x4x4xf32, #tpu.memory_space<vmem>>, %arg15: memref<3x64x128xf32, #tpu.memory_space<vmem>>, %arg16: memref<1x128xf32, #tpu.memory_space<vmem>>, %arg17: memref<3x4x4xf32, #tpu.memory_space<vmem>>, %arg18: memref<3x128x128xf32, #tpu.memory_space<vmem>>, %arg19: memref<1x128xf32, #tpu.memory_space<vmem>>, %arg20: memref<3x4x4xf32, #tpu.memory_space<vmem>>, %arg21: memref<3x128x128xf32, #tpu.memory_space<vmem>>, %arg22: memref<1x128xf32, #tpu.memory_space<vmem>>, %arg23: memref<1x4x128xf32, #tpu.memory_space<vmem>>) attributes {dimension_semantics = [#tpu.dimension_semantics<parallel>], iteration_bounds = array<i64: 2>, scalar_prefetch = 0 : i64, scratch_operands = 0 : i64, tpu.core_type = #tpu.core_type<tc>, window_params = [{transform_indices = @transform_0, window_bounds = array<i64: 1, 16, 48>}, {pipeline_mode = #tpu.pipeline_mode<synchronous>, transform_indices = @transform_1, window_bounds = array<i64: 3, 16, 16>}, {pipeline_mode = #tpu.pipeline_mode<synchronous>, transform_indices = @transform_2, window_bounds = array<i64: 3, 48, 128>}, {pipeline_mode = #tpu.pipeline_mode<synchronous>, transform_indices = @transform_3, window_bounds = array<i64: 1, 128>}, {pipeline_mode = #tpu.pipeline_mode<synchronous>, transform_indices = @transform_4, window_bounds = array<i64: 4, 8, 16>}, {pipeline_mode = #tpu.pipeline_mode<synchronous>, transform_indices = @transform_5, window_bounds = array<i64: 4, 128, 64>}, {pipeline_mode = #tpu.pipeline_mode<synchronous>, transform_indices = @transform_6, window_bounds = array<i64: 1, 64>}, {pipeline_mode = #tpu.pipeline_mode<synchronous>, transform_indices = @transform_7, window_bounds = array<i64: 3, 8, 8>}, {pipeline_mode = #tpu.pipeline_mode<synchronous>, transform_indices = @transform_8, window_bounds = array<i64: 3, 64, 128>}, {pipeline_mode = #tpu.pipeline_mode<synchronous>, transform_indices = @transform_9, window_bounds = array<i64: 1, 128>}, {pipeline_mode = #tpu.pipeline_mode<synchronous>, transform_indices = @transform_10, window_bounds = array<i64: 4, 4, 8>}, {pipeline_mode = #tpu.pipeline_mode<synchronous>, transform_indices = @transform_11, window_bounds = array<i64: 4, 128, 64>}, {pipeline_mode = #tpu.pipeline_mode<synchronous>, transform_indices = @transform_12, window_bounds = array<i64: 1, 64>}, {pipeline_mode = #tpu.pipeline_mode<synchronous>, transform_indices = @transform_13, window_bounds = array<i64: 3, 4, 4>}, {pipeline_mode = #tpu.pipeline_mode<synchronous>, transform_indices = @transform_14, window_bounds = array<i64: 3, 64, 128>}, {pipeline_mode = #tpu.pipeline_mode<synchronous>, transform_indices = @transform_15, window_bounds = array<i64: 1, 128>}, {pipeline_mode = #tpu.pipeline_mode<synchronous>, transform_indices = @transform_16, window_bounds = array<i64: 3, 4, 4>}, {pipeline_mode = #tpu.pipeline_mode<synchronous>, transform_indices = @transform_17, window_bounds = array<i64: 3, 128, 128>}, {pipeline_mode = #tpu.pipeline_mode<synchronous>, transform_indices = @transform_18, window_bounds = array<i64: 1, 128>}, {pipeline_mode = #tpu.pipeline_mode<synchronous>, transform_indices = @transform_19, window_bounds = array<i64: 3, 4, 4>}, {pipeline_mode = #tpu.pipeline_mode<synchronous>, transform_indices = @transform_20, window_bounds = array<i64: 3, 128, 128>}, {pipeline_mode = #tpu.pipeline_mode<synchronous>, transform_indices = @transform_21, window_bounds = array<i64: 1, 128>}, {transform_indices = @transform_22, window_bounds = array<i64: 1, 4, 128>}]} {
    %c0 = arith.constant 0 : index
    %c0_0 = arith.constant 0 : index
    %c0_1 = arith.constant 0 : index
    %0 = vector.load %arg1[%c0, %c0_0, %c0_1] : memref<1x16x48xf32, #tpu.memory_space<vmem>>, vector<1x16x48xf32>
    %1 = vector.shape_cast %0 : vector<1x16x48xf32> to vector<16x48xf32>
    %c0_2 = arith.constant 0 : index
    %c0_3 = arith.constant 0 : index
    %c0_4 = arith.constant 0 : index
    %2 = vector.load %arg2[%c0_2, %c0_3, %c0_4] : memref<3x16x16xf32, #tpu.memory_space<vmem>>, vector<1x16x16xf32>
    %3 = vector.shape_cast %2 : vector<1x16x16xf32> to vector<16x16xf32>
    %cst = arith.constant dense<0.000000e+00> : vector<16x48xf32>
    %4 = tpu.matmul %3, %1, %cst {dimension_numbers = #tpu.dot_dimension_numbers<[1], [0], [0], [1], [0, 0, 1, 1], [], []>} : vector<16x16xf32>, vector<16x48xf32>, vector<16x48xf32> -> vector<16x48xf32>
    %c0_5 = arith.constant 0 : index
    %c0_6 = arith.constant 0 : index
    %c0_7 = arith.constant 0 : index
    %5 = vector.load %arg3[%c0_5, %c0_6, %c0_7] : memref<3x48x128xf32, #tpu.memory_space<vmem>>, vector<1x48x128xf32>
    %6 = vector.shape_cast %5 : vector<1x48x128xf32> to vector<48x128xf32>
    %cst_8 = arith.constant dense<0.000000e+00> : vector<16x128xf32>
    %7 = tpu.matmul %4, %6, %cst_8 {dimension_numbers = #tpu.dot_dimension_numbers<[1], [0], [0], [1], [0, 0, 1, 1], [], []>} : vector<16x48xf32>, vector<48x128xf32>, vector<16x128xf32> -> vector<16x128xf32>
    %c1 = arith.constant 1 : index
    %c0_9 = arith.constant 0 : index
    %c0_10 = arith.constant 0 : index
    %8 = vector.load %arg2[%c1, %c0_9, %c0_10] : memref<3x16x16xf32, #tpu.memory_space<vmem>>, vector<1x16x16xf32>
    %9 = vector.shape_cast %8 : vector<1x16x16xf32> to vector<16x16xf32>
    %cst_11 = arith.constant dense<0.000000e+00> : vector<16x48xf32>
    %10 = tpu.matmul %9, %1, %cst_11 {dimension_numbers = #tpu.dot_dimension_numbers<[1], [0], [0], [1], [0, 0, 1, 1], [], []>} : vector<16x16xf32>, vector<16x48xf32>, vector<16x48xf32> -> vector<16x48xf32>
    %c1_12 = arith.constant 1 : index
    %c0_13 = arith.constant 0 : index
    %c0_14 = arith.constant 0 : index
    %11 = vector.load %arg3[%c1_12, %c0_13, %c0_14] : memref<3x48x128xf32, #tpu.memory_space<vmem>>, vector<1x48x128xf32>
    %12 = vector.shape_cast %11 : vector<1x48x128xf32> to vector<48x128xf32>
    %cst_15 = arith.constant dense<0.000000e+00> : vector<16x128xf32>
    %13 = tpu.matmul %10, %12, %cst_15 {dimension_numbers = #tpu.dot_dimension_numbers<[1], [0], [0], [1], [0, 0, 1, 1], [], []>} : vector<16x48xf32>, vector<48x128xf32>, vector<16x128xf32> -> vector<16x128xf32>
    %14 = arith.addf %7, %13 : vector<16x128xf32>
    %c2 = arith.constant 2 : index
    %c0_16 = arith.constant 0 : index
    %c0_17 = arith.constant 0 : index
    %15 = vector.load %arg2[%c2, %c0_16, %c0_17] : memref<3x16x16xf32, #tpu.memory_space<vmem>>, vector<1x16x16xf32>
    %16 = vector.shape_cast %15 : vector<1x16x16xf32> to vector<16x16xf32>
    %cst_18 = arith.constant dense<0.000000e+00> : vector<16x48xf32>
    %17 = tpu.matmul %16, %1, %cst_18 {dimension_numbers = #tpu.dot_dimension_numbers<[1], [0], [0], [1], [0, 0, 1, 1], [], []>} : vector<16x16xf32>, vector<16x48xf32>, vector<16x48xf32> -> vector<16x48xf32>
    %c2_19 = arith.constant 2 : index
    %c0_20 = arith.constant 0 : index
    %c0_21 = arith.constant 0 : index
    %18 = vector.load %arg3[%c2_19, %c0_20, %c0_21] : memref<3x48x128xf32, #tpu.memory_space<vmem>>, vector<1x48x128xf32>
    %19 = vector.shape_cast %18 : vector<1x48x128xf32> to vector<48x128xf32>
    %cst_22 = arith.constant dense<0.000000e+00> : vector<16x128xf32>
    %20 = tpu.matmul %17, %19, %cst_22 {dimension_numbers = #tpu.dot_dimension_numbers<[1], [0], [0], [1], [0, 0, 1, 1], [], []>} : vector<16x48xf32>, vector<48x128xf32>, vector<16x128xf32> -> vector<16x128xf32>
    %21 = arith.addf %14, %20 : vector<16x128xf32>
    %c0_23 = arith.constant 0 : index
    %c0_24 = arith.constant 0 : index
    %22 = vector.load %arg4[%c0_23, %c0_24] : memref<1x128xf32, #tpu.memory_space<vmem>>, vector<1x128xf32>
    %23 = vector.broadcast %22 : vector<1x128xf32> to vector<16x128xf32>
    %24 = arith.addf %21, %23 : vector<16x128xf32>
    %cst_25 = arith.constant 0.000000e+00 : f32
    %25 = vector.broadcast %cst_25 : f32 to vector<16x128xf32>
    %26 = arith.cmpf oge, %24, %25 : vector<16x128xf32>
    %cst_26 = arith.constant 2.000000e-01 : f32
    %27 = vector.broadcast %cst_26 : f32 to vector<16x128xf32>
    %28 = arith.mulf %27, %24 : vector<16x128xf32>
    %29 = arith.select %26, %24, %28 : vector<16x128xi1>, vector<16x128xf32>
    %c0_27 = arith.constant 0 : index
    %c0_28 = arith.constant 0 : index
    %c0_29 = arith.constant 0 : index
    %30 = vector.load %arg5[%c0_27, %c0_28, %c0_29] : memref<4x8x16xf32, #tpu.memory_space<vmem>>, vector<1x8x16xf32>
    %31 = vector.shape_cast %30 : vector<1x8x16xf32> to vector<8x16xf32>
    %cst_30 = arith.constant dense<0.000000e+00> : vector<8x128xf32>
    %32 = tpu.matmul %31, %29, %cst_30 {dimension_numbers = #tpu.dot_dimension_numbers<[1], [0], [0], [1], [0, 0, 1, 1], [], []>} : vector<8x16xf32>, vector<16x128xf32>, vector<8x128xf32> -> vector<8x128xf32>
    %c0_31 = arith.constant 0 : index
    %c0_32 = arith.constant 0 : index
    %c0_33 = arith.constant 0 : index
    %33 = vector.load %arg6[%c0_31, %c0_32, %c0_33] : memref<4x128x64xf32, #tpu.memory_space<vmem>>, vector<1x128x64xf32>
    %34 = vector.shape_cast %33 : vector<1x128x64xf32> to vector<128x64xf32>
    %cst_34 = arith.constant dense<0.000000e+00> : vector<8x64xf32>
    %35 = tpu.matmul %32, %34, %cst_34 {dimension_numbers = #tpu.dot_dimension_numbers<[1], [0], [0], [1], [0, 0, 1, 1], [], []>} : vector<8x128xf32>, vector<128x64xf32>, vector<8x64xf32> -> vector<8x64xf32>
    %c1_35 = arith.constant 1 : index
    %c0_36 = arith.constant 0 : index
    %c0_37 = arith.constant 0 : index
    %36 = vector.load %arg5[%c1_35, %c0_36, %c0_37] : memref<4x8x16xf32, #tpu.memory_space<vmem>>, vector<1x8x16xf32>
    %37 = vector.shape_cast %36 : vector<1x8x16xf32> to vector<8x16xf32>
    %cst_38 = arith.constant dense<0.000000e+00> : vector<8x128xf32>
    %38 = tpu.matmul %37, %29, %cst_38 {dimension_numbers = #tpu.dot_dimension_numbers<[1], [0], [0], [1], [0, 0, 1, 1], [], []>} : vector<8x16xf32>, vector<16x128xf32>, vector<8x128xf32> -> vector<8x128xf32>
    %c1_39 = arith.constant 1 : index
    %c0_40 = arith.constant 0 : index
    %c0_41 = arith.constant 0 : index
    %39 = vector.load %arg6[%c1_39, %c0_40, %c0_41] : memref<4x128x64xf32, #tpu.memory_space<vmem>>, vector<1x128x64xf32>
    %40 = vector.shape_cast %39 : vector<1x128x64xf32> to vector<128x64xf32>
    %cst_42 = arith.constant dense<0.000000e+00> : vector<8x64xf32>
    %41 = tpu.matmul %38, %40, %cst_42 {dimension_numbers = #tpu.dot_dimension_numbers<[1], [0], [0], [1], [0, 0, 1, 1], [], []>} : vector<8x128xf32>, vector<128x64xf32>, vector<8x64xf32> -> vector<8x64xf32>
    %42 = arith.addf %35, %41 : vector<8x64xf32>
    %c2_43 = arith.constant 2 : index
    %c0_44 = arith.constant 0 : index
    %c0_45 = arith.constant 0 : index
    %43 = vector.load %arg5[%c2_43, %c0_44, %c0_45] : memref<4x8x16xf32, #tpu.memory_space<vmem>>, vector<1x8x16xf32>
    %44 = vector.shape_cast %43 : vector<1x8x16xf32> to vector<8x16xf32>
    %cst_46 = arith.constant dense<0.000000e+00> : vector<8x128xf32>
    %45 = tpu.matmul %44, %29, %cst_46 {dimension_numbers = #tpu.dot_dimension_numbers<[1], [0], [0], [1], [0, 0, 1, 1], [], []>} : vector<8x16xf32>, vector<16x128xf32>, vector<8x128xf32> -> vector<8x128xf32>
    %c2_47 = arith.constant 2 : index
    %c0_48 = arith.constant 0 : index
    %c0_49 = arith.constant 0 : index
    %46 = vector.load %arg6[%c2_47, %c0_48, %c0_49] : memref<4x128x64xf32, #tpu.memory_space<vmem>>, vector<1x128x64xf32>
    %47 = vector.shape_cast %46 : vector<1x128x64xf32> to vector<128x64xf32>
    %cst_50 = arith.constant dense<0.000000e+00> : vector<8x64xf32>
    %48 = tpu.matmul %45, %47, %cst_50 {dimension_numbers = #tpu.dot_dimension_numbers<[1], [0], [0], [1], [0, 0, 1, 1], [], []>} : vector<8x128xf32>, vector<128x64xf32>, vector<8x64xf32> -> vector<8x64xf32>
    %49 = arith.addf %42, %48 : vector<8x64xf32>
    %c3 = arith.constant 3 : index
    %c0_51 = arith.constant 0 : index
    %c0_52 = arith.constant 0 : index
    %50 = vector.load %arg5[%c3, %c0_51, %c0_52] : memref<4x8x16xf32, #tpu.memory_space<vmem>>, vector<1x8x16xf32>
    %51 = vector.shape_cast %50 : vector<1x8x16xf32> to vector<8x16xf32>
    %cst_53 = arith.constant dense<0.000000e+00> : vector<8x128xf32>
    %52 = tpu.matmul %51, %29, %cst_53 {dimension_numbers = #tpu.dot_dimension_numbers<[1], [0], [0], [1], [0, 0, 1, 1], [], []>} : vector<8x16xf32>, vector<16x128xf32>, vector<8x128xf32> -> vector<8x128xf32>
    %c3_54 = arith.constant 3 : index
    %c0_55 = arith.constant 0 : index
    %c0_56 = arith.constant 0 : index
    %53 = vector.load %arg6[%c3_54, %c0_55, %c0_56] : memref<4x128x64xf32, #tpu.memory_space<vmem>>, vector<1x128x64xf32>
    %54 = vector.shape_cast %53 : vector<1x128x64xf32> to vector<128x64xf32>
    %cst_57 = arith.constant dense<0.000000e+00> : vector<8x64xf32>
    %55 = tpu.matmul %52, %54, %cst_57 {dimension_numbers = #tpu.dot_dimension_numbers<[1], [0], [0], [1], [0, 0, 1, 1], [], []>} : vector<8x128xf32>, vector<128x64xf32>, vector<8x64xf32> -> vector<8x64xf32>
    %56 = arith.addf %49, %55 : vector<8x64xf32>
    %c0_58 = arith.constant 0 : index
    %c0_59 = arith.constant 0 : index
    %57 = vector.load %arg7[%c0_58, %c0_59] : memref<1x64xf32, #tpu.memory_space<vmem>>, vector<1x64xf32>
    %58 = vector.broadcast %57 : vector<1x64xf32> to vector<8x64xf32>
    %59 = arith.addf %56, %58 : vector<8x64xf32>
    %cst_60 = arith.constant 0.000000e+00 : f32
    %60 = vector.broadcast %cst_60 : f32 to vector<8x64xf32>
    %61 = arith.cmpf oge, %59, %60 : vector<8x64xf32>
    %cst_61 = arith.constant 2.000000e-01 : f32
    %62 = vector.broadcast %cst_61 : f32 to vector<8x64xf32>
    %63 = arith.mulf %62, %59 : vector<8x64xf32>
    %64 = arith.select %61, %59, %63 : vector<8x64xi1>, vector<8x64xf32>
    %c0_62 = arith.constant 0 : index
    %c0_63 = arith.constant 0 : index
    %c0_64 = arith.constant 0 : index
    %65 = vector.load %arg8[%c0_62, %c0_63, %c0_64] : memref<3x8x8xf32, #tpu.memory_space<vmem>>, vector<1x8x8xf32>
    %66 = vector.shape_cast %65 : vector<1x8x8xf32> to vector<8x8xf32>
    %cst_65 = arith.constant dense<0.000000e+00> : vector<8x64xf32>
    %67 = tpu.matmul %66, %64, %cst_65 {dimension_numbers = #tpu.dot_dimension_numbers<[1], [0], [0], [1], [0, 0, 1, 1], [], []>} : vector<8x8xf32>, vector<8x64xf32>, vector<8x64xf32> -> vector<8x64xf32>
    %c0_66 = arith.constant 0 : index
    %c0_67 = arith.constant 0 : index
    %c0_68 = arith.constant 0 : index
    %68 = vector.load %arg9[%c0_66, %c0_67, %c0_68] : memref<3x64x128xf32, #tpu.memory_space<vmem>>, vector<1x64x128xf32>
    %69 = vector.shape_cast %68 : vector<1x64x128xf32> to vector<64x128xf32>
    %cst_69 = arith.constant dense<0.000000e+00> : vector<8x128xf32>
    %70 = tpu.matmul %67, %69, %cst_69 {dimension_numbers = #tpu.dot_dimension_numbers<[1], [0], [0], [1], [0, 0, 1, 1], [], []>} : vector<8x64xf32>, vector<64x128xf32>, vector<8x128xf32> -> vector<8x128xf32>
    %c1_70 = arith.constant 1 : index
    %c0_71 = arith.constant 0 : index
    %c0_72 = arith.constant 0 : index
    %71 = vector.load %arg8[%c1_70, %c0_71, %c0_72] : memref<3x8x8xf32, #tpu.memory_space<vmem>>, vector<1x8x8xf32>
    %72 = vector.shape_cast %71 : vector<1x8x8xf32> to vector<8x8xf32>
    %cst_73 = arith.constant dense<0.000000e+00> : vector<8x64xf32>
    %73 = tpu.matmul %72, %64, %cst_73 {dimension_numbers = #tpu.dot_dimension_numbers<[1], [0], [0], [1], [0, 0, 1, 1], [], []>} : vector<8x8xf32>, vector<8x64xf32>, vector<8x64xf32> -> vector<8x64xf32>
    %c1_74 = arith.constant 1 : index
    %c0_75 = arith.constant 0 : index
    %c0_76 = arith.constant 0 : index
    %74 = vector.load %arg9[%c1_74, %c0_75, %c0_76] : memref<3x64x128xf32, #tpu.memory_space<vmem>>, vector<1x64x128xf32>
    %75 = vector.shape_cast %74 : vector<1x64x128xf32> to vector<64x128xf32>
    %cst_77 = arith.constant dense<0.000000e+00> : vector<8x128xf32>
    %76 = tpu.matmul %73, %75, %cst_77 {dimension_numbers = #tpu.dot_dimension_numbers<[1], [0], [0], [1], [0, 0, 1, 1], [], []>} : vector<8x64xf32>, vector<64x128xf32>, vector<8x128xf32> -> vector<8x128xf32>
    %77 = arith.addf %70, %76 : vector<8x128xf32>
    %c2_78 = arith.constant 2 : index
    %c0_79 = arith.constant 0 : index
    %c0_80 = arith.constant 0 : index
    %78 = vector.load %arg8[%c2_78, %c0_79, %c0_80] : memref<3x8x8xf32, #tpu.memory_space<vmem>>, vector<1x8x8xf32>
    %79 = vector.shape_cast %78 : vector<1x8x8xf32> to vector<8x8xf32>
    %cst_81 = arith.constant dense<0.000000e+00> : vector<8x64xf32>
    %80 = tpu.matmul %79, %64, %cst_81 {dimension_numbers = #tpu.dot_dimension_numbers<[1], [0], [0], [1], [0, 0, 1, 1], [], []>} : vector<8x8xf32>, vector<8x64xf32>, vector<8x64xf32> -> vector<8x64xf32>
    %c2_82 = arith.constant 2 : index
    %c0_83 = arith.constant 0 : index
    %c0_84 = arith.constant 0 : index
    %81 = vector.load %arg9[%c2_82, %c0_83, %c0_84] : memref<3x64x128xf32, #tpu.memory_space<vmem>>, vector<1x64x128xf32>
    %82 = vector.shape_cast %81 : vector<1x64x128xf32> to vector<64x128xf32>
    %cst_85 = arith.constant dense<0.000000e+00> : vector<8x128xf32>
    %83 = tpu.matmul %80, %82, %cst_85 {dimension_numbers = #tpu.dot_dimension_numbers<[1], [0], [0], [1], [0, 0, 1, 1], [], []>} : vector<8x64xf32>, vector<64x128xf32>, vector<8x128xf32> -> vector<8x128xf32>
    %84 = arith.addf %77, %83 : vector<8x128xf32>
    %c0_86 = arith.constant 0 : index
    %c0_87 = arith.constant 0 : index
    %85 = vector.load %arg10[%c0_86, %c0_87] : memref<1x128xf32, #tpu.memory_space<vmem>>, vector<1x128xf32>
    %86 = vector.broadcast %85 : vector<1x128xf32> to vector<8x128xf32>
    %87 = arith.addf %84, %86 : vector<8x128xf32>
    %cst_88 = arith.constant 0.000000e+00 : f32
    %88 = vector.broadcast %cst_88 : f32 to vector<8x128xf32>
    %89 = arith.cmpf oge, %87, %88 : vector<8x128xf32>
    %cst_89 = arith.constant 2.000000e-01 : f32
    %90 = vector.broadcast %cst_89 : f32 to vector<8x128xf32>
    %91 = arith.mulf %90, %87 : vector<8x128xf32>
    %92 = arith.select %89, %87, %91 : vector<8x128xi1>, vector<8x128xf32>
    %c0_90 = arith.constant 0 : index
    %c0_91 = arith.constant 0 : index
    %c0_92 = arith.constant 0 : index
    %93 = vector.load %arg11[%c0_90, %c0_91, %c0_92] : memref<4x4x8xf32, #tpu.memory_space<vmem>>, vector<1x4x8xf32>
    %94 = vector.shape_cast %93 : vector<1x4x8xf32> to vector<4x8xf32>
    %cst_93 = arith.constant dense<0.000000e+00> : vector<4x128xf32>
    %95 = tpu.matmul %94, %92, %cst_93 {dimension_numbers = #tpu.dot_dimension_numbers<[1], [0], [0], [1], [0, 0, 1, 1], [], []>} : vector<4x8xf32>, vector<8x128xf32>, vector<4x128xf32> -> vector<4x128xf32>
    %c0_94 = arith.constant 0 : index
    %c0_95 = arith.constant 0 : index
    %c0_96 = arith.constant 0 : index
    %96 = vector.load %arg12[%c0_94, %c0_95, %c0_96] : memref<4x128x64xf32, #tpu.memory_space<vmem>>, vector<1x128x64xf32>
    %97 = vector.shape_cast %96 : vector<1x128x64xf32> to vector<128x64xf32>
    %cst_97 = arith.constant dense<0.000000e+00> : vector<4x64xf32>
    %98 = tpu.matmul %95, %97, %cst_97 {dimension_numbers = #tpu.dot_dimension_numbers<[1], [0], [0], [1], [0, 0, 1, 1], [], []>} : vector<4x128xf32>, vector<128x64xf32>, vector<4x64xf32> -> vector<4x64xf32>
    %c1_98 = arith.constant 1 : index
    %c0_99 = arith.constant 0 : index
    %c0_100 = arith.constant 0 : index
    %99 = vector.load %arg11[%c1_98, %c0_99, %c0_100] : memref<4x4x8xf32, #tpu.memory_space<vmem>>, vector<1x4x8xf32>
    %100 = vector.shape_cast %99 : vector<1x4x8xf32> to vector<4x8xf32>
    %cst_101 = arith.constant dense<0.000000e+00> : vector<4x128xf32>
    %101 = tpu.matmul %100, %92, %cst_101 {dimension_numbers = #tpu.dot_dimension_numbers<[1], [0], [0], [1], [0, 0, 1, 1], [], []>} : vector<4x8xf32>, vector<8x128xf32>, vector<4x128xf32> -> vector<4x128xf32>
    %c1_102 = arith.constant 1 : index
    %c0_103 = arith.constant 0 : index
    %c0_104 = arith.constant 0 : index
    %102 = vector.load %arg12[%c1_102, %c0_103, %c0_104] : memref<4x128x64xf32, #tpu.memory_space<vmem>>, vector<1x128x64xf32>
    %103 = vector.shape_cast %102 : vector<1x128x64xf32> to vector<128x64xf32>
    %cst_105 = arith.constant dense<0.000000e+00> : vector<4x64xf32>
    %104 = tpu.matmul %101, %103, %cst_105 {dimension_numbers = #tpu.dot_dimension_numbers<[1], [0], [0], [1], [0, 0, 1, 1], [], []>} : vector<4x128xf32>, vector<128x64xf32>, vector<4x64xf32> -> vector<4x64xf32>
    %105 = arith.addf %98, %104 : vector<4x64xf32>
    %c2_106 = arith.constant 2 : index
    %c0_107 = arith.constant 0 : index
    %c0_108 = arith.constant 0 : index
    %106 = vector.load %arg11[%c2_106, %c0_107, %c0_108] : memref<4x4x8xf32, #tpu.memory_space<vmem>>, vector<1x4x8xf32>
    %107 = vector.shape_cast %106 : vector<1x4x8xf32> to vector<4x8xf32>
    %cst_109 = arith.constant dense<0.000000e+00> : vector<4x128xf32>
    %108 = tpu.matmul %107, %92, %cst_109 {dimension_numbers = #tpu.dot_dimension_numbers<[1], [0], [0], [1], [0, 0, 1, 1], [], []>} : vector<4x8xf32>, vector<8x128xf32>, vector<4x128xf32> -> vector<4x128xf32>
    %c2_110 = arith.constant 2 : index
    %c0_111 = arith.constant 0 : index
    %c0_112 = arith.constant 0 : index
    %109 = vector.load %arg12[%c2_110, %c0_111, %c0_112] : memref<4x128x64xf32, #tpu.memory_space<vmem>>, vector<1x128x64xf32>
    %110 = vector.shape_cast %109 : vector<1x128x64xf32> to vector<128x64xf32>
    %cst_113 = arith.constant dense<0.000000e+00> : vector<4x64xf32>
    %111 = tpu.matmul %108, %110, %cst_113 {dimension_numbers = #tpu.dot_dimension_numbers<[1], [0], [0], [1], [0, 0, 1, 1], [], []>} : vector<4x128xf32>, vector<128x64xf32>, vector<4x64xf32> -> vector<4x64xf32>
    %112 = arith.addf %105, %111 : vector<4x64xf32>
    %c3_114 = arith.constant 3 : index
    %c0_115 = arith.constant 0 : index
    %c0_116 = arith.constant 0 : index
    %113 = vector.load %arg11[%c3_114, %c0_115, %c0_116] : memref<4x4x8xf32, #tpu.memory_space<vmem>>, vector<1x4x8xf32>
    %114 = vector.shape_cast %113 : vector<1x4x8xf32> to vector<4x8xf32>
    %cst_117 = arith.constant dense<0.000000e+00> : vector<4x128xf32>
    %115 = tpu.matmul %114, %92, %cst_117 {dimension_numbers = #tpu.dot_dimension_numbers<[1], [0], [0], [1], [0, 0, 1, 1], [], []>} : vector<4x8xf32>, vector<8x128xf32>, vector<4x128xf32> -> vector<4x128xf32>
    %c3_118 = arith.constant 3 : index
    %c0_119 = arith.constant 0 : index
    %c0_120 = arith.constant 0 : index
    %116 = vector.load %arg12[%c3_118, %c0_119, %c0_120] : memref<4x128x64xf32, #tpu.memory_space<vmem>>, vector<1x128x64xf32>
    %117 = vector.shape_cast %116 : vector<1x128x64xf32> to vector<128x64xf32>
    %cst_121 = arith.constant dense<0.000000e+00> : vector<4x64xf32>
    %118 = tpu.matmul %115, %117, %cst_121 {dimension_numbers = #tpu.dot_dimension_numbers<[1], [0], [0], [1], [0, 0, 1, 1], [], []>} : vector<4x128xf32>, vector<128x64xf32>, vector<4x64xf32> -> vector<4x64xf32>
    %119 = arith.addf %112, %118 : vector<4x64xf32>
    %c0_122 = arith.constant 0 : index
    %c0_123 = arith.constant 0 : index
    %120 = vector.load %arg13[%c0_122, %c0_123] : memref<1x64xf32, #tpu.memory_space<vmem>>, vector<1x64xf32>
    %121 = vector.broadcast %120 : vector<1x64xf32> to vector<4x64xf32>
    %122 = arith.addf %119, %121 : vector<4x64xf32>
    %cst_124 = arith.constant 0.000000e+00 : f32
    %123 = vector.broadcast %cst_124 : f32 to vector<4x64xf32>
    %124 = arith.cmpf oge, %122, %123 : vector<4x64xf32>
    %cst_125 = arith.constant 2.000000e-01 : f32
    %125 = vector.broadcast %cst_125 : f32 to vector<4x64xf32>
    %126 = arith.mulf %125, %122 : vector<4x64xf32>
    %127 = arith.select %124, %122, %126 : vector<4x64xi1>, vector<4x64xf32>
    %c0_126 = arith.constant 0 : index
    %c0_127 = arith.constant 0 : index
    %c0_128 = arith.constant 0 : index
    %128 = vector.load %arg14[%c0_126, %c0_127, %c0_128] : memref<3x4x4xf32, #tpu.memory_space<vmem>>, vector<1x4x4xf32>
    %129 = vector.shape_cast %128 : vector<1x4x4xf32> to vector<4x4xf32>
    %cst_129 = arith.constant dense<0.000000e+00> : vector<4x64xf32>
    %130 = tpu.matmul %129, %127, %cst_129 {dimension_numbers = #tpu.dot_dimension_numbers<[1], [0], [0], [1], [0, 0, 1, 1], [], []>} : vector<4x4xf32>, vector<4x64xf32>, vector<4x64xf32> -> vector<4x64xf32>
    %c0_130 = arith.constant 0 : index
    %c0_131 = arith.constant 0 : index
    %c0_132 = arith.constant 0 : index
    %131 = vector.load %arg15[%c0_130, %c0_131, %c0_132] : memref<3x64x128xf32, #tpu.memory_space<vmem>>, vector<1x64x128xf32>
    %132 = vector.shape_cast %131 : vector<1x64x128xf32> to vector<64x128xf32>
    %cst_133 = arith.constant dense<0.000000e+00> : vector<4x128xf32>
    %133 = tpu.matmul %130, %132, %cst_133 {dimension_numbers = #tpu.dot_dimension_numbers<[1], [0], [0], [1], [0, 0, 1, 1], [], []>} : vector<4x64xf32>, vector<64x128xf32>, vector<4x128xf32> -> vector<4x128xf32>
    %c1_134 = arith.constant 1 : index
    %c0_135 = arith.constant 0 : index
    %c0_136 = arith.constant 0 : index
    %134 = vector.load %arg14[%c1_134, %c0_135, %c0_136] : memref<3x4x4xf32, #tpu.memory_space<vmem>>, vector<1x4x4xf32>
    %135 = vector.shape_cast %134 : vector<1x4x4xf32> to vector<4x4xf32>
    %cst_137 = arith.constant dense<0.000000e+00> : vector<4x64xf32>
    %136 = tpu.matmul %135, %127, %cst_137 {dimension_numbers = #tpu.dot_dimension_numbers<[1], [0], [0], [1], [0, 0, 1, 1], [], []>} : vector<4x4xf32>, vector<4x64xf32>, vector<4x64xf32> -> vector<4x64xf32>
    %c1_138 = arith.constant 1 : index
    %c0_139 = arith.constant 0 : index
    %c0_140 = arith.constant 0 : index
    %137 = vector.load %arg15[%c1_138, %c0_139, %c0_140] : memref<3x64x128xf32, #tpu.memory_space<vmem>>, vector<1x64x128xf32>
    %138 = vector.shape_cast %137 : vector<1x64x128xf32> to vector<64x128xf32>
    %cst_141 = arith.constant dense<0.000000e+00> : vector<4x128xf32>
    %139 = tpu.matmul %136, %138, %cst_141 {dimension_numbers = #tpu.dot_dimension_numbers<[1], [0], [0], [1], [0, 0, 1, 1], [], []>} : vector<4x64xf32>, vector<64x128xf32>, vector<4x128xf32> -> vector<4x128xf32>
    %140 = arith.addf %133, %139 : vector<4x128xf32>
    %c2_142 = arith.constant 2 : index
    %c0_143 = arith.constant 0 : index
    %c0_144 = arith.constant 0 : index
    %141 = vector.load %arg14[%c2_142, %c0_143, %c0_144] : memref<3x4x4xf32, #tpu.memory_space<vmem>>, vector<1x4x4xf32>
    %142 = vector.shape_cast %141 : vector<1x4x4xf32> to vector<4x4xf32>
    %cst_145 = arith.constant dense<0.000000e+00> : vector<4x64xf32>
    %143 = tpu.matmul %142, %127, %cst_145 {dimension_numbers = #tpu.dot_dimension_numbers<[1], [0], [0], [1], [0, 0, 1, 1], [], []>} : vector<4x4xf32>, vector<4x64xf32>, vector<4x64xf32> -> vector<4x64xf32>
    %c2_146 = arith.constant 2 : index
    %c0_147 = arith.constant 0 : index
    %c0_148 = arith.constant 0 : index
    %144 = vector.load %arg15[%c2_146, %c0_147, %c0_148] : memref<3x64x128xf32, #tpu.memory_space<vmem>>, vector<1x64x128xf32>
    %145 = vector.shape_cast %144 : vector<1x64x128xf32> to vector<64x128xf32>
    %cst_149 = arith.constant dense<0.000000e+00> : vector<4x128xf32>
    %146 = tpu.matmul %143, %145, %cst_149 {dimension_numbers = #tpu.dot_dimension_numbers<[1], [0], [0], [1], [0, 0, 1, 1], [], []>} : vector<4x64xf32>, vector<64x128xf32>, vector<4x128xf32> -> vector<4x128xf32>
    %147 = arith.addf %140, %146 : vector<4x128xf32>
    %c0_150 = arith.constant 0 : index
    %c0_151 = arith.constant 0 : index
    %148 = vector.load %arg16[%c0_150, %c0_151] : memref<1x128xf32, #tpu.memory_space<vmem>>, vector<1x128xf32>
    %149 = vector.broadcast %148 : vector<1x128xf32> to vector<4x128xf32>
    %150 = arith.addf %147, %149 : vector<4x128xf32>
    %cst_152 = arith.constant 0.000000e+00 : f32
    %151 = vector.broadcast %cst_152 : f32 to vector<4x128xf32>
    %152 = arith.cmpf oge, %150, %151 : vector<4x128xf32>
    %cst_153 = arith.constant 2.000000e-01 : f32
    %153 = vector.broadcast %cst_153 : f32 to vector<4x128xf32>
    %154 = arith.mulf %153, %150 : vector<4x128xf32>
    %155 = arith.select %152, %150, %154 : vector<4x128xi1>, vector<4x128xf32>
    %c0_154 = arith.constant 0 : index
    %c0_155 = arith.constant 0 : index
    %c0_156 = arith.constant 0 : index
    %156 = vector.load %arg17[%c0_154, %c0_155, %c0_156] : memref<3x4x4xf32, #tpu.memory_space<vmem>>, vector<1x4x4xf32>
    %157 = vector.shape_cast %156 : vector<1x4x4xf32> to vector<4x4xf32>
    %cst_157 = arith.constant dense<0.000000e+00> : vector<4x128xf32>
    %158 = tpu.matmul %157, %155, %cst_157 {dimension_numbers = #tpu.dot_dimension_numbers<[1], [0], [0], [1], [0, 0, 1, 1], [], []>} : vector<4x4xf32>, vector<4x128xf32>, vector<4x128xf32> -> vector<4x128xf32>
    %c0_158 = arith.constant 0 : index
    %c0_159 = arith.constant 0 : index
    %c0_160 = arith.constant 0 : index
    %159 = vector.load %arg18[%c0_158, %c0_159, %c0_160] : memref<3x128x128xf32, #tpu.memory_space<vmem>>, vector<1x128x128xf32>
    %160 = vector.shape_cast %159 : vector<1x128x128xf32> to vector<128x128xf32>
    %cst_161 = arith.constant dense<0.000000e+00> : vector<4x128xf32>
    %161 = tpu.matmul %158, %160, %cst_161 {dimension_numbers = #tpu.dot_dimension_numbers<[1], [0], [0], [1], [0, 0, 1, 1], [], []>} : vector<4x128xf32>, vector<128x128xf32>, vector<4x128xf32> -> vector<4x128xf32>
    %c1_162 = arith.constant 1 : index
    %c0_163 = arith.constant 0 : index
    %c0_164 = arith.constant 0 : index
    %162 = vector.load %arg17[%c1_162, %c0_163, %c0_164] : memref<3x4x4xf32, #tpu.memory_space<vmem>>, vector<1x4x4xf32>
    %163 = vector.shape_cast %162 : vector<1x4x4xf32> to vector<4x4xf32>
    %cst_165 = arith.constant dense<0.000000e+00> : vector<4x128xf32>
    %164 = tpu.matmul %163, %155, %cst_165 {dimension_numbers = #tpu.dot_dimension_numbers<[1], [0], [0], [1], [0, 0, 1, 1], [], []>} : vector<4x4xf32>, vector<4x128xf32>, vector<4x128xf32> -> vector<4x128xf32>
    %c1_166 = arith.constant 1 : index
    %c0_167 = arith.constant 0 : index
    %c0_168 = arith.constant 0 : index
    %165 = vector.load %arg18[%c1_166, %c0_167, %c0_168] : memref<3x128x128xf32, #tpu.memory_space<vmem>>, vector<1x128x128xf32>
    %166 = vector.shape_cast %165 : vector<1x128x128xf32> to vector<128x128xf32>
    %cst_169 = arith.constant dense<0.000000e+00> : vector<4x128xf32>
    %167 = tpu.matmul %164, %166, %cst_169 {dimension_numbers = #tpu.dot_dimension_numbers<[1], [0], [0], [1], [0, 0, 1, 1], [], []>} : vector<4x128xf32>, vector<128x128xf32>, vector<4x128xf32> -> vector<4x128xf32>
    %168 = arith.addf %161, %167 : vector<4x128xf32>
    %c2_170 = arith.constant 2 : index
    %c0_171 = arith.constant 0 : index
    %c0_172 = arith.constant 0 : index
    %169 = vector.load %arg17[%c2_170, %c0_171, %c0_172] : memref<3x4x4xf32, #tpu.memory_space<vmem>>, vector<1x4x4xf32>
    %170 = vector.shape_cast %169 : vector<1x4x4xf32> to vector<4x4xf32>
    %cst_173 = arith.constant dense<0.000000e+00> : vector<4x128xf32>
    %171 = tpu.matmul %170, %155, %cst_173 {dimension_numbers = #tpu.dot_dimension_numbers<[1], [0], [0], [1], [0, 0, 1, 1], [], []>} : vector<4x4xf32>, vector<4x128xf32>, vector<4x128xf32> -> vector<4x128xf32>
    %c2_174 = arith.constant 2 : index
    %c0_175 = arith.constant 0 : index
    %c0_176 = arith.constant 0 : index
    %172 = vector.load %arg18[%c2_174, %c0_175, %c0_176] : memref<3x128x128xf32, #tpu.memory_space<vmem>>, vector<1x128x128xf32>
    %173 = vector.shape_cast %172 : vector<1x128x128xf32> to vector<128x128xf32>
    %cst_177 = arith.constant dense<0.000000e+00> : vector<4x128xf32>
    %174 = tpu.matmul %171, %173, %cst_177 {dimension_numbers = #tpu.dot_dimension_numbers<[1], [0], [0], [1], [0, 0, 1, 1], [], []>} : vector<4x128xf32>, vector<128x128xf32>, vector<4x128xf32> -> vector<4x128xf32>
    %175 = arith.addf %168, %174 : vector<4x128xf32>
    %c0_178 = arith.constant 0 : index
    %c0_179 = arith.constant 0 : index
    %176 = vector.load %arg19[%c0_178, %c0_179] : memref<1x128xf32, #tpu.memory_space<vmem>>, vector<1x128xf32>
    %177 = vector.broadcast %176 : vector<1x128xf32> to vector<4x128xf32>
    %178 = arith.addf %175, %177 : vector<4x128xf32>
    %cst_180 = arith.constant 0.000000e+00 : f32
    %179 = vector.broadcast %cst_180 : f32 to vector<4x128xf32>
    %180 = arith.cmpf oge, %178, %179 : vector<4x128xf32>
    %cst_181 = arith.constant 2.000000e-01 : f32
    %181 = vector.broadcast %cst_181 : f32 to vector<4x128xf32>
    %182 = arith.mulf %181, %178 : vector<4x128xf32>
    %183 = arith.select %180, %178, %182 : vector<4x128xi1>, vector<4x128xf32>
    %c0_182 = arith.constant 0 : index
    %c0_183 = arith.constant 0 : index
    %c0_184 = arith.constant 0 : index
    %184 = vector.load %arg20[%c0_182, %c0_183, %c0_184] : memref<3x4x4xf32, #tpu.memory_space<vmem>>, vector<1x4x4xf32>
    %185 = vector.shape_cast %184 : vector<1x4x4xf32> to vector<4x4xf32>
    %cst_185 = arith.constant dense<0.000000e+00> : vector<4x128xf32>
    %186 = tpu.matmul %185, %183, %cst_185 {dimension_numbers = #tpu.dot_dimension_numbers<[1], [0], [0], [1], [0, 0, 1, 1], [], []>} : vector<4x4xf32>, vector<4x128xf32>, vector<4x128xf32> -> vector<4x128xf32>
    %c0_186 = arith.constant 0 : index
    %c0_187 = arith.constant 0 : index
    %c0_188 = arith.constant 0 : index
    %187 = vector.load %arg21[%c0_186, %c0_187, %c0_188] : memref<3x128x128xf32, #tpu.memory_space<vmem>>, vector<1x128x128xf32>
    %188 = vector.shape_cast %187 : vector<1x128x128xf32> to vector<128x128xf32>
    %cst_189 = arith.constant dense<0.000000e+00> : vector<4x128xf32>
    %189 = tpu.matmul %186, %188, %cst_189 {dimension_numbers = #tpu.dot_dimension_numbers<[1], [0], [0], [1], [0, 0, 1, 1], [], []>} : vector<4x128xf32>, vector<128x128xf32>, vector<4x128xf32> -> vector<4x128xf32>
    %c1_190 = arith.constant 1 : index
    %c0_191 = arith.constant 0 : index
    %c0_192 = arith.constant 0 : index
    %190 = vector.load %arg20[%c1_190, %c0_191, %c0_192] : memref<3x4x4xf32, #tpu.memory_space<vmem>>, vector<1x4x4xf32>
    %191 = vector.shape_cast %190 : vector<1x4x4xf32> to vector<4x4xf32>
    %cst_193 = arith.constant dense<0.000000e+00> : vector<4x128xf32>
    %192 = tpu.matmul %191, %183, %cst_193 {dimension_numbers = #tpu.dot_dimension_numbers<[1], [0], [0], [1], [0, 0, 1, 1], [], []>} : vector<4x4xf32>, vector<4x128xf32>, vector<4x128xf32> -> vector<4x128xf32>
    %c1_194 = arith.constant 1 : index
    %c0_195 = arith.constant 0 : index
    %c0_196 = arith.constant 0 : index
    %193 = vector.load %arg21[%c1_194, %c0_195, %c0_196] : memref<3x128x128xf32, #tpu.memory_space<vmem>>, vector<1x128x128xf32>
    %194 = vector.shape_cast %193 : vector<1x128x128xf32> to vector<128x128xf32>
    %cst_197 = arith.constant dense<0.000000e+00> : vector<4x128xf32>
    %195 = tpu.matmul %192, %194, %cst_197 {dimension_numbers = #tpu.dot_dimension_numbers<[1], [0], [0], [1], [0, 0, 1, 1], [], []>} : vector<4x128xf32>, vector<128x128xf32>, vector<4x128xf32> -> vector<4x128xf32>
    %196 = arith.addf %189, %195 : vector<4x128xf32>
    %c2_198 = arith.constant 2 : index
    %c0_199 = arith.constant 0 : index
    %c0_200 = arith.constant 0 : index
    %197 = vector.load %arg20[%c2_198, %c0_199, %c0_200] : memref<3x4x4xf32, #tpu.memory_space<vmem>>, vector<1x4x4xf32>
    %198 = vector.shape_cast %197 : vector<1x4x4xf32> to vector<4x4xf32>
    %cst_201 = arith.constant dense<0.000000e+00> : vector<4x128xf32>
    %199 = tpu.matmul %198, %183, %cst_201 {dimension_numbers = #tpu.dot_dimension_numbers<[1], [0], [0], [1], [0, 0, 1, 1], [], []>} : vector<4x4xf32>, vector<4x128xf32>, vector<4x128xf32> -> vector<4x128xf32>
    %c2_202 = arith.constant 2 : index
    %c0_203 = arith.constant 0 : index
    %c0_204 = arith.constant 0 : index
    %200 = vector.load %arg21[%c2_202, %c0_203, %c0_204] : memref<3x128x128xf32, #tpu.memory_space<vmem>>, vector<1x128x128xf32>
    %201 = vector.shape_cast %200 : vector<1x128x128xf32> to vector<128x128xf32>
    %cst_205 = arith.constant dense<0.000000e+00> : vector<4x128xf32>
    %202 = tpu.matmul %199, %201, %cst_205 {dimension_numbers = #tpu.dot_dimension_numbers<[1], [0], [0], [1], [0, 0, 1, 1], [], []>} : vector<4x128xf32>, vector<128x128xf32>, vector<4x128xf32> -> vector<4x128xf32>
    %203 = arith.addf %196, %202 : vector<4x128xf32>
    %c0_206 = arith.constant 0 : index
    %c0_207 = arith.constant 0 : index
    %204 = vector.load %arg22[%c0_206, %c0_207] : memref<1x128xf32, #tpu.memory_space<vmem>>, vector<1x128xf32>
    %205 = vector.broadcast %204 : vector<1x128xf32> to vector<4x128xf32>
    %206 = arith.addf %203, %205 : vector<4x128xf32>
    %cst_208 = arith.constant 0.000000e+00 : f32
    %207 = vector.broadcast %cst_208 : f32 to vector<4x128xf32>
    %208 = arith.cmpf oge, %206, %207 : vector<4x128xf32>
    %cst_209 = arith.constant 2.000000e-01 : f32
    %209 = vector.broadcast %cst_209 : f32 to vector<4x128xf32>
    %210 = arith.mulf %209, %206 : vector<4x128xf32>
    %211 = arith.select %208, %206, %210 : vector<4x128xi1>, vector<4x128xf32>
    %c0_210 = arith.constant 0 : index
    %c0_211 = arith.constant 0 : index
    %c0_212 = arith.constant 0 : index
    %212 = vector.load %arg23[%c0_210, %c0_211, %c0_212] : memref<1x4x128xf32, #tpu.memory_space<vmem>>, vector<1x4x128xf32>
    %213 = vector.shape_cast %212 : vector<1x4x128xf32> to vector<4x128xf32>
    %214 = vector.shape_cast %211 : vector<4x128xf32> to vector<1x4x128xf32>
    tpu.vector_store %arg23[%c0_210, %c0_211, %c0_212], %214 {strides = array<i32>} : memref<1x4x128xf32, #tpu.memory_space<vmem>>, vector<1x4x128xf32>,
    return
  }
  func.func @transform_0(%arg0: i32) -> (i32, i32, i32) {
    %c0_i32 = arith.constant 0 : i32
    %c0_i32_0 = arith.constant 0 : i32
    %c0_i32_1 = arith.constant 0 : i32
    return %arg0, %c0_i32, %c0_i32_0 : i32, i32, i32
  }
  func.func @transform_1(%arg0: i32) -> (i32, i32, i32) {
    %c0_i32 = arith.constant 0 : i32
    %c0_i32_0 = arith.constant 0 : i32
    %c0_i32_1 = arith.constant 0 : i32
    %c0_i32_2 = arith.constant 0 : i32
    return %c0_i32, %c0_i32_0, %c0_i32_1 : i32, i32, i32
  }
  func.func @transform_2(%arg0: i32) -> (i32, i32, i32) {
    %c0_i32 = arith.constant 0 : i32
    %c0_i32_0 = arith.constant 0 : i32
    %c0_i32_1 = arith.constant 0 : i32
    %c0_i32_2 = arith.constant 0 : i32
    return %c0_i32, %c0_i32_0, %c0_i32_1 : i32, i32, i32
  }
  func.func @transform_3(%arg0: i32) -> (i32, i32) {
    %c0_i32 = arith.constant 0 : i32
    %c0_i32_0 = arith.constant 0 : i32
    %c0_i32_1 = arith.constant 0 : i32
    return %c0_i32, %c0_i32_0 : i32, i32
  }
  func.func @transform_4(%arg0: i32) -> (i32, i32, i32) {
    %c0_i32 = arith.constant 0 : i32
    %c0_i32_0 = arith.constant 0 : i32
    %c0_i32_1 = arith.constant 0 : i32
    %c0_i32_2 = arith.constant 0 : i32
    return %c0_i32, %c0_i32_0, %c0_i32_1 : i32, i32, i32
  }
  func.func @transform_5(%arg0: i32) -> (i32, i32, i32) {
    %c0_i32 = arith.constant 0 : i32
    %c0_i32_0 = arith.constant 0 : i32
    %c0_i32_1 = arith.constant 0 : i32
    %c0_i32_2 = arith.constant 0 : i32
    return %c0_i32, %c0_i32_0, %c0_i32_1 : i32, i32, i32
  }
  func.func @transform_6(%arg0: i32) -> (i32, i32) {
    %c0_i32 = arith.constant 0 : i32
    %c0_i32_0 = arith.constant 0 : i32
    %c0_i32_1 = arith.constant 0 : i32
    return %c0_i32, %c0_i32_0 : i32, i32
  }
  func.func @transform_7(%arg0: i32) -> (i32, i32, i32) {
    %c0_i32 = arith.constant 0 : i32
    %c0_i32_0 = arith.constant 0 : i32
    %c0_i32_1 = arith.constant 0 : i32
    %c0_i32_2 = arith.constant 0 : i32
    return %c0_i32, %c0_i32_0, %c0_i32_1 : i32, i32, i32
  }
  func.func @transform_8(%arg0: i32) -> (i32, i32, i32) {
    %c0_i32 = arith.constant 0 : i32
    %c0_i32_0 = arith.constant 0 : i32
    %c0_i32_1 = arith.constant 0 : i32
    %c0_i32_2 = arith.constant 0 : i32
    return %c0_i32, %c0_i32_0, %c0_i32_1 : i32, i32, i32
  }
  func.func @transform_9(%arg0: i32) -> (i32, i32) {
    %c0_i32 = arith.constant 0 : i32
    %c0_i32_0 = arith.constant 0 : i32
    %c0_i32_1 = arith.constant 0 : i32
    return %c0_i32, %c0_i32_0 : i32, i32
  }
  func.func @transform_10(%arg0: i32) -> (i32, i32, i32) {
    %c0_i32 = arith.constant 0 : i32
    %c0_i32_0 = arith.constant 0 : i32
    %c0_i32_1 = arith.constant 0 : i32
    %c0_i32_2 = arith.constant 0 : i32
    return %c0_i32, %c0_i32_0, %c0_i32_1 : i32, i32, i32
  }
  func.func @transform_11(%arg0: i32) -> (i32, i32, i32) {
    %c0_i32 = arith.constant 0 : i32
    %c0_i32_0 = arith.constant 0 : i32
    %c0_i32_1 = arith.constant 0 : i32
    %c0_i32_2 = arith.constant 0 : i32
    return %c0_i32, %c0_i32_0, %c0_i32_1 : i32, i32, i32
  }
  func.func @transform_12(%arg0: i32) -> (i32, i32) {
    %c0_i32 = arith.constant 0 : i32
    %c0_i32_0 = arith.constant 0 : i32
    %c0_i32_1 = arith.constant 0 : i32
    return %c0_i32, %c0_i32_0 : i32, i32
  }
  func.func @transform_13(%arg0: i32) -> (i32, i32, i32) {
    %c0_i32 = arith.constant 0 : i32
    %c0_i32_0 = arith.constant 0 : i32
    %c0_i32_1 = arith.constant 0 : i32
    %c0_i32_2 = arith.constant 0 : i32
    return %c0_i32, %c0_i32_0, %c0_i32_1 : i32, i32, i32
  }
  func.func @transform_14(%arg0: i32) -> (i32, i32, i32) {
    %c0_i32 = arith.constant 0 : i32
    %c0_i32_0 = arith.constant 0 : i32
    %c0_i32_1 = arith.constant 0 : i32
    %c0_i32_2 = arith.constant 0 : i32
    return %c0_i32, %c0_i32_0, %c0_i32_1 : i32, i32, i32
  }
  func.func @transform_15(%arg0: i32) -> (i32, i32) {
    %c0_i32 = arith.constant 0 : i32
    %c0_i32_0 = arith.constant 0 : i32
    %c0_i32_1 = arith.constant 0 : i32
    return %c0_i32, %c0_i32_0 : i32, i32
  }
  func.func @transform_16(%arg0: i32) -> (i32, i32, i32) {
    %c0_i32 = arith.constant 0 : i32
    %c0_i32_0 = arith.constant 0 : i32
    %c0_i32_1 = arith.constant 0 : i32
    %c0_i32_2 = arith.constant 0 : i32
    return %c0_i32, %c0_i32_0, %c0_i32_1 : i32, i32, i32
  }
  func.func @transform_17(%arg0: i32) -> (i32, i32, i32) {
    %c0_i32 = arith.constant 0 : i32
    %c0_i32_0 = arith.constant 0 : i32
    %c0_i32_1 = arith.constant 0 : i32
    %c0_i32_2 = arith.constant 0 : i32
    return %c0_i32, %c0_i32_0, %c0_i32_1 : i32, i32, i32
  }
  func.func @transform_18(%arg0: i32) -> (i32, i32) {
    %c0_i32 = arith.constant 0 : i32
    %c0_i32_0 = arith.constant 0 : i32
    %c0_i32_1 = arith.constant 0 : i32
    return %c0_i32, %c0_i32_0 : i32, i32
  }
  func.func @transform_19(%arg0: i32) -> (i32, i32, i32) {
    %c0_i32 = arith.constant 0 : i32
    %c0_i32_0 = arith.constant 0 : i32
    %c0_i32_1 = arith.constant 0 : i32
    %c0_i32_2 = arith.constant 0 : i32
    return %c0_i32, %c0_i32_0, %c0_i32_1 : i32, i32, i32
  }
  func.func @transform_20(%arg0: i32) -> (i32, i32, i32) {
    %c0_i32 = arith.constant 0 : i32
    %c0_i32_0 = arith.constant 0 : i32
    %c0_i32_1 = arith.constant 0 : i32
    %c0_i32_2 = arith.constant 0 : i32
    return %c0_i32, %c0_i32_0, %c0_i32_1 : i32, i32, i32
  }
  func.func @transform_21(%arg0: i32) -> (i32, i32) {
    %c0_i32 = arith.constant 0 : i32
    %c0_i32_0 = arith.constant 0 : i32
    %c0_i32_1 = arith.constant 0 : i32
    return %c0_i32, %c0_i32_0 : i32, i32
  }
  func.func @transform_22(%arg0: i32) -> (i32, i32, i32) {
    %c0_i32 = arith.constant 0 : i32
    %c0_i32_0 = arith.constant 0 : i32
    %c0_i32_1 = arith.constant 0 : i32
    return %arg0, %c0_i32, %c0_i32_0 : i32, i32, i32
  }
}

module attributes {stable_mosaic.version = 11 : i64} {
  func.func @_tail_kernel(%arg0: i32, %arg1: memref<32x32xf32, #tpu.memory_space<vmem>>, %arg2: memref<32x12xf32, #tpu.memory_space<vmem>>, %arg3: memref<32x12xf32, #tpu.memory_space<vmem>>, %arg4: memref<12x32x32xf32, #tpu.memory_space<vmem>>, %arg5: memref<12x1x32xf32, #tpu.memory_space<vmem>>, %arg6: memref<32x4xf32, #tpu.memory_space<vmem>>, %arg7: memref<1x4xf32, #tpu.memory_space<vmem>>, %arg8: memref<1x4xf32, #tpu.memory_space<vmem>>, %arg9: memref<1x1xf32, #tpu.memory_space<vmem>>, %arg10: memref<32x12xf32, #tpu.memory_space<vmem>>, %arg11: memref<12x32x32xf32, #tpu.memory_space<vmem>>, %arg12: memref<32x1xf32, #tpu.memory_space<vmem>>) attributes {dimension_semantics = [#tpu.dimension_semantics<parallel>], iteration_bounds = array<i64: 1>, scalar_prefetch = 0 : i64, scratch_operands = 0 : i64, tpu.core_type = #tpu.core_type<tc>, window_params = [{transform_indices = @transform_0, window_bounds = array<i64: 32, 32>}, {pipeline_mode = #tpu.pipeline_mode<synchronous>, transform_indices = @transform_1, window_bounds = array<i64: 32, 12>}, {transform_indices = @transform_2, window_bounds = array<i64: 32, 12>}, {pipeline_mode = #tpu.pipeline_mode<synchronous>, transform_indices = @transform_3, window_bounds = array<i64: 12, 32, 32>}, {pipeline_mode = #tpu.pipeline_mode<synchronous>, transform_indices = @transform_4, window_bounds = array<i64: 12, 1, 32>}, {pipeline_mode = #tpu.pipeline_mode<synchronous>, transform_indices = @transform_5, window_bounds = array<i64: 32, 4>}, {pipeline_mode = #tpu.pipeline_mode<synchronous>, transform_indices = @transform_6, window_bounds = array<i64: 1, 4>}, {pipeline_mode = #tpu.pipeline_mode<synchronous>, transform_indices = @transform_7, window_bounds = array<i64: 1, 4>}, {pipeline_mode = #tpu.pipeline_mode<synchronous>, transform_indices = @transform_8, window_bounds = array<i64: 1, 1>}, {transform_indices = @transform_9, window_bounds = array<i64: 32, 12>}, {transform_indices = @transform_10, window_bounds = array<i64: 12, 32, 32>}, {transform_indices = @transform_11, window_bounds = array<i64: 32, 1>}]} {
    %c0 = arith.constant 0 : index
    %c0_0 = arith.constant 0 : index
    %0 = vector.load %arg1[%c0, %c0_0] : memref<32x32xf32, #tpu.memory_space<vmem>>, vector<32x32xf32>
    %c0_1 = arith.constant 0 : index
    %c0_2 = arith.constant 0 : index
    %1 = vector.load %arg2[%c0_1, %c0_2] : memref<32x12xf32, #tpu.memory_space<vmem>>, vector<32x12xf32>
    %cst = arith.constant dense<0.000000e+00> : vector<32x12xf32>
    %2 = tpu.matmul %0, %1, %cst {dimension_numbers = #tpu.dot_dimension_numbers<[1], [0], [0], [1], [0, 0, 1, 1], [], []>} : vector<32x32xf32>, vector<32x12xf32>, vector<32x12xf32> -> vector<32x12xf32>
    %cst_3 = arith.constant dense<0xFF800000> : vector<32xf32>
    %3 = vector.multi_reduction <maximumf>, %2, %cst_3 [1] : vector<32x12xf32> to vector<32xf32>
    %4 = vector.shape_cast %3 : vector<32xf32> to vector<32x1xf32>
    %5 = vector.broadcast %4 : vector<32x1xf32> to vector<32x12xf32>
    %6 = arith.subf %2, %5 : vector<32x12xf32>
    %7 = math.exp %6 : vector<32x12xf32>
    %cst_4 = arith.constant dense<0.000000e+00> : vector<32xf32>
    %8 = vector.multi_reduction <add>, %7, %cst_4 [1] : vector<32x12xf32> to vector<32xf32>
    %9 = vector.shape_cast %8 : vector<32xf32> to vector<32x1xf32>
    %10 = tpu.reciprocal %9 {approx = true} : vector<32x1xf32> -> vector<32x1xf32>
    %11 = vector.broadcast %10 : vector<32x1xf32> to vector<32x12xf32>
    %12 = arith.mulf %7, %11 : vector<32x12xf32>
    %c0_5 = arith.constant 0 : index
    %c0_6 = arith.constant 0 : index
    %13 = vector.load %arg10[%c0_5, %c0_6] : memref<32x12xf32, #tpu.memory_space<vmem>>, vector<32x12xf32>
    tpu.vector_store %arg10[%c0_5, %c0_6], %12 {strides = array<i32>} : memref<32x12xf32, #tpu.memory_space<vmem>>, vector<32x12xf32>,
    %cst_7 = arith.constant dense<0xFF800000> : vector<32xf32>
    %14 = vector.multi_reduction <maximumf>, %12, %cst_7 [1] : vector<32x12xf32> to vector<32xf32>
    %15 = vector.shape_cast %14 : vector<32xf32> to vector<32x1xf32>
    %16 = tpu.iota {dimensions = array<i32: 1>} : vector<32x12xi32>
    %17 = vector.broadcast %15 : vector<32x1xf32> to vector<32x12xf32>
    %18 = arith.cmpf oeq, %12, %17 : vector<32x12xf32>
    %c12_i32 = arith.constant 12 : i32
    %19 = vector.broadcast %c12_i32 : i32 to vector<32x12xi32>
    %20 = arith.select %18, %16, %19 : vector<32x12xi1>, vector<32x12xi32>
    %cst_8 = arith.constant dense<2147483647> : vector<32xi32>
    %21 = vector.multi_reduction <minsi>, %20, %cst_8 [1] : vector<32x12xi32> to vector<32xi32>
    %22 = vector.shape_cast %21 : vector<32xi32> to vector<32x1xi32>
    %cst_9 = arith.constant 0.000000e+00 : f32
    %23 = vector.broadcast %cst_9 : f32 to vector<32x32xf32>
    %c0_10 = arith.constant 0 : index
    %c0_11 = arith.constant 0 : index
    %c0_12 = arith.constant 0 : index
    %24 = vector.load %arg4[%c0_10, %c0_11, %c0_12] : memref<12x32x32xf32, #tpu.memory_space<vmem>>, vector<1x32x32xf32>
    %25 = vector.shape_cast %24 : vector<1x32x32xf32> to vector<32x32xf32>
    %cst_13 = arith.constant dense<0.000000e+00> : vector<32x32xf32>
    %26 = tpu.matmul %0, %25, %cst_13 {dimension_numbers = #tpu.dot_dimension_numbers<[1], [0], [0], [1], [0, 0, 1, 1], [], []>} : vector<32x32xf32>, vector<32x32xf32>, vector<32x32xf32> -> vector<32x32xf32>
    %c0_14 = arith.constant 0 : index
    %c0_15 = arith.constant 0 : index
    %c0_16 = arith.constant 0 : index
    %27 = vector.load %arg5[%c0_14, %c0_15, %c0_16] : memref<12x1x32xf32, #tpu.memory_space<vmem>>, vector<1x1x32xf32>
    %28 = vector.shape_cast %27 : vector<1x1x32xf32> to vector<1x32xf32>
    %29 = vector.broadcast %28 : vector<1x32xf32> to vector<32x32xf32>
    %30 = arith.addf %26, %29 : vector<32x32xf32>
    %cst_17 = arith.constant 0.000000e+00 : f32
    %31 = vector.broadcast %cst_17 : f32 to vector<32x32xf32>
    %32 = arith.cmpf oge, %30, %31 : vector<32x32xf32>
    %cst_18 = arith.constant 2.000000e-01 : f32
    %33 = vector.broadcast %cst_18 : f32 to vector<32x32xf32>
    %34 = arith.mulf %33, %30 : vector<32x32xf32>
    %35 = arith.select %32, %30, %34 : vector<32x32xi1>, vector<32x32xf32>
    %c0_19 = arith.constant 0 : index
    %c0_20 = arith.constant 0 : index
    %c0_21 = arith.constant 0 : index
    %36 = vector.load %arg11[%c0_19, %c0_20, %c0_21] : memref<12x32x32xf32, #tpu.memory_space<vmem>>, vector<1x32x32xf32>
    %37 = vector.shape_cast %36 : vector<1x32x32xf32> to vector<32x32xf32>
    %38 = vector.shape_cast %35 : vector<32x32xf32> to vector<1x32x32xf32>
    tpu.vector_store %arg11[%c0_19, %c0_20, %c0_21], %38 {strides = array<i32>} : memref<12x32x32xf32, #tpu.memory_space<vmem>>, vector<1x32x32xf32>,
    %c0_i32 = arith.constant 0 : i32
    %39 = vector.broadcast %c0_i32 : i32 to vector<32x1xi32>
    %40 = arith.cmpi eq, %22, %39 : vector<32x1xi32>
    %cst_22 = arith.constant 0.000000e+00 : f32
    %41 = vector.shape_cast %40 : vector<32x1xi1> to vector<32x1xi1>
    %42 = vector.broadcast %41 : vector<32x1xi1> to vector<32x32xi1>
    %43 = vector.broadcast %cst_22 : f32 to vector<32x32xf32>
    %44 = arith.select %42, %35, %43 : vector<32x32xi1>, vector<32x32xf32>
    %45 = arith.addf %23, %44 : vector<32x32xf32>
    %c1 = arith.constant 1 : index
    %c0_23 = arith.constant 0 : index
    %c0_24 = arith.constant 0 : index
    %46 = vector.load %arg4[%c1, %c0_23, %c0_24] : memref<12x32x32xf32, #tpu.memory_space<vmem>>, vector<1x32x32xf32>
    %47 = vector.shape_cast %46 : vector<1x32x32xf32> to vector<32x32xf32>
    %cst_25 = arith.constant dense<0.000000e+00> : vector<32x32xf32>
    %48 = tpu.matmul %0, %47, %cst_25 {dimension_numbers = #tpu.dot_dimension_numbers<[1], [0], [0], [1], [0, 0, 1, 1], [], []>} : vector<32x32xf32>, vector<32x32xf32>, vector<32x32xf32> -> vector<32x32xf32>
    %c1_26 = arith.constant 1 : index
    %c0_27 = arith.constant 0 : index
    %c0_28 = arith.constant 0 : index
    %49 = vector.load %arg5[%c1_26, %c0_27, %c0_28] : memref<12x1x32xf32, #tpu.memory_space<vmem>>, vector<1x1x32xf32>
    %50 = vector.shape_cast %49 : vector<1x1x32xf32> to vector<1x32xf32>
    %51 = vector.broadcast %50 : vector<1x32xf32> to vector<32x32xf32>
    %52 = arith.addf %48, %51 : vector<32x32xf32>
    %cst_29 = arith.constant 0.000000e+00 : f32
    %53 = vector.broadcast %cst_29 : f32 to vector<32x32xf32>
    %54 = arith.cmpf oge, %52, %53 : vector<32x32xf32>
    %cst_30 = arith.constant 2.000000e-01 : f32
    %55 = vector.broadcast %cst_30 : f32 to vector<32x32xf32>
    %56 = arith.mulf %55, %52 : vector<32x32xf32>
    %57 = arith.select %54, %52, %56 : vector<32x32xi1>, vector<32x32xf32>
    %c1_31 = arith.constant 1 : index
    %c0_32 = arith.constant 0 : index
    %c0_33 = arith.constant 0 : index
    %58 = vector.load %arg11[%c1_31, %c0_32, %c0_33] : memref<12x32x32xf32, #tpu.memory_space<vmem>>, vector<1x32x32xf32>
    %59 = vector.shape_cast %58 : vector<1x32x32xf32> to vector<32x32xf32>
    %60 = vector.shape_cast %57 : vector<32x32xf32> to vector<1x32x32xf32>
    tpu.vector_store %arg11[%c1_31, %c0_32, %c0_33], %60 {strides = array<i32>} : memref<12x32x32xf32, #tpu.memory_space<vmem>>, vector<1x32x32xf32>,
    %c1_i32 = arith.constant 1 : i32
    %61 = vector.broadcast %c1_i32 : i32 to vector<32x1xi32>
    %62 = arith.cmpi eq, %22, %61 : vector<32x1xi32>
    %cst_34 = arith.constant 0.000000e+00 : f32
    %63 = vector.shape_cast %62 : vector<32x1xi1> to vector<32x1xi1>
    %64 = vector.broadcast %63 : vector<32x1xi1> to vector<32x32xi1>
    %65 = vector.broadcast %cst_34 : f32 to vector<32x32xf32>
    %66 = arith.select %64, %57, %65 : vector<32x32xi1>, vector<32x32xf32>
    %67 = arith.addf %45, %66 : vector<32x32xf32>
    %c2 = arith.constant 2 : index
    %c0_35 = arith.constant 0 : index
    %c0_36 = arith.constant 0 : index
    %68 = vector.load %arg4[%c2, %c0_35, %c0_36] : memref<12x32x32xf32, #tpu.memory_space<vmem>>, vector<1x32x32xf32>
    %69 = vector.shape_cast %68 : vector<1x32x32xf32> to vector<32x32xf32>
    %cst_37 = arith.constant dense<0.000000e+00> : vector<32x32xf32>
    %70 = tpu.matmul %0, %69, %cst_37 {dimension_numbers = #tpu.dot_dimension_numbers<[1], [0], [0], [1], [0, 0, 1, 1], [], []>} : vector<32x32xf32>, vector<32x32xf32>, vector<32x32xf32> -> vector<32x32xf32>
    %c2_38 = arith.constant 2 : index
    %c0_39 = arith.constant 0 : index
    %c0_40 = arith.constant 0 : index
    %71 = vector.load %arg5[%c2_38, %c0_39, %c0_40] : memref<12x1x32xf32, #tpu.memory_space<vmem>>, vector<1x1x32xf32>
    %72 = vector.shape_cast %71 : vector<1x1x32xf32> to vector<1x32xf32>
    %73 = vector.broadcast %72 : vector<1x32xf32> to vector<32x32xf32>
    %74 = arith.addf %70, %73 : vector<32x32xf32>
    %cst_41 = arith.constant 0.000000e+00 : f32
    %75 = vector.broadcast %cst_41 : f32 to vector<32x32xf32>
    %76 = arith.cmpf oge, %74, %75 : vector<32x32xf32>
    %cst_42 = arith.constant 2.000000e-01 : f32
    %77 = vector.broadcast %cst_42 : f32 to vector<32x32xf32>
    %78 = arith.mulf %77, %74 : vector<32x32xf32>
    %79 = arith.select %76, %74, %78 : vector<32x32xi1>, vector<32x32xf32>
    %c2_43 = arith.constant 2 : index
    %c0_44 = arith.constant 0 : index
    %c0_45 = arith.constant 0 : index
    %80 = vector.load %arg11[%c2_43, %c0_44, %c0_45] : memref<12x32x32xf32, #tpu.memory_space<vmem>>, vector<1x32x32xf32>
    %81 = vector.shape_cast %80 : vector<1x32x32xf32> to vector<32x32xf32>
    %82 = vector.shape_cast %79 : vector<32x32xf32> to vector<1x32x32xf32>
    tpu.vector_store %arg11[%c2_43, %c0_44, %c0_45], %82 {strides = array<i32>} : memref<12x32x32xf32, #tpu.memory_space<vmem>>, vector<1x32x32xf32>,
    %c2_i32 = arith.constant 2 : i32
    %83 = vector.broadcast %c2_i32 : i32 to vector<32x1xi32>
    %84 = arith.cmpi eq, %22, %83 : vector<32x1xi32>
    %cst_46 = arith.constant 0.000000e+00 : f32
    %85 = vector.shape_cast %84 : vector<32x1xi1> to vector<32x1xi1>
    %86 = vector.broadcast %85 : vector<32x1xi1> to vector<32x32xi1>
    %87 = vector.broadcast %cst_46 : f32 to vector<32x32xf32>
    %88 = arith.select %86, %79, %87 : vector<32x32xi1>, vector<32x32xf32>
    %89 = arith.addf %67, %88 : vector<32x32xf32>
    %c3 = arith.constant 3 : index
    %c0_47 = arith.constant 0 : index
    %c0_48 = arith.constant 0 : index
    %90 = vector.load %arg4[%c3, %c0_47, %c0_48] : memref<12x32x32xf32, #tpu.memory_space<vmem>>, vector<1x32x32xf32>
    %91 = vector.shape_cast %90 : vector<1x32x32xf32> to vector<32x32xf32>
    %cst_49 = arith.constant dense<0.000000e+00> : vector<32x32xf32>
    %92 = tpu.matmul %0, %91, %cst_49 {dimension_numbers = #tpu.dot_dimension_numbers<[1], [0], [0], [1], [0, 0, 1, 1], [], []>} : vector<32x32xf32>, vector<32x32xf32>, vector<32x32xf32> -> vector<32x32xf32>
    %c3_50 = arith.constant 3 : index
    %c0_51 = arith.constant 0 : index
    %c0_52 = arith.constant 0 : index
    %93 = vector.load %arg5[%c3_50, %c0_51, %c0_52] : memref<12x1x32xf32, #tpu.memory_space<vmem>>, vector<1x1x32xf32>
    %94 = vector.shape_cast %93 : vector<1x1x32xf32> to vector<1x32xf32>
    %95 = vector.broadcast %94 : vector<1x32xf32> to vector<32x32xf32>
    %96 = arith.addf %92, %95 : vector<32x32xf32>
    %cst_53 = arith.constant 0.000000e+00 : f32
    %97 = vector.broadcast %cst_53 : f32 to vector<32x32xf32>
    %98 = arith.cmpf oge, %96, %97 : vector<32x32xf32>
    %cst_54 = arith.constant 2.000000e-01 : f32
    %99 = vector.broadcast %cst_54 : f32 to vector<32x32xf32>
    %100 = arith.mulf %99, %96 : vector<32x32xf32>
    %101 = arith.select %98, %96, %100 : vector<32x32xi1>, vector<32x32xf32>
    %c3_55 = arith.constant 3 : index
    %c0_56 = arith.constant 0 : index
    %c0_57 = arith.constant 0 : index
    %102 = vector.load %arg11[%c3_55, %c0_56, %c0_57] : memref<12x32x32xf32, #tpu.memory_space<vmem>>, vector<1x32x32xf32>
    %103 = vector.shape_cast %102 : vector<1x32x32xf32> to vector<32x32xf32>
    %104 = vector.shape_cast %101 : vector<32x32xf32> to vector<1x32x32xf32>
    tpu.vector_store %arg11[%c3_55, %c0_56, %c0_57], %104 {strides = array<i32>} : memref<12x32x32xf32, #tpu.memory_space<vmem>>, vector<1x32x32xf32>,
    %c3_i32 = arith.constant 3 : i32
    %105 = vector.broadcast %c3_i32 : i32 to vector<32x1xi32>
    %106 = arith.cmpi eq, %22, %105 : vector<32x1xi32>
    %cst_58 = arith.constant 0.000000e+00 : f32
    %107 = vector.shape_cast %106 : vector<32x1xi1> to vector<32x1xi1>
    %108 = vector.broadcast %107 : vector<32x1xi1> to vector<32x32xi1>
    %109 = vector.broadcast %cst_58 : f32 to vector<32x32xf32>
    %110 = arith.select %108, %101, %109 : vector<32x32xi1>, vector<32x32xf32>
    %111 = arith.addf %89, %110 : vector<32x32xf32>
    %c4 = arith.constant 4 : index
    %c0_59 = arith.constant 0 : index
    %c0_60 = arith.constant 0 : index
    %112 = vector.load %arg4[%c4, %c0_59, %c0_60] : memref<12x32x32xf32, #tpu.memory_space<vmem>>, vector<1x32x32xf32>
    %113 = vector.shape_cast %112 : vector<1x32x32xf32> to vector<32x32xf32>
    %cst_61 = arith.constant dense<0.000000e+00> : vector<32x32xf32>
    %114 = tpu.matmul %0, %113, %cst_61 {dimension_numbers = #tpu.dot_dimension_numbers<[1], [0], [0], [1], [0, 0, 1, 1], [], []>} : vector<32x32xf32>, vector<32x32xf32>, vector<32x32xf32> -> vector<32x32xf32>
    %c4_62 = arith.constant 4 : index
    %c0_63 = arith.constant 0 : index
    %c0_64 = arith.constant 0 : index
    %115 = vector.load %arg5[%c4_62, %c0_63, %c0_64] : memref<12x1x32xf32, #tpu.memory_space<vmem>>, vector<1x1x32xf32>
    %116 = vector.shape_cast %115 : vector<1x1x32xf32> to vector<1x32xf32>
    %117 = vector.broadcast %116 : vector<1x32xf32> to vector<32x32xf32>
    %118 = arith.addf %114, %117 : vector<32x32xf32>
    %cst_65 = arith.constant 0.000000e+00 : f32
    %119 = vector.broadcast %cst_65 : f32 to vector<32x32xf32>
    %120 = arith.cmpf oge, %118, %119 : vector<32x32xf32>
    %cst_66 = arith.constant 2.000000e-01 : f32
    %121 = vector.broadcast %cst_66 : f32 to vector<32x32xf32>
    %122 = arith.mulf %121, %118 : vector<32x32xf32>
    %123 = arith.select %120, %118, %122 : vector<32x32xi1>, vector<32x32xf32>
    %c4_67 = arith.constant 4 : index
    %c0_68 = arith.constant 0 : index
    %c0_69 = arith.constant 0 : index
    %124 = vector.load %arg11[%c4_67, %c0_68, %c0_69] : memref<12x32x32xf32, #tpu.memory_space<vmem>>, vector<1x32x32xf32>
    %125 = vector.shape_cast %124 : vector<1x32x32xf32> to vector<32x32xf32>
    %126 = vector.shape_cast %123 : vector<32x32xf32> to vector<1x32x32xf32>
    tpu.vector_store %arg11[%c4_67, %c0_68, %c0_69], %126 {strides = array<i32>} : memref<12x32x32xf32, #tpu.memory_space<vmem>>, vector<1x32x32xf32>,
    %c4_i32 = arith.constant 4 : i32
    %127 = vector.broadcast %c4_i32 : i32 to vector<32x1xi32>
    %128 = arith.cmpi eq, %22, %127 : vector<32x1xi32>
    %cst_70 = arith.constant 0.000000e+00 : f32
    %129 = vector.shape_cast %128 : vector<32x1xi1> to vector<32x1xi1>
    %130 = vector.broadcast %129 : vector<32x1xi1> to vector<32x32xi1>
    %131 = vector.broadcast %cst_70 : f32 to vector<32x32xf32>
    %132 = arith.select %130, %123, %131 : vector<32x32xi1>, vector<32x32xf32>
    %133 = arith.addf %111, %132 : vector<32x32xf32>
    %c5 = arith.constant 5 : index
    %c0_71 = arith.constant 0 : index
    %c0_72 = arith.constant 0 : index
    %134 = vector.load %arg4[%c5, %c0_71, %c0_72] : memref<12x32x32xf32, #tpu.memory_space<vmem>>, vector<1x32x32xf32>
    %135 = vector.shape_cast %134 : vector<1x32x32xf32> to vector<32x32xf32>
    %cst_73 = arith.constant dense<0.000000e+00> : vector<32x32xf32>
    %136 = tpu.matmul %0, %135, %cst_73 {dimension_numbers = #tpu.dot_dimension_numbers<[1], [0], [0], [1], [0, 0, 1, 1], [], []>} : vector<32x32xf32>, vector<32x32xf32>, vector<32x32xf32> -> vector<32x32xf32>
    %c5_74 = arith.constant 5 : index
    %c0_75 = arith.constant 0 : index
    %c0_76 = arith.constant 0 : index
    %137 = vector.load %arg5[%c5_74, %c0_75, %c0_76] : memref<12x1x32xf32, #tpu.memory_space<vmem>>, vector<1x1x32xf32>
    %138 = vector.shape_cast %137 : vector<1x1x32xf32> to vector<1x32xf32>
    %139 = vector.broadcast %138 : vector<1x32xf32> to vector<32x32xf32>
    %140 = arith.addf %136, %139 : vector<32x32xf32>
    %cst_77 = arith.constant 0.000000e+00 : f32
    %141 = vector.broadcast %cst_77 : f32 to vector<32x32xf32>
    %142 = arith.cmpf oge, %140, %141 : vector<32x32xf32>
    %cst_78 = arith.constant 2.000000e-01 : f32
    %143 = vector.broadcast %cst_78 : f32 to vector<32x32xf32>
    %144 = arith.mulf %143, %140 : vector<32x32xf32>
    %145 = arith.select %142, %140, %144 : vector<32x32xi1>, vector<32x32xf32>
    %c5_79 = arith.constant 5 : index
    %c0_80 = arith.constant 0 : index
    %c0_81 = arith.constant 0 : index
    %146 = vector.load %arg11[%c5_79, %c0_80, %c0_81] : memref<12x32x32xf32, #tpu.memory_space<vmem>>, vector<1x32x32xf32>
    %147 = vector.shape_cast %146 : vector<1x32x32xf32> to vector<32x32xf32>
    %148 = vector.shape_cast %145 : vector<32x32xf32> to vector<1x32x32xf32>
    tpu.vector_store %arg11[%c5_79, %c0_80, %c0_81], %148 {strides = array<i32>} : memref<12x32x32xf32, #tpu.memory_space<vmem>>, vector<1x32x32xf32>,
    %c5_i32 = arith.constant 5 : i32
    %149 = vector.broadcast %c5_i32 : i32 to vector<32x1xi32>
    %150 = arith.cmpi eq, %22, %149 : vector<32x1xi32>
    %cst_82 = arith.constant 0.000000e+00 : f32
    %151 = vector.shape_cast %150 : vector<32x1xi1> to vector<32x1xi1>
    %152 = vector.broadcast %151 : vector<32x1xi1> to vector<32x32xi1>
    %153 = vector.broadcast %cst_82 : f32 to vector<32x32xf32>
    %154 = arith.select %152, %145, %153 : vector<32x32xi1>, vector<32x32xf32>
    %155 = arith.addf %133, %154 : vector<32x32xf32>
    %c6 = arith.constant 6 : index
    %c0_83 = arith.constant 0 : index
    %c0_84 = arith.constant 0 : index
    %156 = vector.load %arg4[%c6, %c0_83, %c0_84] : memref<12x32x32xf32, #tpu.memory_space<vmem>>, vector<1x32x32xf32>
    %157 = vector.shape_cast %156 : vector<1x32x32xf32> to vector<32x32xf32>
    %cst_85 = arith.constant dense<0.000000e+00> : vector<32x32xf32>
    %158 = tpu.matmul %0, %157, %cst_85 {dimension_numbers = #tpu.dot_dimension_numbers<[1], [0], [0], [1], [0, 0, 1, 1], [], []>} : vector<32x32xf32>, vector<32x32xf32>, vector<32x32xf32> -> vector<32x32xf32>
    %c6_86 = arith.constant 6 : index
    %c0_87 = arith.constant 0 : index
    %c0_88 = arith.constant 0 : index
    %159 = vector.load %arg5[%c6_86, %c0_87, %c0_88] : memref<12x1x32xf32, #tpu.memory_space<vmem>>, vector<1x1x32xf32>
    %160 = vector.shape_cast %159 : vector<1x1x32xf32> to vector<1x32xf32>
    %161 = vector.broadcast %160 : vector<1x32xf32> to vector<32x32xf32>
    %162 = arith.addf %158, %161 : vector<32x32xf32>
    %cst_89 = arith.constant 0.000000e+00 : f32
    %163 = vector.broadcast %cst_89 : f32 to vector<32x32xf32>
    %164 = arith.cmpf oge, %162, %163 : vector<32x32xf32>
    %cst_90 = arith.constant 2.000000e-01 : f32
    %165 = vector.broadcast %cst_90 : f32 to vector<32x32xf32>
    %166 = arith.mulf %165, %162 : vector<32x32xf32>
    %167 = arith.select %164, %162, %166 : vector<32x32xi1>, vector<32x32xf32>
    %c6_91 = arith.constant 6 : index
    %c0_92 = arith.constant 0 : index
    %c0_93 = arith.constant 0 : index
    %168 = vector.load %arg11[%c6_91, %c0_92, %c0_93] : memref<12x32x32xf32, #tpu.memory_space<vmem>>, vector<1x32x32xf32>
    %169 = vector.shape_cast %168 : vector<1x32x32xf32> to vector<32x32xf32>
    %170 = vector.shape_cast %167 : vector<32x32xf32> to vector<1x32x32xf32>
    tpu.vector_store %arg11[%c6_91, %c0_92, %c0_93], %170 {strides = array<i32>} : memref<12x32x32xf32, #tpu.memory_space<vmem>>, vector<1x32x32xf32>,
    %c6_i32 = arith.constant 6 : i32
    %171 = vector.broadcast %c6_i32 : i32 to vector<32x1xi32>
    %172 = arith.cmpi eq, %22, %171 : vector<32x1xi32>
    %cst_94 = arith.constant 0.000000e+00 : f32
    %173 = vector.shape_cast %172 : vector<32x1xi1> to vector<32x1xi1>
    %174 = vector.broadcast %173 : vector<32x1xi1> to vector<32x32xi1>
    %175 = vector.broadcast %cst_94 : f32 to vector<32x32xf32>
    %176 = arith.select %174, %167, %175 : vector<32x32xi1>, vector<32x32xf32>
    %177 = arith.addf %155, %176 : vector<32x32xf32>
    %c7 = arith.constant 7 : index
    %c0_95 = arith.constant 0 : index
    %c0_96 = arith.constant 0 : index
    %178 = vector.load %arg4[%c7, %c0_95, %c0_96] : memref<12x32x32xf32, #tpu.memory_space<vmem>>, vector<1x32x32xf32>
    %179 = vector.shape_cast %178 : vector<1x32x32xf32> to vector<32x32xf32>
    %cst_97 = arith.constant dense<0.000000e+00> : vector<32x32xf32>
    %180 = tpu.matmul %0, %179, %cst_97 {dimension_numbers = #tpu.dot_dimension_numbers<[1], [0], [0], [1], [0, 0, 1, 1], [], []>} : vector<32x32xf32>, vector<32x32xf32>, vector<32x32xf32> -> vector<32x32xf32>
    %c7_98 = arith.constant 7 : index
    %c0_99 = arith.constant 0 : index
    %c0_100 = arith.constant 0 : index
    %181 = vector.load %arg5[%c7_98, %c0_99, %c0_100] : memref<12x1x32xf32, #tpu.memory_space<vmem>>, vector<1x1x32xf32>
    %182 = vector.shape_cast %181 : vector<1x1x32xf32> to vector<1x32xf32>
    %183 = vector.broadcast %182 : vector<1x32xf32> to vector<32x32xf32>
    %184 = arith.addf %180, %183 : vector<32x32xf32>
    %cst_101 = arith.constant 0.000000e+00 : f32
    %185 = vector.broadcast %cst_101 : f32 to vector<32x32xf32>
    %186 = arith.cmpf oge, %184, %185 : vector<32x32xf32>
    %cst_102 = arith.constant 2.000000e-01 : f32
    %187 = vector.broadcast %cst_102 : f32 to vector<32x32xf32>
    %188 = arith.mulf %187, %184 : vector<32x32xf32>
    %189 = arith.select %186, %184, %188 : vector<32x32xi1>, vector<32x32xf32>
    %c7_103 = arith.constant 7 : index
    %c0_104 = arith.constant 0 : index
    %c0_105 = arith.constant 0 : index
    %190 = vector.load %arg11[%c7_103, %c0_104, %c0_105] : memref<12x32x32xf32, #tpu.memory_space<vmem>>, vector<1x32x32xf32>
    %191 = vector.shape_cast %190 : vector<1x32x32xf32> to vector<32x32xf32>
    %192 = vector.shape_cast %189 : vector<32x32xf32> to vector<1x32x32xf32>
    tpu.vector_store %arg11[%c7_103, %c0_104, %c0_105], %192 {strides = array<i32>} : memref<12x32x32xf32, #tpu.memory_space<vmem>>, vector<1x32x32xf32>,
    %c7_i32 = arith.constant 7 : i32
    %193 = vector.broadcast %c7_i32 : i32 to vector<32x1xi32>
    %194 = arith.cmpi eq, %22, %193 : vector<32x1xi32>
    %cst_106 = arith.constant 0.000000e+00 : f32
    %195 = vector.shape_cast %194 : vector<32x1xi1> to vector<32x1xi1>
    %196 = vector.broadcast %195 : vector<32x1xi1> to vector<32x32xi1>
    %197 = vector.broadcast %cst_106 : f32 to vector<32x32xf32>
    %198 = arith.select %196, %189, %197 : vector<32x32xi1>, vector<32x32xf32>
    %199 = arith.addf %177, %198 : vector<32x32xf32>
    %c8 = arith.constant 8 : index
    %c0_107 = arith.constant 0 : index
    %c0_108 = arith.constant 0 : index
    %200 = vector.load %arg4[%c8, %c0_107, %c0_108] : memref<12x32x32xf32, #tpu.memory_space<vmem>>, vector<1x32x32xf32>
    %201 = vector.shape_cast %200 : vector<1x32x32xf32> to vector<32x32xf32>
    %cst_109 = arith.constant dense<0.000000e+00> : vector<32x32xf32>
    %202 = tpu.matmul %0, %201, %cst_109 {dimension_numbers = #tpu.dot_dimension_numbers<[1], [0], [0], [1], [0, 0, 1, 1], [], []>} : vector<32x32xf32>, vector<32x32xf32>, vector<32x32xf32> -> vector<32x32xf32>
    %c8_110 = arith.constant 8 : index
    %c0_111 = arith.constant 0 : index
    %c0_112 = arith.constant 0 : index
    %203 = vector.load %arg5[%c8_110, %c0_111, %c0_112] : memref<12x1x32xf32, #tpu.memory_space<vmem>>, vector<1x1x32xf32>
    %204 = vector.shape_cast %203 : vector<1x1x32xf32> to vector<1x32xf32>
    %205 = vector.broadcast %204 : vector<1x32xf32> to vector<32x32xf32>
    %206 = arith.addf %202, %205 : vector<32x32xf32>
    %cst_113 = arith.constant 0.000000e+00 : f32
    %207 = vector.broadcast %cst_113 : f32 to vector<32x32xf32>
    %208 = arith.cmpf oge, %206, %207 : vector<32x32xf32>
    %cst_114 = arith.constant 2.000000e-01 : f32
    %209 = vector.broadcast %cst_114 : f32 to vector<32x32xf32>
    %210 = arith.mulf %209, %206 : vector<32x32xf32>
    %211 = arith.select %208, %206, %210 : vector<32x32xi1>, vector<32x32xf32>
    %c8_115 = arith.constant 8 : index
    %c0_116 = arith.constant 0 : index
    %c0_117 = arith.constant 0 : index
    %212 = vector.load %arg11[%c8_115, %c0_116, %c0_117] : memref<12x32x32xf32, #tpu.memory_space<vmem>>, vector<1x32x32xf32>
    %213 = vector.shape_cast %212 : vector<1x32x32xf32> to vector<32x32xf32>
    %214 = vector.shape_cast %211 : vector<32x32xf32> to vector<1x32x32xf32>
    tpu.vector_store %arg11[%c8_115, %c0_116, %c0_117], %214 {strides = array<i32>} : memref<12x32x32xf32, #tpu.memory_space<vmem>>, vector<1x32x32xf32>,
    %c8_i32 = arith.constant 8 : i32
    %215 = vector.broadcast %c8_i32 : i32 to vector<32x1xi32>
    %216 = arith.cmpi eq, %22, %215 : vector<32x1xi32>
    %cst_118 = arith.constant 0.000000e+00 : f32
    %217 = vector.shape_cast %216 : vector<32x1xi1> to vector<32x1xi1>
    %218 = vector.broadcast %217 : vector<32x1xi1> to vector<32x32xi1>
    %219 = vector.broadcast %cst_118 : f32 to vector<32x32xf32>
    %220 = arith.select %218, %211, %219 : vector<32x32xi1>, vector<32x32xf32>
    %221 = arith.addf %199, %220 : vector<32x32xf32>
    %c9 = arith.constant 9 : index
    %c0_119 = arith.constant 0 : index
    %c0_120 = arith.constant 0 : index
    %222 = vector.load %arg4[%c9, %c0_119, %c0_120] : memref<12x32x32xf32, #tpu.memory_space<vmem>>, vector<1x32x32xf32>
    %223 = vector.shape_cast %222 : vector<1x32x32xf32> to vector<32x32xf32>
    %cst_121 = arith.constant dense<0.000000e+00> : vector<32x32xf32>
    %224 = tpu.matmul %0, %223, %cst_121 {dimension_numbers = #tpu.dot_dimension_numbers<[1], [0], [0], [1], [0, 0, 1, 1], [], []>} : vector<32x32xf32>, vector<32x32xf32>, vector<32x32xf32> -> vector<32x32xf32>
    %c9_122 = arith.constant 9 : index
    %c0_123 = arith.constant 0 : index
    %c0_124 = arith.constant 0 : index
    %225 = vector.load %arg5[%c9_122, %c0_123, %c0_124] : memref<12x1x32xf32, #tpu.memory_space<vmem>>, vector<1x1x32xf32>
    %226 = vector.shape_cast %225 : vector<1x1x32xf32> to vector<1x32xf32>
    %227 = vector.broadcast %226 : vector<1x32xf32> to vector<32x32xf32>
    %228 = arith.addf %224, %227 : vector<32x32xf32>
    %cst_125 = arith.constant 0.000000e+00 : f32
    %229 = vector.broadcast %cst_125 : f32 to vector<32x32xf32>
    %230 = arith.cmpf oge, %228, %229 : vector<32x32xf32>
    %cst_126 = arith.constant 2.000000e-01 : f32
    %231 = vector.broadcast %cst_126 : f32 to vector<32x32xf32>
    %232 = arith.mulf %231, %228 : vector<32x32xf32>
    %233 = arith.select %230, %228, %232 : vector<32x32xi1>, vector<32x32xf32>
    %c9_127 = arith.constant 9 : index
    %c0_128 = arith.constant 0 : index
    %c0_129 = arith.constant 0 : index
    %234 = vector.load %arg11[%c9_127, %c0_128, %c0_129] : memref<12x32x32xf32, #tpu.memory_space<vmem>>, vector<1x32x32xf32>
    %235 = vector.shape_cast %234 : vector<1x32x32xf32> to vector<32x32xf32>
    %236 = vector.shape_cast %233 : vector<32x32xf32> to vector<1x32x32xf32>
    tpu.vector_store %arg11[%c9_127, %c0_128, %c0_129], %236 {strides = array<i32>} : memref<12x32x32xf32, #tpu.memory_space<vmem>>, vector<1x32x32xf32>,
    %c9_i32 = arith.constant 9 : i32
    %237 = vector.broadcast %c9_i32 : i32 to vector<32x1xi32>
    %238 = arith.cmpi eq, %22, %237 : vector<32x1xi32>
    %cst_130 = arith.constant 0.000000e+00 : f32
    %239 = vector.shape_cast %238 : vector<32x1xi1> to vector<32x1xi1>
    %240 = vector.broadcast %239 : vector<32x1xi1> to vector<32x32xi1>
    %241 = vector.broadcast %cst_130 : f32 to vector<32x32xf32>
    %242 = arith.select %240, %233, %241 : vector<32x32xi1>, vector<32x32xf32>
    %243 = arith.addf %221, %242 : vector<32x32xf32>
    %c10 = arith.constant 10 : index
    %c0_131 = arith.constant 0 : index
    %c0_132 = arith.constant 0 : index
    %244 = vector.load %arg4[%c10, %c0_131, %c0_132] : memref<12x32x32xf32, #tpu.memory_space<vmem>>, vector<1x32x32xf32>
    %245 = vector.shape_cast %244 : vector<1x32x32xf32> to vector<32x32xf32>
    %cst_133 = arith.constant dense<0.000000e+00> : vector<32x32xf32>
    %246 = tpu.matmul %0, %245, %cst_133 {dimension_numbers = #tpu.dot_dimension_numbers<[1], [0], [0], [1], [0, 0, 1, 1], [], []>} : vector<32x32xf32>, vector<32x32xf32>, vector<32x32xf32> -> vector<32x32xf32>
    %c10_134 = arith.constant 10 : index
    %c0_135 = arith.constant 0 : index
    %c0_136 = arith.constant 0 : index
    %247 = vector.load %arg5[%c10_134, %c0_135, %c0_136] : memref<12x1x32xf32, #tpu.memory_space<vmem>>, vector<1x1x32xf32>
    %248 = vector.shape_cast %247 : vector<1x1x32xf32> to vector<1x32xf32>
    %249 = vector.broadcast %248 : vector<1x32xf32> to vector<32x32xf32>
    %250 = arith.addf %246, %249 : vector<32x32xf32>
    %cst_137 = arith.constant 0.000000e+00 : f32
    %251 = vector.broadcast %cst_137 : f32 to vector<32x32xf32>
    %252 = arith.cmpf oge, %250, %251 : vector<32x32xf32>
    %cst_138 = arith.constant 2.000000e-01 : f32
    %253 = vector.broadcast %cst_138 : f32 to vector<32x32xf32>
    %254 = arith.mulf %253, %250 : vector<32x32xf32>
    %255 = arith.select %252, %250, %254 : vector<32x32xi1>, vector<32x32xf32>
    %c10_139 = arith.constant 10 : index
    %c0_140 = arith.constant 0 : index
    %c0_141 = arith.constant 0 : index
    %256 = vector.load %arg11[%c10_139, %c0_140, %c0_141] : memref<12x32x32xf32, #tpu.memory_space<vmem>>, vector<1x32x32xf32>
    %257 = vector.shape_cast %256 : vector<1x32x32xf32> to vector<32x32xf32>
    %258 = vector.shape_cast %255 : vector<32x32xf32> to vector<1x32x32xf32>
    tpu.vector_store %arg11[%c10_139, %c0_140, %c0_141], %258 {strides = array<i32>} : memref<12x32x32xf32, #tpu.memory_space<vmem>>, vector<1x32x32xf32>,
    %c10_i32 = arith.constant 10 : i32
    %259 = vector.broadcast %c10_i32 : i32 to vector<32x1xi32>
    %260 = arith.cmpi eq, %22, %259 : vector<32x1xi32>
    %cst_142 = arith.constant 0.000000e+00 : f32
    %261 = vector.shape_cast %260 : vector<32x1xi1> to vector<32x1xi1>
    %262 = vector.broadcast %261 : vector<32x1xi1> to vector<32x32xi1>
    %263 = vector.broadcast %cst_142 : f32 to vector<32x32xf32>
    %264 = arith.select %262, %255, %263 : vector<32x32xi1>, vector<32x32xf32>
    %265 = arith.addf %243, %264 : vector<32x32xf32>
    %c11 = arith.constant 11 : index
    %c0_143 = arith.constant 0 : index
    %c0_144 = arith.constant 0 : index
    %266 = vector.load %arg4[%c11, %c0_143, %c0_144] : memref<12x32x32xf32, #tpu.memory_space<vmem>>, vector<1x32x32xf32>
    %267 = vector.shape_cast %266 : vector<1x32x32xf32> to vector<32x32xf32>
    %cst_145 = arith.constant dense<0.000000e+00> : vector<32x32xf32>
    %268 = tpu.matmul %0, %267, %cst_145 {dimension_numbers = #tpu.dot_dimension_numbers<[1], [0], [0], [1], [0, 0, 1, 1], [], []>} : vector<32x32xf32>, vector<32x32xf32>, vector<32x32xf32> -> vector<32x32xf32>
    %c11_146 = arith.constant 11 : index
    %c0_147 = arith.constant 0 : index
    %c0_148 = arith.constant 0 : index
    %269 = vector.load %arg5[%c11_146, %c0_147, %c0_148] : memref<12x1x32xf32, #tpu.memory_space<vmem>>, vector<1x1x32xf32>
    %270 = vector.shape_cast %269 : vector<1x1x32xf32> to vector<1x32xf32>
    %271 = vector.broadcast %270 : vector<1x32xf32> to vector<32x32xf32>
    %272 = arith.addf %268, %271 : vector<32x32xf32>
    %cst_149 = arith.constant 0.000000e+00 : f32
    %273 = vector.broadcast %cst_149 : f32 to vector<32x32xf32>
    %274 = arith.cmpf oge, %272, %273 : vector<32x32xf32>
    %cst_150 = arith.constant 2.000000e-01 : f32
    %275 = vector.broadcast %cst_150 : f32 to vector<32x32xf32>
    %276 = arith.mulf %275, %272 : vector<32x32xf32>
    %277 = arith.select %274, %272, %276 : vector<32x32xi1>, vector<32x32xf32>
    %c11_151 = arith.constant 11 : index
    %c0_152 = arith.constant 0 : index
    %c0_153 = arith.constant 0 : index
    %278 = vector.load %arg11[%c11_151, %c0_152, %c0_153] : memref<12x32x32xf32, #tpu.memory_space<vmem>>, vector<1x32x32xf32>
    %279 = vector.shape_cast %278 : vector<1x32x32xf32> to vector<32x32xf32>
    %280 = vector.shape_cast %277 : vector<32x32xf32> to vector<1x32x32xf32>
    tpu.vector_store %arg11[%c11_151, %c0_152, %c0_153], %280 {strides = array<i32>} : memref<12x32x32xf32, #tpu.memory_space<vmem>>, vector<1x32x32xf32>,
    %c11_i32 = arith.constant 11 : i32
    %281 = vector.broadcast %c11_i32 : i32 to vector<32x1xi32>
    %282 = arith.cmpi eq, %22, %281 : vector<32x1xi32>
    %cst_154 = arith.constant 0.000000e+00 : f32
    %283 = vector.shape_cast %282 : vector<32x1xi1> to vector<32x1xi1>
    %284 = vector.broadcast %283 : vector<32x1xi1> to vector<32x32xi1>
    %285 = vector.broadcast %cst_154 : f32 to vector<32x32xf32>
    %286 = arith.select %284, %277, %285 : vector<32x32xi1>, vector<32x32xf32>
    %287 = arith.addf %265, %286 : vector<32x32xf32>
    %c0_155 = arith.constant 0 : index
    %c0_156 = arith.constant 0 : index
    %288 = vector.load %arg6[%c0_155, %c0_156] : memref<32x4xf32, #tpu.memory_space<vmem>>, vector<32x4xf32>
    %cst_157 = arith.constant dense<0.000000e+00> : vector<32x4xf32>
    %289 = tpu.matmul %287, %288, %cst_157 {dimension_numbers = #tpu.dot_dimension_numbers<[1], [0], [0], [1], [0, 0, 1, 1], [], []>} : vector<32x32xf32>, vector<32x4xf32>, vector<32x4xf32> -> vector<32x4xf32>
    %c0_158 = arith.constant 0 : index
    %c0_159 = arith.constant 0 : index
    %290 = vector.load %arg7[%c0_158, %c0_159] : memref<1x4xf32, #tpu.memory_space<vmem>>, vector<1x4xf32>
    %291 = vector.broadcast %290 : vector<1x4xf32> to vector<32x4xf32>
    %292 = arith.addf %289, %291 : vector<32x4xf32>
    %cst_160 = arith.constant 0.000000e+00 : f32
    %293 = vector.broadcast %cst_160 : f32 to vector<32x4xf32>
    %294 = arith.cmpf oge, %292, %293 : vector<32x4xf32>
    %cst_161 = arith.constant 2.000000e-01 : f32
    %295 = vector.broadcast %cst_161 : f32 to vector<32x4xf32>
    %296 = arith.mulf %295, %292 : vector<32x4xf32>
    %297 = arith.select %294, %292, %296 : vector<32x4xi1>, vector<32x4xf32>
    %c0_162 = arith.constant 0 : index
    %c0_163 = arith.constant 0 : index
    %298 = vector.load %arg8[%c0_162, %c0_163] : memref<1x4xf32, #tpu.memory_space<vmem>>, vector<1x4xf32>
    %299 = vector.broadcast %298 : vector<1x4xf32> to vector<32x4xf32>
    %300 = arith.mulf %297, %299 : vector<32x4xf32>
    %cst_164 = arith.constant dense<0.000000e+00> : vector<32xf32>
    %301 = vector.multi_reduction <add>, %300, %cst_164 [1] : vector<32x4xf32> to vector<32xf32>
    %302 = vector.shape_cast %301 : vector<32xf32> to vector<32x1xf32>
    %c0_165 = arith.constant 0 : index
    %c0_166 = arith.constant 0 : index
    %303 = vector.load %arg9[%c0_165, %c0_166] : memref<1x1xf32, #tpu.memory_space<vmem>>, vector<1x1xf32>
    %304 = vector.broadcast %303 : vector<1x1xf32> to vector<32x1xf32>
    %305 = arith.addf %302, %304 : vector<32x1xf32>
    %c0_167 = arith.constant 0 : index
    %c0_168 = arith.constant 0 : index
    %306 = vector.load %arg12[%c0_167, %c0_168] : memref<32x1xf32, #tpu.memory_space<vmem>>, vector<32x1xf32>
    tpu.vector_store %arg12[%c0_167, %c0_168], %305 {strides = array<i32>} : memref<32x1xf32, #tpu.memory_space<vmem>>, vector<32x1xf32>,
    return
  }
  func.func @transform_0(%arg0: i32) -> (i32, i32) {
    %c0_i32 = arith.constant 0 : i32
    %c0_i32_0 = arith.constant 0 : i32
    return %arg0, %c0_i32 : i32, i32
  }
  func.func @transform_1(%arg0: i32) -> (i32, i32) {
    %c0_i32 = arith.constant 0 : i32
    %c0_i32_0 = arith.constant 0 : i32
    %c0_i32_1 = arith.constant 0 : i32
    return %c0_i32, %c0_i32_0 : i32, i32
  }
  func.func @transform_2(%arg0: i32) -> (i32, i32) {
    %c0_i32 = arith.constant 0 : i32
    %c0_i32_0 = arith.constant 0 : i32
    return %arg0, %c0_i32 : i32, i32
  }
  func.func @transform_3(%arg0: i32) -> (i32, i32, i32) {
    %c0_i32 = arith.constant 0 : i32
    %c0_i32_0 = arith.constant 0 : i32
    %c0_i32_1 = arith.constant 0 : i32
    %c0_i32_2 = arith.constant 0 : i32
    return %c0_i32, %c0_i32_0, %c0_i32_1 : i32, i32, i32
  }
  func.func @transform_4(%arg0: i32) -> (i32, i32, i32) {
    %c0_i32 = arith.constant 0 : i32
    %c0_i32_0 = arith.constant 0 : i32
    %c0_i32_1 = arith.constant 0 : i32
    %c0_i32_2 = arith.constant 0 : i32
    return %c0_i32, %c0_i32_0, %c0_i32_1 : i32, i32, i32
  }
  func.func @transform_5(%arg0: i32) -> (i32, i32) {
    %c0_i32 = arith.constant 0 : i32
    %c0_i32_0 = arith.constant 0 : i32
    %c0_i32_1 = arith.constant 0 : i32
    return %c0_i32, %c0_i32_0 : i32, i32
  }
  func.func @transform_6(%arg0: i32) -> (i32, i32) {
    %c0_i32 = arith.constant 0 : i32
    %c0_i32_0 = arith.constant 0 : i32
    %c0_i32_1 = arith.constant 0 : i32
    return %c0_i32, %c0_i32_0 : i32, i32
  }
  func.func @transform_7(%arg0: i32) -> (i32, i32) {
    %c0_i32 = arith.constant 0 : i32
    %c0_i32_0 = arith.constant 0 : i32
    %c0_i32_1 = arith.constant 0 : i32
    return %c0_i32, %c0_i32_0 : i32, i32
  }
  func.func @transform_8(%arg0: i32) -> (i32, i32) {
    %c0_i32 = arith.constant 0 : i32
    %c0_i32_0 = arith.constant 0 : i32
    %c0_i32_1 = arith.constant 0 : i32
    return %c0_i32, %c0_i32_0 : i32, i32
  }
  func.func @transform_9(%arg0: i32) -> (i32, i32) {
    %c0_i32 = arith.constant 0 : i32
    %c0_i32_0 = arith.constant 0 : i32
    return %arg0, %c0_i32 : i32, i32
  }
  func.func @transform_10(%arg0: i32) -> (i32, i32, i32) {
    %c0_i32 = arith.constant 0 : i32
    %c0_i32_0 = arith.constant 0 : i32
    %c0_i32_1 = arith.constant 0 : i32
    return %c0_i32, %arg0, %c0_i32_0 : i32, i32, i32
  }
  func.func @transform_11(%arg0: i32) -> (i32, i32) {
    %c0_i32 = arith.constant 0 : i32
    %c0_i32_0 = arith.constant 0 : i32
    return %arg0, %c0_i32 : i32, i32
  }
}

</mosaic_0001>

<bundles_post_ra>
// kernel: tile.38
= control target key start
LH: loop header
LB: loop body
LE: loop exit
PB: predicated region body
PF: predicated region fallthrough
CT: control target
= control target key end

     0   :  { %s28_s0 = inlined_call_operand.vmem [shape: f32[8], index: 0, kind: input, shape index: {}]   ;;  %s29_s1 = inlined_call_operand.vmem [shape: f32[16,8], index: 1, kind: output, shape index: {}]  }
   0x1   :  { %v4_v0 = vld [vmem:[%s28_s0] ss:$0 sm:$0xff] }
   0x2   :  { %5 = vst [vmem:[%s29_s1] sm:$0xff] %v4_v0  ;;  %8 = vst [vmem:[%s29_s1 + $0x8] sm:$0xff] %v4_v0 }

// kernel: tile.39
= control target key start
LH: loop header
LB: loop body
LE: loop exit
PB: predicated region body
PF: predicated region fallthrough
CT: control target
= control target key end

     0   :  { %s131_s10 = smov 120   ;;  %s132_s11 = smov 104   ;;  %vm3_vm0 = vcmask 64512   ;;  %vm9_vm1 = vcmask 1048512   ;;  %vm15_vm2 = vcmask 982912   ;;  %vm21_vm3 = vcmask 917312   ;;  %s207_s0 = inlined_call_operand.vmem [shape: f32[16,8], index: 0, kind: input, shape index: {}]   ;;  %s208_s1 = inlined_call_operand.vmem [shape: f32[1,128], index: 1, kind: output, shape index: {}]  }
   0x1   :  { %v101_v0 = vld [vmem:[%s207_s0 + $0xf] sm:$0x1]   ;;  %v103_v1 = vld [vmem:[%s207_s0 + $0xd] sm:$0x1]   ;;  %v102_v2 = vld [vmem:[%s207_s0 + $0xe] sm:$0x1]  }
   0x2   :  { %7 = vrot.lane.b32.xlu0 %v101_v0, %s131_s10  ;;  %19 = vrot.lane.b32.xlu1 %v103_v1, %s132_s11  ;;  %v104_v3 = vld [vmem:[%s207_s0 + $0xc] sm:$0x1]   ;;  %s133_s16 = smov 112   ;;  %s134_s17 = smov 96   ;;  %v105_v4 = vld [vmem:[%s207_s0 + $0xb] sm:$0x1]  }
   0x3   :  { %v106_v5 = vld [vmem:[%s207_s0 + $0xa] sm:$0x1]   ;;  %v2_v6 = vld [vmem:[%s207_s0] sm:$0x1]   ;;  %s135_s24 = smov 88   ;;  %s136_s25 = smov 80  }
   0x4   :  { %4 = vst.msk [vmem:[#allocation0] sm:$0x1] %vm3_vm0, %v2_v6   ;;  %v107_v7 = vld [vmem:[%s207_s0 + $0x9] sm:$0x1]   ;;  %v108_v8 = vld [vmem:[%s207_s0 + $0x8] sm:$0x1]  }
   0x5   :  { %s137_s30 = smov 72   ;;  %s138_s2 = smov 64   ;;  %v109_v9 = vld [vmem:[%s207_s0 + $0x7] sm:$0x1]   ;;  %v110_v10 = vld [vmem:[%s207_s0 + $0x6] sm:$0x1]  }
   0x6   :  { %13 = vrot.lane.b32.xlu0 %v102_v2, %s133_s16  ;;  %25 = vrot.lane.b32.xlu1 %v104_v3, %s134_s17  ;;  %s139_s7 = smov 56   ;;  %s140_s8 = smov 48   ;;  %v111_v11 = vld [vmem:[%s207_s0 + $0x5] sm:$0x1]   ;;  %v112_v12 = vld [vmem:[%s207_s0 + $0x4] sm:$0x1]  }
   0x7   :  { %s141_s13 = smov 40   ;;  %s142_s14 = smov 32   ;;  %v113_v13 = vld [vmem:[%s207_s0 + $0x3] sm:$0x1]   ;;  %v114_v14 = vld [vmem:[%s207_s0 + $0x2] sm:$0x1]  }
   0x8   :  { %s143_s19 = smov 24   ;;  %s144_s20 = smov 16   ;;  %v115_v15 = vld [vmem:[%s207_s0 + $0x1] sm:$0x1]   ;;  %vm27_vm4 = vcmask 851712   ;;  %vm33_vm5 = vcmask 786112  }
   0x9   :  { %s145_s0 = smov 8   ;;  %vm39_vm6 = vcmask 720512   ;;  %vm45_vm7 = vcmask 654912   ;;  %vm51_vm8 = vcmask 589312   ;;  %vm57_vm9 = vcmask 523712  }
   0xa   :  { %31 = vrot.lane.b32.xlu0 %v105_v4, %s135_s24  ;;  %37 = vrot.lane.b32.xlu1 %v106_v5, %s136_s25  ;;  %vm63_vm10 = vcmask 458112   ;;  %vm69_vm11 = vcmask 392512   ;;  %vm75_vm12 = vcmask 326912   ;;  %vm81_vm13 = vcmask 261312  }
   0xb   :  { %vm87_vm14 = vcmask 195712   ;;  %vm93_vm15 = vcmask 130112  }
   0xe   :  { %43 = vrot.lane.b32.xlu0 %v107_v7, %s137_s30  ;;  %49 = vrot.lane.b32.xlu1 %v108_v8, %s138_s2 }
  0x12   :  { %55 = vrot.lane.b32.xlu0 %v109_v9, %s139_s7  ;;  %61 = vrot.lane.b32.xlu1 %v110_v10, %s140_s8 }
  0x16   :  { %67 = vrot.lane.b32.xlu0 %v111_v11, %s141_s13  ;;  %73 = vrot.lane.b32.xlu1 %v112_v12, %s142_s14 }
  0x1a   :  { %79 = vrot.lane.b32.xlu0 %v113_v13, %s143_s19  ;;  %85 = vrot.lane.b32.xlu1 %v114_v14, %s144_s20 }
  0x1e   :  { %91 = vrot.lane.b32.xlu0 %v115_v15, %s145_s0 }
  0x74   :  { %v8_v16 = vpop.permute.xlu0 %7   ;;  %v20_v17 = vpop.permute.xlu1 %19  }
  0x75   :  { %10 = vst.msk [vmem:[#allocation0] sm:$0x1] %vm9_vm1, %v8_v16  }
  0x78   :  { %v14_v18 = vpop.permute.xlu0 %13   ;;  %v26_v19 = vpop.permute.xlu1 %25  }
  0x79   :  { %16 = vst.msk [vmem:[#allocation0] sm:$0x1] %vm15_vm2, %v14_v18  }
  0x7a   :  { %22 = vst.msk [vmem:[#allocation0] sm:$0x1] %vm21_vm3, %v20_v17  }
  0x7b   :  { %28 = vst.msk [vmem:[#allocation0] sm:$0x1] %vm27_vm4, %v26_v19  }
  0x7c   :  { %v32_v20 = vpop.permute.xlu0 %31   ;;  %v38_v21 = vpop.permute.xlu1 %37  }
  0x7d   :  { %34 = vst.msk [vmem:[#allocation0] sm:$0x1] %vm33_vm5, %v32_v20  }
  0x7e   :  { %40 = vst.msk [vmem:[#allocation0] sm:$0x1] %vm39_vm6, %v38_v21  }
  0x80   :  { %v44_v22 = vpop.permute.xlu0 %43   ;;  %v50_v23 = vpop.permute.xlu1 %49  }
  0x81   :  { %46 = vst.msk [vmem:[#allocation0] sm:$0x1] %vm45_vm7, %v44_v22  }
  0x82   :  { %52 = vst.msk [vmem:[#allocation0] sm:$0x1] %vm51_vm8, %v50_v23  }
  0x84   :  { %v56_v24 = vpop.permute.xlu0 %55   ;;  %v62_v25 = vpop.permute.xlu1 %61  }
  0x85   :  { %58 = vst.msk [vmem:[#allocation0] sm:$0x1] %vm57_vm9, %v56_v24  }
  0x86   :  { %64 = vst.msk [vmem:[#allocation0] sm:$0x1] %vm63_vm10, %v62_v25  }
  0x88   :  { %v68_v26 = vpop.permute.xlu0 %67   ;;  %v74_v27 = vpop.permute.xlu1 %73  }
  0x89   :  { %70 = vst.msk [vmem:[#allocation0] sm:$0x1] %vm69_vm11, %v68_v26  }
  0x8a   :  { %76 = vst.msk [vmem:[#allocation0] sm:$0x1] %vm75_vm12, %v74_v27  }
  0x8c   :  { %v80_v28 = vpop.permute.xlu0 %79   ;;  %v86_v29 = vpop.permute.xlu1 %85  }
  0x8d   :  { %82 = vst.msk [vmem:[#allocation0] sm:$0x1] %vm81_vm13, %v80_v28  }
  0x8e   :  { %88 = vst.msk [vmem:[#allocation0] sm:$0x1] %vm87_vm14, %v86_v29  }
  0x90   :  { %v92_v30 = vpop.permute.xlu0 %91  }
  0x91   :  { %94 = vst.msk [vmem:[#allocation0] sm:$0x1] %vm93_vm15, %v92_v30  }
  0x98   :  { %v98_v31 = vld [vmem:[#allocation0] sm:$0x1] }
  0x99   :  { %100 = vst [vmem:[%s208_s1] sm:$0x1] %v98_v31 }

// kernel: tile.43
= control target key start
LH: loop header
LB: loop body
LE: loop exit
PB: predicated region body
PF: predicated region fallthrough
CT: control target
= control target key end

     0   :  { %s22_s0 = inlined_call_operand.vmem [shape: f32[8], index: 0, kind: input, shape index: {}]   ;;  %s23_s1 = inlined_call_operand.vmem [shape: f32[8,8], index: 1, kind: output, shape index: {}]  }
   0x1   :  { %v4_v0 = vld [vmem:[%s22_s0] ss:$0 sm:$0xff] }
   0x2   :  { %5 = vst [vmem:[%s23_s1] sm:$0xff] %v4_v0 }

// kernel: tile.44
= control target key start
LH: loop header
LB: loop body
LE: loop exit
PB: predicated region body
PF: predicated region fallthrough
CT: control target
= control target key end

     0   :  { %s67_s10 = smov 56   ;;  %s68_s11 = smov 40   ;;  %vm3_vm0 = vcmask 64512   ;;  %vm9_vm1 = vcmask 523712   ;;  %vm15_vm2 = vcmask 458112   ;;  %vm21_vm3 = vcmask 392512   ;;  %s111_s0 = inlined_call_operand.vmem [shape: f32[8,8], index: 0, kind: input, shape index: {}]   ;;  %s112_s1 = inlined_call_operand.vmem [shape: f32[1,64], index: 1, kind: output, shape index: {}]  }
   0x1   :  { %v53_v0 = vld [vmem:[%s111_s0 + $0x7] sm:$0x1]   ;;  %v55_v1 = vld [vmem:[%s111_s0 + $0x5] sm:$0x1]   ;;  %v54_v2 = vld [vmem:[%s111_s0 + $0x6] sm:$0x1]  }
   0x2   :  { %7 = vrot.lane.b32.xlu0 %v53_v0, %s67_s10  ;;  %19 = vrot.lane.b32.xlu1 %v55_v1, %s68_s11  ;;  %v56_v3 = vld [vmem:[%s111_s0 + $0x4] sm:$0x1]   ;;  %v2_v4 = vld [vmem:[%s111_s0] sm:$0x1]   ;;  %s69_s18 = smov 48   ;;  %s70_s19 = smov 32  }
   0x3   :  { %4 = vst.msk [vmem:[#allocation0] sm:$0x1] %vm3_vm0, %v2_v4   ;;  %v57_v5 = vld [vmem:[%s111_s0 + $0x3] sm:$0x1]   ;;  %v58_v6 = vld [vmem:[%s111_s0 + $0x2] sm:$0x1]  }
   0x4   :  { %s71_s24 = smov 24   ;;  %s72_s25 = smov 16   ;;  %v59_v7 = vld [vmem:[%s111_s0 + $0x1] sm:$0x1]   ;;  %vm27_vm4 = vcmask 326912   ;;  %vm33_vm5 = vcmask 261312  }
   0x5   :  { %s73_s0 = smov 8   ;;  %vm39_vm6 = vcmask 195712   ;;  %vm45_vm7 = vcmask 130112  }
   0x6   :  { %13 = vrot.lane.b32.xlu0 %v54_v2, %s69_s18  ;;  %25 = vrot.lane.b32.xlu1 %v56_v3, %s70_s19 }
   0xa   :  { %31 = vrot.lane.b32.xlu0 %v57_v5, %s71_s24  ;;  %37 = vrot.lane.b32.xlu1 %v58_v6, %s72_s25 }
   0xe   :  { %43 = vrot.lane.b32.xlu0 %v59_v7, %s73_s0 }
  0x74   :  { %v8_v8 = vpop.permute.xlu0 %7   ;;  %v20_v9 = vpop.permute.xlu1 %19  }
  0x75   :  { %10 = vst.msk [vmem:[#allocation0] sm:$0x1] %vm9_vm1, %v8_v8  }
  0x78   :  { %v14_v10 = vpop.permute.xlu0 %13   ;;  %v26_v11 = vpop.permute.xlu1 %25  }
  0x79   :  { %16 = vst.msk [vmem:[#allocation0] sm:$0x1] %vm15_vm2, %v14_v10  }
  0x7a   :  { %22 = vst.msk [vmem:[#allocation0] sm:$0x1] %vm21_vm3, %v20_v9  }
  0x7b   :  { %28 = vst.msk [vmem:[#allocation0] sm:$0x1] %vm27_vm4, %v26_v11  }
  0x7c   :  { %v32_v12 = vpop.permute.xlu0 %31   ;;  %v38_v13 = vpop.permute.xlu1 %37  }
  0x7d   :  { %34 = vst.msk [vmem:[#allocation0] sm:$0x1] %vm33_vm5, %v32_v12  }
  0x7e   :  { %40 = vst.msk [vmem:[#allocation0] sm:$0x1] %vm39_vm6, %v38_v13  }
  0x80   :  { %v44_v14 = vpop.permute.xlu0 %43  }
  0x81   :  { %46 = vst.msk [vmem:[#allocation0] sm:$0x1] %vm45_vm7, %v44_v14  }
  0x88   :  { %v50_v15 = vld [vmem:[#allocation0] sm:$0x1] }
  0x89   :  { %52 = vst [vmem:[%s112_s1] sm:$0x1] %v50_v15 }

// kernel: tile.48
= control target key start
LH: loop header
LB: loop body
LE: loop exit
PB: predicated region body
PF: predicated region fallthrough
CT: control target
= control target key end

     0   :  { %s22_s0 = inlined_call_operand.vmem [shape: f32[16], index: 0, kind: input, shape index: {}]   ;;  %s23_s1 = inlined_call_operand.vmem [shape: f32[8,16], index: 1, kind: output, shape index: {}]  }
   0x1   :  { %v4_v0 = vld [vmem:[%s22_s0] ss:$0 sm:$0xff] }
   0x2   :  { %5 = vst [vmem:[%s23_s1] sm:$0xff] %v4_v0 }

// kernel: tile.49
= control target key start
LH: loop header
LB: loop body
LE: loop exit
PB: predicated region body
PF: predicated region fallthrough
CT: control target
= control target key end

     0   :  { %s67_s10 = smov 112   ;;  %s68_s11 = smov 80   ;;  %vm3_vm0 = vcmask 130048   ;;  %vm9_vm1 = vcmask 1048448   ;;  %vm15_vm2 = vcmask 917248   ;;  %vm21_vm3 = vcmask 786048   ;;  %s111_s0 = inlined_call_operand.vmem [shape: f32[8,16], index: 0, kind: input, shape index: {}]   ;;  %s112_s1 = inlined_call_operand.vmem [shape: f32[1,128], index: 1, kind: output, shape index: {}]  }
   0x1   :  { %v53_v0 = vld [vmem:[%s111_s0 + $0x7] sm:$0x1]   ;;  %v55_v1 = vld [vmem:[%s111_s0 + $0x5] sm:$0x1]   ;;  %v54_v2 = vld [vmem:[%s111_s0 + $0x6] sm:$0x1]  }
   0x2   :  { %7 = vrot.lane.b32.xlu0 %v53_v0, %s67_s10  ;;  %19 = vrot.lane.b32.xlu1 %v55_v1, %s68_s11  ;;  %v56_v3 = vld [vmem:[%s111_s0 + $0x4] sm:$0x1]   ;;  %v2_v4 = vld [vmem:[%s111_s0] sm:$0x1]   ;;  %s69_s18 = smov 96   ;;  %s70_s19 = smov 64  }
   0x3   :  { %4 = vst.msk [vmem:[#allocation0] sm:$0x1] %vm3_vm0, %v2_v4   ;;  %v57_v5 = vld [vmem:[%s111_s0 + $0x3] sm:$0x1]   ;;  %v58_v6 = vld [vmem:[%s111_s0 + $0x2] sm:$0x1]  }
   0x4   :  { %s71_s24 = smov 48   ;;  %s72_s25 = smov 32   ;;  %v59_v7 = vld [vmem:[%s111_s0 + $0x1] sm:$0x1]   ;;  %vm27_vm4 = vcmask 654848   ;;  %vm33_vm5 = vcmask 523648  }
   0x5   :  { %s73_s0 = smov 16   ;;  %vm39_vm6 = vcmask 392448   ;;  %vm45_vm7 = vcmask 261248  }
   0x6   :  { %13 = vrot.lane.b32.xlu0 %v54_v2, %s69_s18  ;;  %25 = vrot.lane.b32.xlu1 %v56_v3, %s70_s19 }
   0xa   :  { %31 = vrot.lane.b32.xlu0 %v57_v5, %s71_s24  ;;  %37 = vrot.lane.b32.xlu1 %v58_v6, %s72_s25 }
   0xe   :  { %43 = vrot.lane.b32.xlu0 %v59_v7, %s73_s0 }
  0x74   :  { %v8_v8 = vpop.permute.xlu0 %7   ;;  %v20_v9 = vpop.permute.xlu1 %19  }
  0x75   :  { %10 = vst.msk [vmem:[#allocation0] sm:$0x1] %vm9_vm1, %v8_v8  }
  0x78   :  { %v14_v10 = vpop.permute.xlu0 %13   ;;  %v26_v11 = vpop.permute.xlu1 %25  }
  0x79   :  { %16 = vst.msk [vmem:[#allocation0] sm:$0x1] %vm15_vm2, %v14_v10  }
  0x7a   :  { %22 = vst.msk [vmem:[#allocation0] sm:$0x1] %vm21_vm3, %v20_v9  }
  0x7b   :  { %28 = vst.msk [vmem:[#allocation0] sm:$0x1] %vm27_vm4, %v26_v11  }
  0x7c   :  { %v32_v12 = vpop.permute.xlu0 %31   ;;  %v38_v13 = vpop.permute.xlu1 %37  }
  0x7d   :  { %34 = vst.msk [vmem:[#allocation0] sm:$0x1] %vm33_vm5, %v32_v12  }
  0x7e   :  { %40 = vst.msk [vmem:[#allocation0] sm:$0x1] %vm39_vm6, %v38_v13  }
  0x80   :  { %v44_v14 = vpop.permute.xlu0 %43  }
  0x81   :  { %46 = vst.msk [vmem:[#allocation0] sm:$0x1] %vm45_vm7, %v44_v14  }
  0x88   :  { %v50_v15 = vld [vmem:[#allocation0] sm:$0x1] }
  0x89   :  { %52 = vst [vmem:[%s112_s1] sm:$0x1] %v50_v15 }

// kernel: tile.53
= control target key start
LH: loop header
LB: loop body
LE: loop exit
PB: predicated region body
PF: predicated region fallthrough
CT: control target
= control target key end

     0   :  { %s22_s0 = inlined_call_operand.vmem [shape: f32[16], index: 0, kind: input, shape index: {}]   ;;  %s23_s1 = inlined_call_operand.vmem [shape: f32[4,16], index: 1, kind: output, shape index: {}]  }
   0x1   :  { %v4_v0 = vld [vmem:[%s22_s0] ss:$0 sm:$0xff] }
   0x2   :  { %5 = vst [vmem:[%s23_s1] sm:$0xf] %v4_v0 }

// kernel: tile.54
= control target key start
LH: loop header
LB: loop body
LE: loop exit
PB: predicated region body
PF: predicated region fallthrough
CT: control target
= control target key end

     0   :  { %vm7_vm0 = vcmask 130048   ;;  %s37_s8 = smov 16   ;;  %s38_s9 = smov 32   ;;  %vm13_vm1 = vcmask 523648   ;;  %vm19_vm2 = vcmask 392448   ;;  %vm25_vm3 = vcmask 261248   ;;  %s55_s0 = inlined_call_operand.vmem [shape: f32[4,16], index: 0, kind: input, shape index: {}]   ;;  %s56_s1 = inlined_call_operand.vmem [shape: f32[1,64], index: 1, kind: output, shape index: {}]  }
   0x1   :  { %v4_v0 = vld [vmem:[%s55_s0] sm:$0xf]  ;;  %s36_s0 = smov 48  }
   0x2   :  { %5 = vst [vmem:[#allocation1] sm:$0xf] %v4_v0 }
   0x9   :  { %v10_v1 = vld [vmem:[#allocation1 + $0x3] sm:$0x1]   ;;  %v22_v2 = vld [vmem:[#allocation1 + $0x1] sm:$0x1]   ;;  %v6_v3 = vld [vmem:[#allocation1] sm:$0x1]  }
   0xa   :  { %11 = vrot.lane.b32.xlu0 %v10_v1, %s36_s0  ;;  %23 = vrot.lane.b32.xlu1 %v22_v2, %s37_s8  ;;  %v16_v4 = vld [vmem:[#allocation1 + $0x2] sm:$0x1]   ;;  %8 = vst.msk [vmem:[#allocation0] sm:$0x1] %vm7_vm0, %v6_v3  }
   0xe   :  { %17 = vrot.lane.b32.xlu0 %v16_v4, %s38_s9 }
  0x7c   :  { %v12_v5 = vpop.permute.xlu0 %11   ;;  %v24_v6 = vpop.permute.xlu1 %23  }
  0x7d   :  { %14 = vst.msk [vmem:[#allocation0] sm:$0x1] %vm13_vm1, %v12_v5  }
  0x80   :  { %v18_v7 = vpop.permute.xlu0 %17  }
  0x81   :  { %20 = vst.msk [vmem:[#allocation0] sm:$0x1] %vm19_vm2, %v18_v7  }
  0x82   :  { %26 = vst.msk [vmem:[#allocation0] sm:$0x1] %vm25_vm3, %v24_v6  }
  0x89   :  { %v30_v8 = vld [vmem:[#allocation0] sm:$0x1] }
  0x8a   :  { %32 = vst [vmem:[%s56_s1] sm:$0x1] %v30_v8 }

// kernel: tile.58
= control target key start
LH: loop header
LB: loop body
LE: loop exit
PB: predicated region body
PF: predicated region fallthrough
CT: control target
= control target key end

     0   :  { %s22_s0 = inlined_call_operand.vmem [shape: f32[32], index: 0, kind: input, shape index: {}]   ;;  %s23_s1 = inlined_call_operand.vmem [shape: f32[4,32], index: 1, kind: output, shape index: {}]  }
   0x1   :  { %v4_v0 = vld [vmem:[%s22_s0] ss:$0 sm:$0xff] }
   0x2   :  { %5 = vst [vmem:[%s23_s1] sm:$0xf] %v4_v0 }

// kernel: tile.59
= control target key start
LH: loop header
LB: loop body
LE: loop exit
PB: predicated region body
PF: predicated region fallthrough
CT: control target
= control target key end

     0   :  { %vm7_vm0 = vcmask 261120   ;;  %s37_s8 = smov 32   ;;  %s38_s9 = smov 64   ;;  %vm13_vm1 = vcmask 1048320   ;;  %vm19_vm2 = vcmask 785920   ;;  %vm25_vm3 = vcmask 523520   ;;  %s55_s0 = inlined_call_operand.vmem [shape: f32[4,32], index: 0, kind: input, shape index: {}]   ;;  %s56_s1 = inlined_call_operand.vmem [shape: f32[1,128], index: 1, kind: output, shape index: {}]  }
   0x1   :  { %v4_v0 = vld [vmem:[%s55_s0] sm:$0xf]  ;;  %s36_s0 = smov 96  }
   0x2   :  { %5 = vst [vmem:[#allocation1] sm:$0xf] %v4_v0 }
   0x9   :  { %v10_v1 = vld [vmem:[#allocation1 + $0x3] sm:$0x1]   ;;  %v22_v2 = vld [vmem:[#allocation1 + $0x1] sm:$0x1]   ;;  %v6_v3 = vld [vmem:[#allocation1] sm:$0x1]  }
   0xa   :  { %11 = vrot.lane.b32.xlu0 %v10_v1, %s36_s0  ;;  %23 = vrot.lane.b32.xlu1 %v22_v2, %s37_s8  ;;  %v16_v4 = vld [vmem:[#allocation1 + $0x2] sm:$0x1]   ;;  %8 = vst.msk [vmem:[#allocation0] sm:$0x1] %vm7_vm0, %v6_v3  }
   0xe   :  { %17 = vrot.lane.b32.xlu0 %v16_v4, %s38_s9 }
  0x7c   :  { %v12_v5 = vpop.permute.xlu0 %11   ;;  %v24_v6 = vpop.permute.xlu1 %23  }
  0x7d   :  { %14 = vst.msk [vmem:[#allocation0] sm:$0x1] %vm13_vm1, %v12_v5  }
  0x80   :  { %v18_v7 = vpop.permute.xlu0 %17  }
  0x81   :  { %20 = vst.msk [vmem:[#allocation0] sm:$0x1] %vm19_vm2, %v18_v7  }
  0x82   :  { %26 = vst.msk [vmem:[#allocation0] sm:$0x1] %vm25_vm3, %v24_v6  }
  0x89   :  { %v30_v8 = vld [vmem:[#allocation0] sm:$0x1] }
  0x8a   :  { %32 = vst [vmem:[%s56_s1] sm:$0x1] %v30_v8 }

// kernel: mod_forward.3
= control target key start
LH: loop header
LB: loop body
LE: loop exit
PB: predicated region body
PF: predicated region fallthrough
CT: control target
= control target key end

     0   :  { %vm45_vm0 = vcmask 261120   ;;  %vm143_vm1 = vcmask 97280   ;;  %s3656_s1 = inlined_call_operand.vmem [shape: f32[32,12], index: 1, kind: input, shape index: {}]   ;;  %s3657_s2 = inlined_call_operand.vmem [shape: f32[32,12], index: 2, kind: input, shape index: {}]   ;;  %s3658_s0 = inlined_call_operand.vmem [shape: f32[32,32], index: 0, kind: input, shape index: {}]   ;;  %s3659_s9 = inlined_call_operand.vmem [shape: f32[32,12], index: 9, kind: output, shape index: {0}]   ;;  %s3660_s3 = inlined_call_operand.vmem [shape: f32[12,32,32], index: 3, kind: input, shape index: {}]   ;;  %s3661_s4 = inlined_call_operand.vmem [shape: f32[12,1,32], index: 4, kind: input, shape index: {}]   ;;  %s3662_s10 = inlined_call_operand.vmem [shape: f32[12,32,32], index: 10, kind: output, shape index: {1}]   ;;  %s3663_s5 = inlined_call_operand.vmem [shape: f32[32,4], index: 5, kind: input, shape index: {}]   ;;  %s3664_s8 = inlined_call_operand.<no memory space> [shape: f32[1,1], index: 8, kind: input, shape index: {}]   ;;  %s3665_s6 = inlined_call_operand.vmem [shape: f32[1,4], index: 6, kind: input, shape index: {}]   ;;  %s3666_s7 = inlined_call_operand.vmem [shape: f32[1,4], index: 7, kind: input, shape index: {}]   ;;  %s3667_s11 = inlined_call_operand.vmem [shape: f32[32,1], index: 11, kind: output, shape index: {2}]  }
   0x1   :  { %v41_v0 = vld [vmem:[%s3656_s1] sm:$0xff]  ;;  %v42_v1 = vld [vmem:[%s3656_s1 + $0x8] sm:$0xff]  ;;  %v43_v2 = vld [vmem:[%s3656_s1 + $0x10] sm:$0xff] }
   0x2   :  { %v2541_v3 = vpack.c.bf16 %v42_v1, %v41_v0  ;;  %v44_v4 = vld [vmem:[%s3656_s1 + $0x18] sm:$0xff]  ;;  %v2744_v5 = vld [vmem:[%s3658_s0] sm:$0xff]  ;;  %v2753_v7 = vld [vmem:[%s3658_s0 + $0x8] sm:$0xff] }
   0x3   :  { %v2545_v6 = vpack.c.bf16 %v44_v4, %v43_v2  ;;  %2353 = vmatprep.mubr.msk.f32.mxu0 %vm45_vm0, %v2744_v5  ;;  %2367 = vmatprep.mubr.msk.f32.mxu1 %vm45_vm0, %v2744_v5  ;;  %v2758_v8 = vld [vmem:[%s3658_s0 + $0x10] sm:$0xff]  ;;  %v2767_v9 = vld [vmem:[%s3658_s0 + $0x18] sm:$0xff]  ;;  %v274_v54 = vld [vmem:[%s3660_s3] sm:$0xff] }
   0x4   :  { %2542 = vmatprep.subr.bf16.mxu0 %v2541_v3  ;;  %v275_v55 = vld [vmem:[%s3660_s3 + $0x8] sm:$0xff]  ;;  %v2072_v56 = vld [vmem:[%s3660_s3 + $0x20] sm:$0xff]  ;;  %v276_v59 = vld [vmem:[%s3660_s3 + $0x10] sm:$0xff] }
   0x5   :  { %2544 = vmatpush3.bf16.msra.mxu0 %v2541_v3  ;;  %v2549_v57 = vpack.c.bf16 %v275_v55, %v274_v54  ;;  %v2073_v58 = vld [vmem:[%s3660_s3 + $0x28] sm:$0xff]  ;;  %v277_v60 = vld [vmem:[%s3660_s3 + $0x18] sm:$0xff]  ;;  %v2074_v63 = vld [vmem:[%s3660_s3 + $0x30] sm:$0xff] }
   0x6   :  { %2546 = vmatprep.subr.bf16.mxu0 %v2545_v6  ;;  %v2557_v61 = vpack.c.bf16 %v2073_v58, %v2072_v56  ;;  %v2553_v62 = vpack.c.bf16 %v277_v60, %v276_v59  ;;  %v2075_v0 = vld [vmem:[%s3660_s3 + $0x38] sm:$0xff]  ;;  %v2086_v1 = vld [vmem:[%s3660_s3 + $0x40] sm:$0xff]  ;;  %v2087_v3 = vld [vmem:[%s3660_s3 + $0x48] sm:$0xff] }
   0x7   :  { %2550 = vmatprep.subr.bf16.mxu1 %v2549_v57  ;;  %v2561_v2 = vpack.c.bf16 %v2075_v0, %v2074_v63  ;;  %v2100_v4 = vld [vmem:[%s3660_s3 + $0x60] sm:$0xff]  ;;  %v2186_v54 = vld [vmem:[%s3660_s3 + $0x130] sm:$0xff]  ;;  %v2187_v55 = vld [vmem:[%s3660_s3 + $0x138] sm:$0xff] }
   0x8   :  { %2552 = vmatpush3.bf16.msra.mxu1 %v2549_v57  ;;  %v2625_v57 = vpack.c.bf16 %v2187_v55, %v2186_v54  ;;  %v2198_v58 = vld [vmem:[%s3660_s3 + $0x140] sm:$0xff]  ;;  %v2199_v59 = vld [vmem:[%s3660_s3 + $0x148] sm:$0xff]  ;;  %v2200_v0 = vld [vmem:[%s3660_s3 + $0x150] sm:$0xff] }
   0x9   :  { %2548 = vmatpush3.bf16.msra.mxu0 %v2545_v6  ;;  %v2101_v6 = vld [vmem:[%s3660_s3 + $0x68] sm:$0xff]  ;;  %2554 = vmatprep.subr.bf16.mxu1 %v2553_v62  ;;  %v2212_v60 = vld [vmem:[%s3660_s3 + $0x160] sm:$0xff] }
   0xa   :  { %2558 = vmatprep.subr.bf16.mxu0 %v2557_v61  ;;  %v2091_v55 = vld [vmem:[%s3661_s4 + $0x2] ss:$0 sm:$0xff] }
   0xc   :  { %2354 = vmatmul.mubr.msk.f32.vlgmr.msra.gmra.mrb[0].mxu0 %vm45_vm0, %v2753_v7  ;;  %2556 = vmatpush3.bf16.msra.mxu1 %v2553_v62  ;;  %v2629_v62 = vpack.c.bf16 %v2199_v59, %v2198_v58 }
   0xd   :  { %2356 = vmatprep.mubr.msk.f32.mxu0 %vm45_vm0, %v2758_v8  ;;  %2560 = vmatpush3.bf16.msra.mxu0 %v2557_v61  ;;  %v2213_v61 = vld [vmem:[%s3660_s3 + $0x168] sm:$0xff] }
   0xe   :  { %2562 = vmatprep.subr.bf16.mxu0 %v2561_v2  ;;  %v2637_v63 = vpack.c.bf16 %v2213_v61, %v2212_v60 }
   0xf   :  { %2368 = vmatmul.mubr.msk.f32.vlgmr.msra.gmra.mrb[0].mxu1 %vm45_vm0, %v2753_v7 }
  0x10   :  { %2357 = vmatmul.mubr.msk.f32.gmra.mrb[2].mxu0 %vm45_vm0, %v2767_v9  ;;  %2370 = vmatprep.mubr.msk.f32.mxu1 %vm45_vm0, %v2758_v8 }
  0x11   :  { %2381 = vmatprep.mubr.msk.f32.mxu0 %vm45_vm0, %v2744_v5  ;;  %2564 = vmatpush3.bf16.msra.mxu0 %v2561_v2  ;;  %v2214_v2 = vld [vmem:[%s3660_s3 + $0x170] sm:$0xff] }
  0x13   :  { %2371 = vmatmul.mubr.msk.f32.gmra.mrb[2].mxu1 %vm45_vm0, %v2767_v9 }
  0x14   :  { %2382 = vmatmul.mubr.msk.f32.vlgmr.msra.gmra.mrb[4].mxu0 %vm45_vm0, %v2753_v7  ;;  %2395 = vmatprep.mubr.msk.f32.mxu1 %vm45_vm0, %v2744_v5 }
  0x15   :  { %2384 = vmatprep.mubr.msk.f32.mxu0 %vm45_vm0, %v2758_v8 }
  0x18   :  { %2385 = vmatmul.mubr.msk.f32.gmra.mrb[6].mxu0 %vm45_vm0, %v2767_v9 }
  0x19   :  { %2409 = vmatprep.mubr.msk.f32.mxu0 %vm45_vm0, %v2744_v5 }
  0xdf   :  { %v2355_v10 = vpop.f32.mrb[0].mxu0 }
  0xe0   :  { %v124_v11 = vpop.f32.mrb[1].mxu0  ;;  %v147_v15 = vsel %vm143_vm1, %v2355_v10, -inf }
  0xe1   :  { %v144_v12 = vsel %vm143_vm1, %v124_v11, -inf }
  0xe2   :  { %145 = vmax.xlane.f32.xlu0 %v144_v12  ;;  %v2088_v12 = vld [vmem:[%s3660_s3 + $0x50] sm:$0xff] }
  0xe3   :  { %v2358_v13 = vpop.f32.mrb[2].mxu0 }
  0xe4   :  { %v134_v14 = vpop.f32.mrb[3].mxu0  ;;  %v153_v17 = vsel %vm143_vm1, %v2358_v13, -inf }
  0xe5   :  { %v150_v16 = vsel %vm143_vm1, %v134_v14, -inf }
  0xe6   :  { %148 = vmax.xlane.f32.xlu0 %v147_v15  ;;  %151 = vmax.xlane.f32.xlu1 %v150_v16  ;;  %v2103_v15 = vld [vmem:[%s3660_s3 + $0x78] sm:$0xff] }
  0xea   :  { %154 = vmax.xlane.f32.xlu1 %v153_v17 }
 0x16f   :  { %v146_v18 = vpop.xlane.xlu0 %145 }
 0x170   :  { %v156_v19 = vsub.f32 %v124_v11, %v146_v18  ;;  %v2573_v11 = vpack.c.bf16 %v2101_v6, %v2100_v4  ;;  %v2114_v18 = vld [vmem:[%s3660_s3 + $0x80] sm:$0xff] }
 0x172   :  { %v160_v20 = vmul.f32 1.442695, %v156_v19  ;;  %2574 = vmatprep.subr.bf16.mxu0 %v2573_v11  ;;  %v2115_v19 = vld [vmem:[%s3660_s3 + $0x88] sm:$0xff] }
 0x173   :  { %v149_v21 = vpop.xlane.xlu0 %148  ;;  %v152_v22 = vpop.xlane.xlu1 %151  ;;  %2576 = vmatpush3.bf16.msra.mxu0 %v2573_v11 }
 0x174   :  { %2653 = vpow2.f32 %v160_v20  ;;  %v157_v23 = vsub.f32 %v2355_v10, %v149_v21  ;;  %v158_v24 = vsub.f32 %v134_v14, %v152_v22  ;;  %v2565_v10 = vpack.c.bf16 %v2087_v3, %v2086_v1  ;;  %v2102_v14 = vld [vmem:[%s3660_s3 + $0x70] sm:$0xff]  ;;  %v2128_v20 = vld [vmem:[%s3660_s3 + $0xa0] sm:$0xff]  ;;  %v2129_v21 = vld [vmem:[%s3660_s3 + $0xa8] sm:$0xff] }
 0x175   :  { %v2577_v17 = vpack.c.bf16 %v2103_v15, %v2102_v14  ;;  %v2581_v22 = vpack.c.bf16 %v2115_v19, %v2114_v18  ;;  %v2201_v1 = vld [vmem:[%s3660_s3 + $0x158] sm:$0xff] }
 0x176   :  { %v162_v25 = vmul.f32 1.442695, %v157_v23  ;;  %v164_v26 = vmul.f32 1.442695, %v158_v24  ;;  %2566 = vmatprep.subr.bf16.mxu1 %v2565_v10  ;;  %v2589_v23 = vpack.c.bf16 %v2129_v21, %v2128_v20  ;;  %v2116_v24 = vld [vmem:[%s3660_s3 + $0x90] sm:$0xff]  ;;  %v2215_v3 = vld [vmem:[%s3660_s3 + $0x178] sm:$0xff]  ;;  %v2633_v4 = vpack.c.bf16 %v2201_v1, %v2200_v0 }
 0x177   :  { %v155_v27 = vpop.xlane.xlu1 %154  ;;  %2568 = vmatpush3.bf16.msra.mxu1 %v2565_v10  ;;  %2578 = vmatprep.subr.bf16.mxu0 %v2577_v17  ;;  %v2641_v6 = vpack.c.bf16 %v2215_v3, %v2214_v2  ;;  %v204_v10 = vlaneseq }
 0x178   :  { %2655 = vpow2.f32 %v162_v25  ;;  %v159_v28 = vsub.f32 %v2358_v13, %v155_v27  ;;  %v2089_v13 = vld [vmem:[%s3660_s3 + $0x58] sm:$0xff]  ;;  %2580 = vmatpush3.bf16.msra.mxu0 %v2577_v17 }
 0x179   :  { %2657 = vpow2.f32 %v164_v26  ;;  %v2569_v16 = vpack.c.bf16 %v2089_v13, %v2088_v12  ;;  %v2117_v25 = vld [vmem:[%s3660_s3 + $0x98] sm:$0xff]  ;;  %v2130_v26 = vld [vmem:[%s3660_s3 + $0xb0] sm:$0xff]  ;;  %2590 = vmatprep.subr.bf16.mxu0 %v2589_v23 }
 0x17a   :  { %v166_v29 = vmul.f32 1.442695, %v159_v28  ;;  %v2131_v27 = vld [vmem:[%s3660_s3 + $0xb8] sm:$0xff]  ;;  %v2585_v28 = vpack.c.bf16 %v2117_v25, %v2116_v24  ;;  %v2077_v25 = vld [vmem:[%s3661_s4 + $0x1] ss:$0 sm:$0xff] }
 0x17b   :  { %2570 = vmatprep.subr.bf16.mxu1 %v2569_v16  ;;  %2410 = vmatmul.mubr.msk.f32.vlgmr.msra.gmra.mrb[8].mxu0 %vm45_vm0, %v2753_v7 }
 0x17c   :  { %2659 = vpow2.f32 %v166_v29  ;;  %2572 = vmatpush3.bf16.msra.mxu1 %v2569_v16  ;;  %v2593_v29 = vpack.c.bf16 %v2131_v27, %v2130_v26  ;;  %2592 = vmatpush3.bf16.msra.mxu0 %v2589_v23  ;;  %v2369_v26 = vpop.f32.mrb[0].mxu1 }
 0x17d   :  { %2582 = vmatprep.subr.bf16.mxu1 %v2581_v22  ;;  %2412 = vmatprep.mubr.msk.f32.mxu0 %vm45_vm0, %v2758_v8 }
 0x17e   :  { %v2654_v30 = vpop.eup %2653  ;;  %2594 = vmatprep.subr.bf16.mxu0 %v2593_v29 }
 0x17f   :  { %v168_v31 = vsel %vm143_vm1, %v2654_v30, 0.0  ;;  %2396 = vmatmul.mubr.msk.f32.vlgmr.msra.gmra.mrb[4].mxu1 %vm45_vm0, %v2753_v7  ;;  %2413 = vmatmul.mubr.msk.f32.gmra.mrb[10].mxu0 %vm45_vm0, %v2767_v9 }
 0x180   :  { %169 = vadd.xlane.f32.xlu0 %v168_v31  ;;  %v2143_v31 = vld [vmem:[%s3660_s3 + $0xc8] sm:$0xff]  ;;  %2584 = vmatpush3.bf16.msra.mxu1 %v2581_v22 }
 0x181   :  { %2398 = vmatprep.mubr.msk.f32.mxu1 %vm45_vm0, %v2758_v8  ;;  %2586 = vmatprep.subr.bf16.mxu1 %v2585_v28 }
 0x182   :  { %v2656_v32 = vpop.eup %2655  ;;  %2596 = vmatpush3.bf16.msra.mxu0 %v2593_v29  ;;  %2437 = vmatprep.mubr.msk.f32.mxu0 %vm45_vm0, %v2744_v5  ;;  %v2383_v29 = vpop.f32.mrb[4].mxu0 }
 0x183   :  { %v2658_v33 = vpop.eup %2657  ;;  %v171_v34 = vsel %vm143_vm1, %v2656_v32, 0.0  ;;  %2399 = vmatmul.mubr.msk.f32.gmra.mrb[6].mxu1 %vm45_vm0, %v2767_v9 }
 0x184   :  { %172 = vadd.xlane.f32.xlu1 %v171_v34  ;;  %v174_v35 = vsel %vm143_vm1, %v2658_v33, 0.0  ;;  %2588 = vmatpush3.bf16.msra.mxu1 %v2585_v28  ;;  %v351_v28 = vpop.f32.mrb[1].mxu1 }
 0x185   :  { %175 = vadd.xlane.f32.xlu0 %v174_v35  ;;  %2423 = vmatprep.mubr.msk.f32.mxu1 %vm45_vm0, %v2744_v5 }
 0x186   :  { %v2660_v36 = vpop.eup %2659  ;;  %2438 = vmatmul.mubr.msk.f32.vlgmr.msra.gmra.mrb[12].mxu0 %vm45_vm0, %v2753_v7 }
 0x187   :  { %v177_v37 = vsel %vm143_vm1, %v2660_v36, 0.0  ;;  %2424 = vmatmul.mubr.msk.f32.vlgmr.msra.gmra.mrb[8].mxu1 %vm45_vm0, %v2753_v7  ;;  %2440 = vmatprep.mubr.msk.f32.mxu0 %vm45_vm0, %v2758_v8 }
 0x188   :  { %178 = vadd.xlane.f32.xlu1 %v177_v37  ;;  %v2145_v37 = vld [vmem:[%s3660_s3 + $0xd8] sm:$0xff]  ;;  %2426 = vmatprep.mubr.msk.f32.mxu1 %vm45_vm0, %v2758_v8 }
 0x18a   :  { %2441 = vmatmul.mubr.msk.f32.gmra.mrb[14].mxu0 %vm45_vm0, %v2767_v9 }
 0x18b   :  { %2427 = vmatmul.mubr.msk.f32.gmra.mrb[10].mxu1 %vm45_vm0, %v2767_v9  ;;  %2465 = vmatprep.mubr.msk.f32.mxu0 %vm45_vm0, %v2744_v5 }
 0x18c   :  { %2451 = vmatprep.mubr.msk.f32.mxu1 %vm45_vm0, %v2744_v5 }
 0x20d   :  { %v170_v38 = vpop.xlane.xlu0 %169 }
 0x20e   :  { %2661 = vrcp.f32 %v170_v38  ;;  %v2158_v38 = vld [vmem:[%s3660_s3 + $0xf0] sm:$0xff] }
 0x211   :  { %v173_v39 = vpop.xlane.xlu1 %172 }
 0x212   :  { %v176_v40 = vpop.xlane.xlu0 %175  ;;  %2663 = vrcp.f32 %v173_v39  ;;  %v2159_v39 = vld [vmem:[%s3660_s3 + $0xf8] sm:$0xff] }
 0x213   :  { %2665 = vrcp.f32 %v176_v40 }
 0x215   :  { %v179_v41 = vpop.xlane.xlu1 %178 }
 0x216   :  { %2667 = vrcp.f32 %v179_v41  ;;  %v2609_v41 = vpack.c.bf16 %v2159_v39, %v2158_v38  ;;  %v2372_v39 = vpop.f32.mrb[2].mxu1 }
 0x218   :  { %v2662_v42 = vpop.eup %2661 }
 0x219   :  { %v2781_v43 = vmul.f32 %v2662_v42, %v2654_v30  ;;  %v2142_v30 = vld [vmem:[%s3660_s3 + $0xc0] sm:$0xff] }
 0x21a   :  { %v2597_v34 = vpack.c.bf16 %v2143_v31, %v2142_v30  ;;  %v2170_v42 = vld [vmem:[%s3660_s3 + $0x100] sm:$0xff]  ;;  %v491_v31 = vadd.f32 %v2383_v29, %v2077_v25 }
 0x21b   :  { %188 = vst.msk [vmem:[%s3659_s9] sm:$0xff] %vm143_vm1, %v2781_v43  ;;  %v192_v44 = vsel %vm143_vm1, %v2781_v43, -inf }
 0x21c   :  { %v2664_v45 = vpop.eup %2663  ;;  %193 = vmax.xlane.f32.xlu0 %v192_v44  ;;  %2598 = vmatprep.subr.bf16.mxu1 %v2597_v34  ;;  %v2171_v44 = vld [vmem:[%s3660_s3 + $0x108] sm:$0xff]  ;;  %vm505_vm8 = vcmp.ge.f32.partialorder %v491_v31, 0.0 }
 0x21d   :  { %v2666_v46 = vpop.eup %2665  ;;  %v2790_v47 = vmul.f32 %v2664_v45, %v2656_v32  ;;  %v2156_v32 = vld [vmem:[%s3660_s3 + $0xe0] sm:$0xff]  ;;  %2600 = vmatpush3.bf16.msra.mxu1 %v2597_v34 }
 0x21e   :  { %v2792_v48 = vmul.f32 %v2666_v46, %v2658_v33  ;;  %v2157_v33 = vld [vmem:[%s3660_s3 + $0xe8] sm:$0xff]  ;;  %v2184_v45 = vld [vmem:[%s3660_s3 + $0x120] sm:$0xff] }
 0x21f   :  { %v195_v49 = vsel %vm143_vm1, %v2790_v47, -inf  ;;  %189 = vst.msk [vmem:[%s3659_s9 + $0x8] sm:$0xff] %vm143_vm1, %v2790_v47  ;;  %v2605_v35 = vpack.c.bf16 %v2157_v33, %v2156_v32  ;;  %v2185_v46 = vld [vmem:[%s3660_s3 + $0x128] sm:$0xff]  ;;  %v485_v32 = vpop.f32.mrb[5].mxu0 }
 0x220   :  { %v2668_v50 = vpop.eup %2667  ;;  %v198_v51 = vsel %vm143_vm1, %v2792_v48, -inf  ;;  %190 = vst.msk [vmem:[%s3659_s9 + $0x10] sm:$0xff] %vm143_vm1, %v2792_v48  ;;  %196 = vmax.xlane.f32.xlu1 %v195_v49  ;;  %v2613_v49 = vpack.c.bf16 %v2171_v44, %v2170_v42  ;;  %v486_v34 = vadd.f32 %v2077_v25, %v485_v32  ;;  %v2133_v32 = vld [vmem:[%s3661_s4 + $0x5] ss:$0 sm:$0xff] }
 0x221   :  { %199 = vmax.xlane.f32.xlu0 %v198_v51  ;;  %v2808_v52 = vmul.f32 %v2668_v50, %v2660_v36  ;;  %v2144_v36 = vld [vmem:[%s3660_s3 + $0xd0] sm:$0xff]  ;;  %2606 = vmatprep.subr.bf16.mxu0 %v2605_v35  ;;  %v2621_v50 = vpack.c.bf16 %v2185_v46, %v2184_v45  ;;  %v361_v46 = vpop.f32.mrb[3].mxu1 }
 0x222   :  { %v2601_v40 = vpack.c.bf16 %v2145_v37, %v2144_v36  ;;  %2608 = vmatpush3.bf16.msra.mxu0 %v2605_v35  ;;  %v2172_v51 = vld [vmem:[%s3660_s3 + $0x110] sm:$0xff]  ;;  %v509_v36 = vmul.f32 0.2, %v491_v31  ;;  %vm504_vm9 = vcmp.ge.f32.partialorder %v486_v34, 0.0  ;;  %v508_v38 = vmul.f32 0.2, %v486_v34 }
 0x223   :  { %v201_v53 = vsel %vm143_vm1, %v2808_v52, -inf  ;;  %191 = vst.msk [vmem:[%s3659_s9 + $0x18] sm:$0xff] %vm143_vm1, %v2808_v52  ;;  %2610 = vmatprep.subr.bf16.mxu0 %v2609_v41 }
 0x224   :  { %202 = vmax.xlane.f32.xlu1 %v201_v53  ;;  %2602 = vmatprep.subr.bf16.mxu1 %v2601_v40  ;;  %v2173_v53 = vld [vmem:[%s3660_s3 + $0x118] sm:$0xff]  ;;  %v3100_v42 = vsel %vm505_vm8, %v491_v31, %v509_v36 }
 0x225   :  { %2604 = vmatpush3.bf16.msra.mxu1 %v2601_v40  ;;  %v2617_v56 = vpack.c.bf16 %v2173_v53, %v2172_v51  ;;  %v2386_v40 = vpop.f32.mrb[6].mxu0  ;;  %2083 = vst.msk [vmem:[%s3662_s10 + $0x28] sm:$0xff] %vm45_vm0, %v3100_v42  ;;  %v3113_v51 = vsel %vm504_vm9, %v486_v34, %v508_v38 }
 0x226   :  { %2612 = vmatpush3.bf16.msra.mxu0 %v2609_v41  ;;  %2614 = vmatprep.subr.bf16.mxu1 %v2613_v49  ;;  %v501_v45 = vadd.f32 %v2386_v40, %v2077_v25  ;;  %2082 = vst.msk [vmem:[%s3662_s10 + $0x20] sm:$0xff] %vm45_vm0, %v3113_v51 }
 0x227   :  { %2622 = vmatprep.subr.bf16.mxu0 %v2621_v50 }
 0x228   :  { %2452 = vmatmul.mubr.msk.f32.vlgmr.msra.gmra.mrb[12].mxu1 %vm45_vm0, %v2753_v7  ;;  %vm507_vm11 = vcmp.ge.f32.partialorder %v501_v45, 0.0  ;;  %v511_v58 = vmul.f32 0.2, %v501_v45 }
 0x229   :  { %2466 = vmatmul.mubr.msk.f32.vlgmr.msra.gmra.mrb[16].mxu0 %vm45_vm0, %v2753_v7  ;;  %2616 = vmatpush3.bf16.msra.mxu1 %v2613_v49  ;;  %v495_v49 = vpop.f32.mrb[7].mxu0 }
 0x22a   :  { %2624 = vmatpush3.bf16.msra.mxu0 %v2621_v50  ;;  %2454 = vmatprep.mubr.msk.f32.mxu1 %vm45_vm0, %v2758_v8  ;;  %v496_v54 = vadd.f32 %v2077_v25, %v495_v49 }
 0x22b   :  { %2468 = vmatprep.mubr.msk.f32.mxu0 %vm45_vm0, %v2758_v8  ;;  %2618 = vmatprep.subr.bf16.mxu1 %v2617_v56 }
 0x22c   :  { %2455 = vmatmul.mubr.msk.f32.gmra.mrb[14].mxu1 %vm45_vm0, %v2767_v9  ;;  %2626 = vmatprep.subr.bf16.mxu0 %v2625_v57  ;;  %vm506_vm13 = vcmp.ge.f32.partialorder %v496_v54, 0.0  ;;  %v510_v60 = vmul.f32 0.2, %v496_v54 }
 0x22d   :  { %2469 = vmatmul.mubr.msk.f32.gmra.mrb[18].mxu0 %vm45_vm0, %v2767_v9  ;;  %2620 = vmatpush3.bf16.msra.mxu1 %v2617_v56  ;;  %v2105_v56 = vld [vmem:[%s3661_s4 + $0x3] ss:$0 sm:$0xff] }
 0x22e   :  { %2628 = vmatpush3.bf16.msra.mxu0 %v2625_v57  ;;  %2479 = vmatprep.mubr.msk.f32.mxu1 %vm45_vm0, %v2744_v5  ;;  %v3142_v2 = vsel %vm506_vm13, %v496_v54, %v510_v60 }
 0x22f   :  { %2493 = vmatprep.mubr.msk.f32.mxu0 %vm45_vm0, %v2744_v5  ;;  %2630 = vmatprep.subr.bf16.mxu1 %v2629_v62  ;;  %2084 = vst.msk [vmem:[%s3662_s10 + $0x30] sm:$0xff] %vm45_vm0, %v3142_v2 }
 0x230   :  { %2480 = vmatmul.mubr.msk.f32.vlgmr.msra.gmra.mrb[16].mxu1 %vm45_vm0, %v2753_v7  ;;  %2638 = vmatprep.subr.bf16.mxu0 %v2637_v63 }
 0x231   :  { %2494 = vmatmul.mubr.msk.f32.vlgmr.msra.gmra.mrb[20].mxu0 %vm45_vm0, %v2753_v7  ;;  %2632 = vmatpush3.bf16.msra.mxu1 %v2629_v62  ;;  %v3128_v62 = vsel %vm507_vm11, %v501_v45, %v511_v58 }
 0x232   :  { %2640 = vmatpush3.bf16.msra.mxu0 %v2637_v63  ;;  %2482 = vmatprep.mubr.msk.f32.mxu1 %vm45_vm0, %v2758_v8  ;;  %2085 = vst.msk [vmem:[%s3662_s10 + $0x38] sm:$0xff] %vm45_vm0, %v3128_v62 }
 0x233   :  { %2496 = vmatprep.mubr.msk.f32.mxu0 %vm45_vm0, %v2758_v8  ;;  %2634 = vmatprep.subr.bf16.mxu1 %v2633_v4 }
 0x234   :  { %2483 = vmatmul.mubr.msk.f32.gmra.mrb[18].mxu1 %vm45_vm0, %v2767_v9  ;;  %2642 = vmatprep.subr.bf16.mxu0 %v2641_v6 }
 0x235   :  { %2497 = vmatmul.mubr.msk.f32.gmra.mrb[22].mxu0 %vm45_vm0, %v2767_v9  ;;  %2636 = vmatpush3.bf16.msra.mxu1 %v2633_v4 }
 0x236   :  { %2644 = vmatpush3.bf16.msra.mxu0 %v2641_v6  ;;  %2507 = vmatprep.mubr.msk.f32.mxu1 %vm45_vm0, %v2744_v5 }
 0x237   :  { %2521 = vmatprep.mubr.msk.f32.mxu0 %vm45_vm0, %v2744_v5  ;;  %v205_v5 = vand.u32 127, %v204_v10 }
 0x238   :  { %2508 = vmatmul.mubr.msk.f32.vlgmr.msra.gmra.mrb[20].mxu1 %vm45_vm0, %v2753_v7 }
 0x239   :  { %2522 = vmatmul.mubr.msk.f32.vlgmr.msra.gmra.mrb[24].mxu0 %vm45_vm0, %v2753_v7  ;;  %2510 = vmatprep.mubr.msk.f32.mxu1 %vm45_vm0, %v2758_v8 }
 0x23a   :  { %2524 = vmatprep.mubr.msk.f32.mxu0 %vm45_vm0, %v2758_v8 }
 0x23c   :  { %2511 = vmatmul.mubr.msk.f32.gmra.mrb[22].mxu1 %vm45_vm0, %v2767_v9 }
 0x23d   :  { %2525 = vmatmul.mubr.msk.f32.gmra.mrb[26].mxu0 %vm45_vm0, %v2767_v9 }
 0x24e   :  { %v2411_v0 = vpop.f32.mrb[8].mxu0 }
 0x24f   :  { %v761_v4 = vadd.f32 %v2411_v0, %v2105_v56  ;;  %v755_v10 = vpop.f32.mrb[9].mxu0 }
 0x251   :  { %vm775_vm15 = vcmp.ge.f32.partialorder %v761_v4, 0.0 }
 0x252   :  { %v2397_v63 = vpop.f32.mrb[4].mxu1 }
 0x253   :  { %v626_v3 = vadd.f32 %v2397_v63, %v2091_v55  ;;  %v620_v6 = vpop.f32.mrb[5].mxu1 }
 0x255   :  { %vm640_vm14 = vcmp.ge.f32.partialorder %v626_v3, 0.0 }
 0x2a9   :  { %v194_v11 = vpop.xlane.xlu0 %193 }
 0x2aa   :  { %vm206_vm2 = vcmp.eq.f32.partialorder %v2781_v43, %v194_v11 }
 0x2ab   :  { %v210_v12 = vsel %vm206_vm2, %v205_v5, 12 }
 0x2ac   :  { %v3055_v7 = vsel %vm143_vm1, %v210_v12, 2147483647  ;;  %v621_v12 = vadd.f32 %v2091_v55, %v620_v6 }
 0x2ad   :  { %v197_v13 = vpop.xlane.xlu1 %196  ;;  %v216_v14 = vshra.s32 %v3055_v7, 16  ;;  %v215_v50 = vand.u32 65535, %v3055_v7  ;;  %v756_v7 = vadd.f32 %v2105_v56, %v755_v10  ;;  %v2147_v10 = vld [vmem:[%s3661_s4 + $0x6] ss:$0 sm:$0xff] }
 0x2ae   :  { %v200_v15 = vpop.xlane.xlu0 %199  ;;  %vm207_vm3 = vcmp.eq.f32.partialorder %v2790_v47, %v197_v13  ;;  %v2400_v13 = vpop.f32.mrb[6].mxu1 }
 0x2af   :  { %vm208_vm4 = vcmp.eq.f32.partialorder %v2792_v48, %v200_v15  ;;  %v211_v8 = vsel %vm207_vm3, %v205_v5, 12  ;;  %v3060_v16 = vcvt.s32.f32 %v216_v14  ;;  %v3160_v14 = vld [vmem:[%s3661_s4 + $0x4] ss:$0 sm:$0xff]  ;;  %v644_v15 = vmul.f32 0.2, %v626_v3  ;;  %v630_v25 = vpop.f32.mrb[7].mxu1 }
 0x2b0   :  { %v212_v9 = vsel %vm208_vm4, %v205_v5, 12  ;;  %v3063_v17 = vsel %vm143_vm1, %v211_v8, 2147483647  ;;  %v779_v8 = vmul.f32 0.2, %v761_v4  ;;  %vm774_vm2 = vcmp.ge.f32.partialorder %v756_v7, 0.0 }
 0x2b1   :  { %v3066_v43 = vsel %vm143_vm1, %v212_v9, 2147483647  ;;  %219 = vmin.xlane.f32.xlu0 %v3060_v16  ;;  %v203_v18 = vpop.xlane.xlu1 %202  ;;  %v231_v19 = vshra.s32 %v3063_v17, 16  ;;  %v230_v11 = vand.u32 65535, %v3063_v17  ;;  %v643_v9 = vmul.f32 0.2, %v621_v12 }
 0x2b2   :  { %vm209_vm5 = vcmp.eq.f32.partialorder %v2808_v52, %v203_v18  ;;  %v246_v47 = vshra.s32 %v3066_v43, 16  ;;  %v2067_v52 = vld [vmem:[%s3661_s4] ss:$0 sm:$0xff]  ;;  %v778_v18 = vmul.f32 0.2, %v756_v7  ;;  %v631_v29 = vadd.f32 %v2091_v55, %v630_v25  ;;  %v2425_v31 = vpop.f32.mrb[8].mxu1 }
 0x2b3   :  { %v213_v48 = vsel %vm209_vm5, %v205_v5, 12  ;;  %v3072_v20 = vcvt.s32.f32 %v231_v19  ;;  %v357_v27 = vadd.f32 %v2369_v26, %v2067_v52  ;;  %v352_v30 = vadd.f32 %v2067_v52, %v351_v28  ;;  %v890_v38 = vpop.f32.mrb[9].mxu1 }
 0x2b4   :  { %v3075_v21 = vsel %vm143_vm1, %v213_v48, 2147483647  ;;  %v3077_v22 = vcvt.s32.f32 %v246_v47  ;;  %v367_v44 = vadd.f32 %v2372_v39, %v2067_v52  ;;  %v362_v53 = vadd.f32 %v2067_v52, %v361_v46  ;;  %v2414_v52 = vpop.f32.mrb[10].mxu0 }
 0x2b5   :  { %234 = vmin.xlane.f32.xlu1 %v3072_v20  ;;  %v261_v23 = vshra.s32 %v3075_v21, 16  ;;  %vm371_vm6 = vcmp.ge.f32.partialorder %v357_v27, 0.0  ;;  %v375_v33 = vmul.f32 0.2, %v357_v27  ;;  %vm370_vm7 = vcmp.ge.f32.partialorder %v352_v30, 0.0 }
 0x2b6   :  { %249 = vmin.xlane.f32.xlu0 %v3077_v22  ;;  %v374_v35 = vmul.f32 0.2, %v352_v30  ;;  %vm373_vm10 = vcmp.ge.f32.partialorder %v367_v44, 0.0  ;;  %v377_v57 = vmul.f32 0.2, %v367_v44  ;;  %vm372_vm12 = vcmp.ge.f32.partialorder %v362_v53, 0.0 }
 0x2b7   :  { %v3082_v24 = vcvt.s32.f32 %v261_v23  ;;  %v3091_v37 = vsel %vm371_vm6, %v357_v27, %v375_v33  ;;  %v376_v59 = vmul.f32 0.2, %v362_v53  ;;  %v3144_v5 = vcvt.s32.f32 %v215_v50 }
 0x2b8   :  { %383 = vst.msk [vmem:[%s3662_s10 + $0x8] sm:$0xff] %vm45_vm0, %v3091_v37  ;;  %v3098_v41 = vsel %vm370_vm7, %v352_v30, %v374_v35  ;;  %v3126_v61 = vsel %vm373_vm10, %v367_v44, %v377_v57  ;;  %vm639_vm1 = vcmp.ge.f32.partialorder %v621_v12, 0.0  ;;  %v245_v19 = vand.u32 65535, %v3066_v43  ;;  %v765_v30 = vpop.f32.mrb[11].mxu0 }
 0x2b9   :  { %264 = vmin.xlane.f32.xlu1 %v3082_v24  ;;  %382 = vst.msk [vmem:[%s3662_s10] sm:$0xff] %vm45_vm0, %v3098_v41  ;;  %385 = vst.msk [vmem:[%s3662_s10 + $0x18] sm:$0xff] %vm45_vm0, %v3126_v61  ;;  %v3140_v1 = vsel %vm372_vm12, %v362_v53, %v376_v59  ;;  %v3163_v47 = vsel %vm640_vm14, %v626_v3, %v644_v15  ;;  %v3165_v48 = vsel %vm775_vm15, %v761_v4, %v779_v8  ;;  %v2439_v36 = vpop.f32.mrb[12].mxu0 }
 0x2ba   :  { %384 = vst.msk [vmem:[%s3662_s10 + $0x10] sm:$0xff] %vm45_vm0, %v3140_v1  ;;  %v636_v23 = vadd.f32 %v2400_v13, %v2091_v55  ;;  %2097 = vst.msk [vmem:[%s3662_s10 + $0x48] sm:$0xff] %vm45_vm0, %v3163_v47  ;;  %v3177_v26 = vsel %vm639_vm1, %v621_v12, %v643_v9  ;;  %v3179_v27 = vsel %vm774_vm2, %v756_v7, %v778_v18  ;;  %vm641_vm5 = vcmp.ge.f32.partialorder %v631_v29, 0.0  ;;  %v1025_v46 = vpop.f32.mrb[13].mxu0  ;;  %v2428_v55 = vpop.f32.mrb[10].mxu1 }
 0x2bb   :  { %2111 = vst.msk [vmem:[%s3662_s10 + $0x68] sm:$0xff] %vm45_vm0, %v3165_v48  ;;  %v771_v28 = vadd.f32 %v2414_v52, %v2105_v56  ;;  %2096 = vst.msk [vmem:[%s3662_s10 + $0x40] sm:$0xff] %vm45_vm0, %v3177_v26  ;;  %v766_v34 = vadd.f32 %v2105_v56, %v765_v30  ;;  %v896_v35 = vadd.f32 %v2425_v31, %v3160_v14  ;;  %v645_v40 = vmul.f32 0.2, %v631_v29  ;;  %v2442_v60 = vpop.f32.mrb[14].mxu0  ;;  %v900_v63 = vpop.f32.mrb[11].mxu1 }
 0x2bc   :  { %2110 = vst.msk [vmem:[%s3662_s10 + $0x60] sm:$0xff] %vm45_vm0, %v3179_v27  ;;  %vm642_vm3 = vcmp.ge.f32.partialorder %v636_v23, 0.0  ;;  %v646_v33 = vmul.f32 0.2, %v636_v23  ;;  %v1031_v54 = vadd.f32 %v2439_v36, %v2133_v32  ;;  %v891_v57 = vadd.f32 %v3160_v14, %v890_v38  ;;  %v1035_v6 = vpop.f32.mrb[15].mxu0 }
 0x2bd   :  { %vm777_vm4 = vcmp.ge.f32.partialorder %v771_v28, 0.0  ;;  %v781_v39 = vmul.f32 0.2, %v771_v28  ;;  %vm776_vm6 = vcmp.ge.f32.partialorder %v766_v34, 0.0  ;;  %v780_v45 = vmul.f32 0.2, %v766_v34 }
 0x2be   :  { %v3195_v44 = vsel %vm642_vm3, %v636_v23, %v646_v33  ;;  %vm910_vm7 = vcmp.ge.f32.partialorder %v896_v35, 0.0  ;;  %v3204_v50 = vsel %vm641_vm5, %v631_v29, %v645_v40  ;;  %v914_v53 = vmul.f32 0.2, %v896_v35 }
 0x2bf   :  { %2099 = vst.msk [vmem:[%s3662_s10 + $0x58] sm:$0xff] %vm45_vm0, %v3195_v44  ;;  %v3202_v49 = vsel %vm777_vm4, %v771_v28, %v781_v39  ;;  %2098 = vst.msk [vmem:[%s3662_s10 + $0x50] sm:$0xff] %vm45_vm0, %v3204_v50  ;;  %v3216_v56 = vsel %vm776_vm6, %v766_v34, %v780_v45  ;;  %v1026_v58 = vadd.f32 %v2133_v32, %v1025_v46  ;;  %vm1045_vm8 = vcmp.ge.f32.partialorder %v1031_v54, 0.0  ;;  %v2161_v28 = vld [vmem:[%s3661_s4 + $0x7] ss:$0 sm:$0xff] }
 0x2c0   :  { %2113 = vst.msk [vmem:[%s3662_s10 + $0x78] sm:$0xff] %vm45_vm0, %v3202_v49  ;;  %v906_v59 = vadd.f32 %v2428_v55, %v3160_v14  ;;  %2112 = vst.msk [vmem:[%s3662_s10 + $0x70] sm:$0xff] %vm45_vm0, %v3216_v56  ;;  %v3226_v0 = vsel %vm910_vm7, %v896_v35, %v914_v53  ;;  %v1049_v3 = vmul.f32 0.2, %v1031_v54  ;;  %v1041_v4 = vadd.f32 %v2442_v60, %v2133_v32 }
 0x2c1   :  { %2125 = vst.msk [vmem:[%s3662_s10 + $0x88] sm:$0xff] %vm45_vm0, %v3226_v0  ;;  %vm909_vm9 = vcmp.ge.f32.partialorder %v891_v57, 0.0  ;;  %v913_v12 = vmul.f32 0.2, %v891_v57  ;;  %vm1044_vm10 = vcmp.ge.f32.partialorder %v1026_v58, 0.0  ;;  %v901_v52 = vadd.f32 %v3160_v14, %v900_v63 }
 0x2c2   :  { %v1048_v7 = vmul.f32 0.2, %v1026_v58  ;;  %v3236_v13 = vsel %vm1045_vm8, %v1031_v54, %v1049_v3  ;;  %vm912_vm11 = vcmp.ge.f32.partialorder %v906_v59, 0.0  ;;  %v916_v15 = vmul.f32 0.2, %v906_v59 }
 0x2c3   :  { %vm1047_vm12 = vcmp.ge.f32.partialorder %v1041_v4, 0.0  ;;  %2139 = vst.msk [vmem:[%s3662_s10 + $0xa8] sm:$0xff] %vm45_vm0, %v3236_v13  ;;  %v3243_v9 = vsel %vm909_vm9, %v891_v57, %v913_v12  ;;  %v1051_v23 = vmul.f32 0.2, %v1041_v4  ;;  %v1036_v14 = vadd.f32 %v2133_v32, %v1035_v6  ;;  %v3302_v12 = vld [vmem:[%s3661_s4 + $0x8] ss:$0 sm:$0xff] }
 0x2c4   :  { %v3245_v18 = vsel %vm1044_vm10, %v1026_v58, %v1048_v7  ;;  %2124 = vst.msk [vmem:[%s3662_s10 + $0x80] sm:$0xff] %vm45_vm0, %v3243_v9  ;;  %v3261_v30 = vsel %vm912_vm11, %v906_v59, %v916_v15  ;;  %vm911_vm13 = vcmp.ge.f32.partialorder %v901_v52, 0.0  ;;  %v915_v36 = vmul.f32 0.2, %v901_v52 }
 0x2c5   :  { %2138 = vst.msk [vmem:[%s3662_s10 + $0xa0] sm:$0xff] %vm45_vm0, %v3245_v18  ;;  %2127 = vst.msk [vmem:[%s3662_s10 + $0x98] sm:$0xff] %vm45_vm0, %v3261_v30  ;;  %v3269_v35 = vsel %vm1047_vm12, %v1041_v4, %v1051_v23  ;;  %vm1046_vm14 = vcmp.ge.f32.partialorder %v1036_v14, 0.0  ;;  %v1050_v32 = vmul.f32 0.2, %v1036_v14  ;;  %v247_v17 = vcvt.s32.f32 %v245_v19 }
 0x2c6   :  { %2141 = vst.msk [vmem:[%s3662_s10 + $0xb8] sm:$0xff] %vm45_vm0, %v3269_v35  ;;  %v3276_v40 = vsel %vm911_vm13, %v901_v52, %v915_v36  ;;  %v260_v43 = vand.u32 65535, %v3075_v21 }
 0x2c7   :  { %2126 = vst.msk [vmem:[%s3662_s10 + $0x90] sm:$0xff] %vm45_vm0, %v3276_v40  ;;  %v3283_v54 = vsel %vm1046_vm14, %v1036_v14, %v1050_v32 }
 0x2c8   :  { %2140 = vst.msk [vmem:[%s3662_s10 + $0xb0] sm:$0xff] %vm45_vm0, %v3283_v54 }
 0x2fb   :  { %v2453_v8 = vpop.f32.mrb[12].mxu1 }
 0x2fc   :  { %v2467_v25 = vpop.f32.mrb[16].mxu0  ;;  %v1160_v29 = vpop.f32.mrb[13].mxu1  ;;  %v1166_v31 = vadd.f32 %v2453_v8, %v2147_v10 }
 0x2fd   :  { %v1301_v33 = vadd.f32 %v2467_v25, %v2161_v28  ;;  %v1295_v34 = vpop.f32.mrb[17].mxu0  ;;  %v1161_v38 = vadd.f32 %v2147_v10, %v1160_v29 }
 0x2fe   :  { %vm1180_vm15 = vcmp.ge.f32.partialorder %v1166_v31, 0.0  ;;  %v1184_v39 = vmul.f32 0.2, %v1166_v31  ;;  %v1296_v58 = vadd.f32 %v2161_v28, %v1295_v34 }
 0x2ff   :  { %vm1315_vm1 = vcmp.ge.f32.partialorder %v1301_v33, 0.0  ;;  %v1319_v45 = vmul.f32 0.2, %v1301_v33  ;;  %vm1179_vm2 = vcmp.ge.f32.partialorder %v1161_v38, 0.0  ;;  %v2456_v46 = vpop.f32.mrb[14].mxu1 }
 0x300   :  { %v2470_v53 = vpop.f32.mrb[18].mxu0  ;;  %v3285_v55 = vsel %vm1180_vm15, %v1166_v31, %v1184_v39  ;;  %v1183_v57 = vmul.f32 0.2, %v1161_v38  ;;  %v1170_v59 = vpop.f32.mrb[15].mxu1  ;;  %v1176_v3 = vadd.f32 %v2456_v46, %v2147_v10  ;;  %vm1314_vm3 = vcmp.ge.f32.partialorder %v1296_v58, 0.0 }
 0x301   :  { %v1305_v60 = vpop.f32.mrb[19].mxu0  ;;  %2153 = vst.msk [vmem:[%s3662_s10 + $0xc8] sm:$0xff] %vm45_vm0, %v3285_v55  ;;  %v3297_v63 = vsel %vm1315_vm1, %v1301_v33, %v1319_v45  ;;  %v1311_v4 = vadd.f32 %v2470_v53, %v2161_v28  ;;  %v1171_v6 = vadd.f32 %v2147_v10, %v1170_v59  ;;  %v1318_v15 = vmul.f32 0.2, %v1296_v58  ;;  %v2189_v10 = vld [vmem:[%s3661_s4 + $0x9] ss:$0 sm:$0xff] }
 0x302   :  { %2167 = vst.msk [vmem:[%s3662_s10 + $0xe8] sm:$0xff] %vm45_vm0, %v3297_v63  ;;  %v3310_v7 = vsel %vm1179_vm2, %v1161_v38, %v1183_v57  ;;  %v1306_v8 = vadd.f32 %v2161_v28, %v1305_v60  ;;  %vm1182_vm4 = vcmp.ge.f32.partialorder %v1176_v3, 0.0  ;;  %v1186_v52 = vmul.f32 0.2, %v1176_v3 }
 0x303   :  { %v2481_v23 = vpop.f32.mrb[16].mxu1  ;;  %2152 = vst.msk [vmem:[%s3662_s10 + $0xc0] sm:$0xff] %vm45_vm0, %v3310_v7  ;;  %vm1317_vm5 = vcmp.ge.f32.partialorder %v1311_v4, 0.0  ;;  %v1321_v25 = vmul.f32 0.2, %v1311_v4  ;;  %v3320_v29 = vsel %vm1314_vm3, %v1296_v58, %v1318_v15  ;;  %vm1181_vm6 = vcmp.ge.f32.partialorder %v1171_v6, 0.0 }
 0x304   :  { %v1185_v14 = vmul.f32 0.2, %v1171_v6  ;;  %vm1316_vm7 = vcmp.ge.f32.partialorder %v1306_v8, 0.0  ;;  %v2495_v28 = vpop.f32.mrb[20].mxu0  ;;  %v1430_v31 = vpop.f32.mrb[17].mxu1  ;;  %2166 = vst.msk [vmem:[%s3662_s10 + $0xe0] sm:$0xff] %vm45_vm0, %v3320_v29  ;;  %v3327_v33 = vsel %vm1182_vm4, %v1176_v3, %v1186_v52  ;;  %v1436_v38 = vadd.f32 %v2481_v23, %v3302_v12 }
 0x305   :  { %v3329_v34 = vsel %vm1317_vm5, %v1311_v4, %v1321_v25  ;;  %v1320_v36 = vmul.f32 0.2, %v1306_v8  ;;  %v1565_v32 = vpop.f32.mrb[21].mxu0  ;;  %2155 = vst.msk [vmem:[%s3662_s10 + $0xd8] sm:$0xff] %vm45_vm0, %v3327_v33  ;;  %v1571_v45 = vadd.f32 %v2495_v28, %v2189_v10  ;;  %v1431_v46 = vadd.f32 %v3302_v12, %v1430_v31 }
 0x306   :  { %2169 = vst.msk [vmem:[%s3662_s10 + $0xf8] sm:$0xff] %vm45_vm0, %v3329_v34  ;;  %v3342_v39 = vsel %vm1181_vm6, %v1171_v6, %v1185_v14  ;;  %v1566_v53 = vadd.f32 %v2189_v10, %v1565_v32  ;;  %vm1450_vm8 = vcmp.ge.f32.partialorder %v1436_v38, 0.0  ;;  %v1454_v59 = vmul.f32 0.2, %v1436_v38 }
 0x307   :  { %v2484_v57 = vpop.f32.mrb[18].mxu1  ;;  %2154 = vst.msk [vmem:[%s3662_s10 + $0xd0] sm:$0xff] %vm45_vm0, %v3342_v39  ;;  %v3351_v58 = vsel %vm1316_vm7, %v1306_v8, %v1320_v36  ;;  %vm1585_vm9 = vcmp.ge.f32.partialorder %v1571_v45, 0.0  ;;  %v1589_v15 = vmul.f32 0.2, %v1571_v45  ;;  %vm1449_vm10 = vcmp.ge.f32.partialorder %v1431_v46, 0.0 }
 0x308   :  { %v1446_v60 = vadd.f32 %v2484_v57, %v3302_v12  ;;  %v2498_v3 = vpop.f32.mrb[22].mxu0  ;;  %v1440_v4 = vpop.f32.mrb[19].mxu1  ;;  %2168 = vst.msk [vmem:[%s3662_s10 + $0xf0] sm:$0xff] %vm45_vm0, %v3351_v58  ;;  %v1453_v23 = vmul.f32 0.2, %v1431_v46  ;;  %v232_v8 = vcvt.s32.f32 %v230_v11  ;;  %v3365_v52 = vsel %vm1450_vm8, %v1436_v38, %v1454_v59 }
 0x309   :  { %vm1584_vm12 = vcmp.ge.f32.partialorder %v1566_v53, 0.0  ;;  %v1575_v25 = vpop.f32.mrb[23].mxu0  ;;  %2181 = vst.msk [vmem:[%s3662_s10 + $0x108] sm:$0xff] %vm45_vm0, %v3365_v52  ;;  %v3373_v28 = vsel %vm1585_vm9, %v1571_v45, %v1589_v15  ;;  %v1581_v11 = vadd.f32 %v2498_v3, %v2189_v10  ;;  %v2203_v59 = vld [vmem:[%s3661_s4 + $0xa] ss:$0 sm:$0xff] }
 0x30a   :  { %v3375_v31 = vsel %vm1449_vm10, %v1431_v46, %v1453_v23  ;;  %2195 = vst.msk [vmem:[%s3662_s10 + $0x128] sm:$0xff] %vm45_vm0, %v3373_v28  ;;  %vm1452_vm13 = vcmp.ge.f32.partialorder %v1446_v60, 0.0  ;;  %v1441_v46 = vadd.f32 %v3302_v12, %v1440_v4  ;;  %v1576_v57 = vadd.f32 %v2189_v10, %v1575_v25 }
 0x30b   :  { %v2509_v36 = vpop.f32.mrb[20].mxu1  ;;  %2180 = vst.msk [vmem:[%s3662_s10 + $0x100] sm:$0xff] %vm45_vm0, %v3375_v31  ;;  %vm1587_vm15 = vcmp.ge.f32.partialorder %v1581_v11, 0.0  ;;  %v262_v4 = vcvt.s32.f32 %v260_v43 }
 0x30c   :  { %v2523_v38 = vpop.f32.mrb[24].mxu0  ;;  %v1700_v32 = vpop.f32.mrb[21].mxu1  ;;  %v1706_v12 = vadd.f32 %v2509_v36, %v2203_v59  ;;  %vm1451_vm2 = vcmp.ge.f32.partialorder %v1441_v46, 0.0  ;;  %v1455_v3 = vmul.f32 0.2, %v1441_v46  ;;  %vm1586_vm3 = vcmp.ge.f32.partialorder %v1576_v57, 0.0 }
 0x30d   :  { %v1835_v15 = vpop.f32.mrb[25].mxu0 }
 0x30e   :  { %vm1720_vm5 = vcmp.ge.f32.partialorder %v1706_v12, 0.0 }
 0x33e   :  { %v3354_v6 = vpop.xlane.xlu0 %219 }
 0x33f   :  { %vm221_vm11 = vcmp.eq.f32.partialorder %v3060_v16, %v3354_v6  ;;  %v1588_v16 = vmul.f32 0.2, %v1566_v53 }
 0x340   :  { %v222_v14 = vsel %vm221_vm11, %v3144_v5, inf  ;;  %v1456_v5 = vmul.f32 0.2, %v1446_v60 }
 0x341   :  { %223 = vmin.xlane.f32.xlu0 %v222_v14  ;;  %v3393_v19 = vsel %vm1584_vm12, %v1566_v53, %v1588_v16  ;;  %v3431_v14 = vsel %vm1451_vm2, %v1441_v46, %v1455_v3 }
 0x342   :  { %v3389_v45 = vpop.xlane.xlu1 %234  ;;  %2194 = vst.msk [vmem:[%s3662_s10 + $0x120] sm:$0xff] %vm45_vm0, %v3393_v19  ;;  %v3408_v21 = vsel %vm1452_vm13, %v1446_v60, %v1456_v5  ;;  %2182 = vst.msk [vmem:[%s3662_s10 + $0x110] sm:$0xff] %vm45_vm0, %v3431_v14  ;;  %v1701_v5 = vadd.f32 %v2203_v59, %v1700_v32 }
 0x343   :  { %v3399_v23 = vpop.xlane.xlu0 %249  ;;  %vm236_vm14 = vcmp.eq.f32.partialorder %v3072_v20, %v3389_v45  ;;  %2183 = vst.msk [vmem:[%s3662_s10 + $0x118] sm:$0xff] %vm45_vm0, %v3408_v21  ;;  %v1591_v20 = vmul.f32 0.2, %v1581_v11 }
 0x344   :  { %vm251_vm1 = vcmp.eq.f32.partialorder %v3077_v22, %v3399_v23  ;;  %v237_v10 = vsel %vm236_vm14, %v232_v8, inf  ;;  %v1590_v22 = vmul.f32 0.2, %v1576_v57  ;;  %v2217_v8 = vld [vmem:[%s3661_s4 + $0xb] ss:$0 sm:$0xff]  ;;  %vm1719_vm7 = vcmp.ge.f32.partialorder %v1701_v5, 0.0 }
 0x345   :  { %v252_v53 = vsel %vm251_vm1, %v247_v17, inf  ;;  %238 = vmin.xlane.f32.xlu1 %v237_v10  ;;  %v3419_v25 = vsel %vm1587_vm15, %v1581_v11, %v1591_v20  ;;  %v1724_v17 = vmul.f32 0.2, %v1706_v12  ;;  %v1836_v11 = vadd.f32 %v2217_v8, %v1835_v15  ;;  %v2526_v20 = vpop.f32.mrb[26].mxu0 }
 0x346   :  { %253 = vmin.xlane.f32.xlu0 %v252_v53  ;;  %v3417_v60 = vpop.xlane.xlu1 %264  ;;  %2197 = vst.msk [vmem:[%s3662_s10 + $0x138] sm:$0xff] %vm45_vm0, %v3419_v25  ;;  %v3438_v36 = vsel %vm1586_vm3, %v1576_v57, %v1590_v22  ;;  %v1851_v3 = vadd.f32 %v2526_v20, %v2217_v8  ;;  %v1845_v22 = vpop.f32.mrb[27].mxu0  ;;  %v1892_v20 = vld [vmem:[%s3663_s5 + $0x8] sm:$0xff] }
 0x347   :  { %vm266_vm4 = vcmp.eq.f32.partialorder %v3082_v24, %v3417_v60  ;;  %v1841_v24 = vadd.f32 %v2523_v38, %v2217_v8  ;;  %2196 = vst.msk [vmem:[%s3662_s10 + $0x130] sm:$0xff] %vm45_vm0, %v3438_v36  ;;  %v3445_v43 = vsel %vm1720_vm5, %v1706_v12, %v1724_v17  ;;  %v1723_v38 = vmul.f32 0.2, %v1701_v5  ;;  %v2512_v12 = vpop.f32.mrb[22].mxu1 }
 0x348   :  { %v267_v16 = vsel %vm266_vm4, %v262_v4, inf  ;;  %2209 = vst.msk [vmem:[%s3662_s10 + $0x148] sm:$0xff] %vm45_vm0, %v3445_v43  ;;  %vm1854_vm8 = vcmp.ge.f32.partialorder %v1836_v11, 0.0  ;;  %v1858_v57 = vmul.f32 0.2, %v1836_v11  ;;  %v1716_v53 = vadd.f32 %v2512_v12, %v2203_v59  ;;  %v1710_v4 = vpop.f32.mrb[23].mxu1 }
 0x349   :  { %268 = vmin.xlane.f32.xlu1 %v267_v16  ;;  %vm1855_vm6 = vcmp.ge.f32.partialorder %v1841_v24, 0.0  ;;  %v1859_v46 = vmul.f32 0.2, %v1841_v24  ;;  %v3459_v32 = vsel %vm1719_vm7, %v1701_v5, %v1723_v38  ;;  %v1711_v16 = vadd.f32 %v2203_v59, %v1710_v4  ;;  %v1891_v12 = vld [vmem:[%s3663_s5] sm:$0xff]  ;;  %v1894_v4 = vld [vmem:[%s3663_s5 + $0x18] sm:$0xff] }
 0x34a   :  { %v3461_v15 = vsel %vm1854_vm8, %v1836_v11, %v1858_v57  ;;  %2208 = vst.msk [vmem:[%s3662_s10 + $0x140] sm:$0xff] %vm45_vm0, %v3459_v32  ;;  %v1846_v17 = vadd.f32 %v2217_v8, %v1845_v22  ;;  %vm1722_vm9 = vcmp.ge.f32.partialorder %v1716_v53, 0.0  ;;  %vm1857_vm10 = vcmp.ge.f32.partialorder %v1851_v3, 0.0 }
 0x34b   :  { %v3452_v10 = vsel %vm1855_vm6, %v1841_v24, %v1859_v46  ;;  %2222 = vst.msk [vmem:[%s3662_s10 + $0x160] sm:$0xff] %vm45_vm0, %v3461_v15  ;;  %v1726_v24 = vmul.f32 0.2, %v1716_v53  ;;  %v1861_v5 = vmul.f32 0.2, %v1851_v3  ;;  %vm1721_vm11 = vcmp.ge.f32.partialorder %v1711_v16, 0.0 }
 0x34c   :  { %2223 = vst.msk [vmem:[%s3662_s10 + $0x168] sm:$0xff] %vm45_vm0, %v3452_v10  ;;  %v1725_v11 = vmul.f32 0.2, %v1711_v16  ;;  %vm1856_vm12 = vcmp.ge.f32.partialorder %v1846_v17, 0.0  ;;  %v1860_v46 = vmul.f32 0.2, %v1846_v17 }
 0x34d   :  { %v3473_v38 = vsel %vm1722_vm9, %v1716_v53, %v1726_v24  ;;  %v3475_v57 = vsel %vm1857_vm10, %v1851_v3, %v1861_v5  ;;  %v1893_v53 = vld [vmem:[%s3663_s5 + $0x10] sm:$0xff]  ;;  %v2645_v3 = vpack.c.bf16 %v1892_v20, %v1891_v12 }
 0x34e   :  { %3669 = vst [vmem:[#allocation3_spill] sm:$0xff] %v3475_v57  ;;  %2211 = vst.msk [vmem:[%s3662_s10 + $0x158] sm:$0xff] %vm45_vm0, %v3473_v38  ;;  %v3487_v59 = vsel %vm1721_vm11, %v1711_v16, %v1725_v11  ;;  %v3489_v8 = vsel %vm1856_vm12, %v1846_v17, %v1860_v46  ;;  %v2649_v22 = vpack.c.bf16 %v1894_v4, %v1893_v53  ;;  %v226_v16 = vcvt.f32.s32 %v3354_v6 }
 0x34f   :  { %2225 = vst.msk [vmem:[%s3662_s10 + $0x178] sm:$0xff] %vm45_vm0, %v3475_v57  ;;  %2210 = vst.msk [vmem:[%s3662_s10 + $0x150] sm:$0xff] %vm45_vm0, %v3487_v59  ;;  %2646 = vmatprep.subr.bf16.mxu1 %v2645_v3  ;;  %v241_v11 = vcvt.f32.s32 %v3389_v45  ;;  %v256_v4 = vcvt.f32.s32 %v3399_v23  ;;  %v271_v45 = vcvt.f32.s32 %v3417_v60 }
 0x350   :  { %2224 = vst.msk [vmem:[%s3662_s10 + $0x170] sm:$0xff] %vm45_vm0, %v3489_v8  ;;  %2648 = vmatpush3.bf16.msra.mxu1 %v2645_v3  ;;  %v227_v24 = vshll.u32 %v226_v16, 16 }
 0x351   :  { %2650 = vmatprep.subr.bf16.mxu1 %v2649_v22  ;;  %v242_v20 = vshll.u32 %v241_v11, 16  ;;  %v257_v11 = vshll.u32 %v256_v4, 16  ;;  %v272_v23 = vshll.u32 %v271_v45, 16 }
 0x354   :  { %2652 = vmatpush3.bf16.msra.mxu1 %v2649_v22 }
 0x3ce   :  { %v224_v17 = vpop.xlane.xlu0 %223 }
 0x3cf   :  { %v225_v5 = vcvt.f32.s32 %v224_v17 }
 0x3d1   :  { %v3515_v46 = vadd.s32 %v227_v24, %v225_v5 }
 0x3d2   :  { %v239_v57 = vpop.xlane.xlu1 %238 }
 0x3d3   :  { %v240_v12 = vcvt.f32.s32 %v239_v57  ;;  %vm386_vm13 = vcmp.eq.s32.totalorder %v3515_v46, 0  ;;  %vm521_vm14 = vcmp.eq.s32.totalorder %v3515_v46, 1  ;;  %vm656_vm15 = vcmp.eq.s32.totalorder %v3515_v46, 2  ;;  %v254_v53 = vpop.xlane.xlu0 %253 }
 0x3d4   :  { %v398_v3 = vsel %vm386_vm13, %v3098_v41, 0.0  ;;  %v533_v6 = vsel %vm521_vm14, %v3113_v51, 0.0  ;;  %vm791_vm1 = vcmp.eq.s32.totalorder %v3515_v46, 3  ;;  %v668_v16 = vsel %vm656_vm15, %v3177_v26, 0.0 }
 0x3d5   :  { %v537_v22 = vadd.f32 %v533_v6, %v398_v3  ;;  %v3525_v57 = vadd.s32 %v242_v20, %v240_v12  ;;  %v255_v17 = vcvt.f32.s32 %v254_v53  ;;  %vm926_vm2 = vcmp.eq.s32.totalorder %v3515_v46, 4 }
 0x3d6   :  { %v269_v24 = vpop.xlane.xlu1 %268  ;;  %v803_v41 = vsel %vm791_vm1, %v3179_v27, 0.0  ;;  %vm1061_vm3 = vcmp.eq.s32.totalorder %v3515_v46, 5  ;;  %v938_v6 = vsel %vm926_vm2, %v3243_v9, 0.0  ;;  %vm1196_vm5 = vcmp.eq.s32.totalorder %v3515_v46, 6 }
 0x3d7   :  { %v672_v5 = vadd.f32 %v668_v16, %v537_v22  ;;  %v270_v3 = vcvt.f32.s32 %v269_v24  ;;  %vm387_vm4 = vcmp.eq.s32.totalorder %v3525_v57, 0  ;;  %v3533_v60 = vadd.s32 %v257_v11, %v255_v17 }
 0x3d8   :  { %v399_v12 = vsel %vm387_vm4, %v3091_v37, 0.0  ;;  %v1073_v20 = vsel %vm1061_vm3, %v3245_v18, 0.0  ;;  %vm1331_vm6 = vcmp.eq.s32.totalorder %v3515_v46, 7  ;;  %vm522_vm7 = vcmp.eq.s32.totalorder %v3525_v57, 1 }
 0x3d9   :  { %v807_v51 = vadd.f32 %v803_v41, %v672_v5  ;;  %vm657_vm8 = vcmp.eq.s32.totalorder %v3525_v57, 2  ;;  %vm1466_vm9 = vcmp.eq.s32.totalorder %v3515_v46, 8  ;;  %vm1601_vm10 = vcmp.eq.s32.totalorder %v3515_v46, 9 }
 0x3da   :  { %v534_v9 = vsel %vm522_vm7, %v3100_v42, 0.0  ;;  %v3544_v53 = vadd.s32 %v272_v23, %v270_v3  ;;  %v1208_v4 = vsel %vm1196_vm5, %v3310_v7, 0.0  ;;  %vm792_vm11 = vcmp.eq.s32.totalorder %v3525_v57, 3 }
 0x3db   :  { %v942_v26 = vadd.f32 %v938_v6, %v807_v51  ;;  %v538_v37 = vadd.f32 %v534_v9, %v399_v12  ;;  %v1343_v22 = vsel %vm1331_vm6, %v3320_v29, 0.0  ;;  %vm1736_vm12 = vcmp.eq.s32.totalorder %v3515_v46, 10 }
 0x3dc   :  { %v669_v45 = vsel %vm657_vm8, %v3163_v47, 0.0  ;;  %v1478_v16 = vsel %vm1466_vm9, %v3375_v31, 0.0  ;;  %v1613_v17 = vsel %vm1601_vm10, %v3393_v19, 0.0  ;;  %vm927_vm13 = vcmp.eq.s32.totalorder %v3525_v57, 4 }
 0x3dd   :  { %v1077_v27 = vadd.f32 %v1073_v20, %v942_v26  ;;  %v673_v24 = vadd.f32 %v669_v45, %v538_v37  ;;  %vm1871_vm14 = vcmp.eq.s32.totalorder %v3515_v46, 11  ;;  %v804_v7 = vsel %vm792_vm11, %v3165_v48, 0.0 }
 0x3de   :  { %vm1062_vm15 = vcmp.eq.s32.totalorder %v3525_v57, 5  ;;  %v1748_v29 = vsel %vm1736_vm12, %v3459_v32, 0.0  ;;  %vm1197_vm1 = vcmp.eq.s32.totalorder %v3525_v57, 6  ;;  %vm388_vm2 = vcmp.eq.s32.totalorder %v3533_v60, 0 }
 0x3df   :  { %v1212_v18 = vadd.f32 %v1208_v4, %v1077_v27  ;;  %v808_v5 = vadd.f32 %v804_v7, %v673_v24  ;;  %v939_v31 = vsel %vm927_vm13, %v3226_v0, 0.0  ;;  %v400_v19 = vsel %vm388_vm2, %v3140_v1, 0.0 }
 0x3e0   :  { %vm523_vm3 = vcmp.eq.s32.totalorder %v3533_v60, 1  ;;  %v1074_v11 = vsel %vm1062_vm15, %v3236_v13, 0.0  ;;  %vm658_vm4 = vcmp.eq.s32.totalorder %v3533_v60, 2  ;;  %v1209_v51 = vsel %vm1197_vm1, %v3285_v55, 0.0 }
 0x3e1   :  { %v1347_v42 = vadd.f32 %v1343_v22, %v1212_v18  ;;  %v943_v41 = vadd.f32 %v939_v31, %v808_v5  ;;  %v535_v48 = vsel %vm523_vm3, %v3142_v2, 0.0  ;;  %vm793_vm5 = vcmp.eq.s32.totalorder %v3533_v60, 3 }
 0x3e2   :  { %v539_v23 = vadd.f32 %v535_v48, %v400_v19  ;;  %vm1332_vm6 = vcmp.eq.s32.totalorder %v3525_v57, 7  ;;  %vm1467_vm7 = vcmp.eq.s32.totalorder %v3525_v57, 8  ;;  %v670_v1 = vsel %vm658_vm4, %v3204_v50, 0.0 }
 0x3e3   :  { %v1482_v47 = vadd.f32 %v1478_v16, %v1347_v42  ;;  %v1078_v3 = vadd.f32 %v1074_v11, %v943_v41  ;;  %vm1602_vm8 = vcmp.eq.s32.totalorder %v3525_v57, 9  ;;  %vm928_vm9 = vcmp.eq.s32.totalorder %v3533_v60, 4 }
 0x3e4   :  { %v674_v13 = vadd.f32 %v670_v1, %v539_v23  ;;  %v1883_v2 = vsel %vm1871_vm14, %v3461_v15, 0.0  ;;  %v805_v6 = vsel %vm793_vm5, %v3216_v56, 0.0  ;;  %vm1063_vm10 = vcmp.eq.s32.totalorder %v3533_v60, 5 }
 0x3e5   :  { %v1617_v32 = vadd.f32 %v1613_v17, %v1482_v47  ;;  %v1213_v55 = vadd.f32 %v1209_v51, %v1078_v3  ;;  %v1344_v12 = vsel %vm1332_vm6, %v3297_v63, 0.0  ;;  %v1479_v50 = vsel %vm1467_vm7, %v3365_v52, 0.0 }
 0x3e6   :  { %v809_v20 = vadd.f32 %v805_v6, %v674_v13  ;;  %v1614_v9 = vsel %vm1602_vm8, %v3373_v28, 0.0  ;;  %vm1737_vm11 = vcmp.eq.s32.totalorder %v3525_v57, 10  ;;  %v940_v4 = vsel %vm928_vm9, %v3276_v40, 0.0 }
 0x3e7   :  { %v1752_v0 = vadd.f32 %v1748_v29, %v1617_v32  ;;  %v1348_v27 = vadd.f32 %v1344_v12, %v1213_v55  ;;  %vm1872_vm12 = vcmp.eq.s32.totalorder %v3525_v57, 11  ;;  %v1075_v15 = vsel %vm1063_vm10, %v3283_v54, 0.0  ;;  %v3670_v32 = vld [vmem:[#allocation3_spill] sm:$0xff] }
 0x3e8   :  { %v944_v56 = vadd.f32 %v940_v4, %v809_v20  ;;  %vm1198_vm13 = vcmp.eq.s32.totalorder %v3533_v60, 6  ;;  %vm389_vm14 = vcmp.eq.s32.totalorder %v3544_v53, 0  ;;  %vm524_vm15 = vcmp.eq.s32.totalorder %v3544_v53, 1 }
 0x3e9   :  { %v1887_v26 = vadd.f32 %v1883_v2, %v1752_v0  ;;  %v1483_v63 = vadd.f32 %v1479_v50, %v1348_v27  ;;  %vm659_vm1 = vcmp.eq.s32.totalorder %v3544_v53, 2  ;;  %vm1333_vm2 = vcmp.eq.s32.totalorder %v3533_v60, 7  ;;  %v2231_v0 = vld [vmem:[%s3666_s7] ss:$0 sm:$0xff] }
 0x3ea   :  { %v1079_v52 = vadd.f32 %v1075_v15, %v944_v56  ;;  %v401_v40 = vsel %vm389_vm14, %v3126_v61, 0.0  ;;  %v536_v28 = vsel %vm524_vm15, %v3128_v62, 0.0  ;;  %v1210_v37 = vsel %vm1198_vm13, %v3342_v39, 0.0 }
 0x3eb   :  { %2535 = vmatprep.mubr.msk.f32.mxu1 %vm45_vm0, %v1887_v26  ;;  %v1618_v46 = vadd.f32 %v1614_v9, %v1483_v63  ;;  %v540_v54 = vadd.f32 %v536_v28, %v401_v40  ;;  %vm794_vm3 = vcmp.eq.s32.totalorder %v3544_v53, 3  ;;  %v1749_v18 = vsel %vm1737_vm11, %v3445_v43, 0.0 }
 0x3ec   :  { %v1214_v22 = vadd.f32 %v1210_v37, %v1079_v52  ;;  %vm1468_vm4 = vcmp.eq.s32.totalorder %v3533_v60, 8  ;;  %v671_v45 = vsel %vm659_vm1, %v3195_v44, 0.0  ;;  %v1345_v61 = vsel %vm1333_vm2, %v3351_v58, 0.0 }
 0x3ed   :  { %v1753_v16 = vadd.f32 %v1749_v18, %v1618_v46  ;;  %v675_v17 = vadd.f32 %v671_v45, %v540_v54  ;;  %vm929_vm5 = vcmp.eq.s32.totalorder %v3544_v53, 4  ;;  %v1884_v62 = vsel %vm1872_vm12, %v3452_v10, 0.0 }
 0x3ee   :  { %v1349_v39 = vadd.f32 %v1345_v61, %v1214_v22  ;;  %vm1603_vm6 = vcmp.eq.s32.totalorder %v3533_v60, 9  ;;  %v806_v43 = vsel %vm794_vm3, %v3202_v49, 0.0  ;;  %v1480_v42 = vsel %vm1468_vm4, %v3431_v14, 0.0 }
 0x3ef   :  { %v1888_v24 = vadd.f32 %v1884_v62, %v1753_v16  ;;  %v810_v7 = vadd.f32 %v806_v43, %v675_v17  ;;  %vm1064_vm7 = vcmp.eq.s32.totalorder %v3544_v53, 5  ;;  %vm1738_vm8 = vcmp.eq.s32.totalorder %v3533_v60, 10 }
 0x3f0   :  { %v1484_v44 = vadd.f32 %v1480_v42, %v1349_v39  ;;  %v941_v58 = vsel %vm929_vm5, %v3261_v30, 0.0  ;;  %v1615_v10 = vsel %vm1603_vm6, %v3438_v36, 0.0  ;;  %vm1199_vm9 = vcmp.eq.s32.totalorder %v3544_v53, 6 }
 0x3f1   :  { %2536 = vmatmul.mubr.msk.f32.vlgmr.msra.gmra.mrb[24].mxu1 %vm45_vm0, %v1888_v24  ;;  %v945_v57 = vadd.f32 %v941_v58, %v810_v7  ;;  %vm1873_vm10 = vcmp.eq.s32.totalorder %v3533_v60, 11  ;;  %v1076_v49 = vsel %vm1064_vm7, %v3269_v35, 0.0  ;;  %v1750_v14 = vsel %vm1738_vm8, %v3487_v59, 0.0 }
 0x3f2   :  { %v1619_v29 = vadd.f32 %v1615_v10, %v1484_v44  ;;  %vm1334_vm11 = vcmp.eq.s32.totalorder %v3544_v53, 7  ;;  %v1211_v30 = vsel %vm1199_vm9, %v3327_v33, 0.0  ;;  %v1885_v31 = vsel %vm1873_vm10, %v3489_v8, 0.0 }
 0x3f3   :  { %v1080_v5 = vadd.f32 %v1076_v49, %v945_v57  ;;  %vm1469_vm12 = vcmp.eq.s32.totalorder %v3544_v53, 8  ;;  %v1346_v41 = vsel %vm1334_vm11, %v3329_v34, 0.0  ;;  %vm1604_vm13 = vcmp.eq.s32.totalorder %v3544_v53, 9 }
 0x3f4   :  { %v1754_v47 = vadd.f32 %v1750_v14, %v1619_v29  ;;  %v1481_v35 = vsel %vm1469_vm12, %v3408_v21, 0.0  ;;  %vm1739_vm14 = vcmp.eq.s32.totalorder %v3544_v53, 10  ;;  %v1616_v33 = vsel %vm1604_vm13, %v3419_v25, 0.0  ;;  %v2226_v25 = vld [vmem:[%s3665_s6] ss:$0 sm:$0xff] }
 0x3f5   :  { %v1215_v19 = vadd.f32 %v1211_v30, %v1080_v5  ;;  %vm1874_vm15 = vcmp.eq.s32.totalorder %v3544_v53, 11  ;;  %v1751_v8 = vsel %vm1739_vm14, %v3473_v38, 0.0  ;;  %v17_v21 = vstv %s3664_s8 }
 0x3f6   :  { %v1889_v36 = vadd.f32 %v1885_v31, %v1754_v47  ;;  %v1886_v34 = vsel %vm1874_vm15, %v3670_v32, 0.0  ;;  %18 = vst [vmem:[#allocation2] sm:$0x1] %v17_v21  ;;  %vm2022_vm2 = vcmask 31744   ;;  %vm2046_vm5 = vcmask 7168  }
 0x3f7   :  { %v1350_v11 = vadd.f32 %v1346_v41, %v1215_v19 }
 0x3f8   :  { %2538 = vmatprep.mubr.msk.f32.mxu1 %vm45_vm0, %v1889_v36 }
 0x3f9   :  { %v1485_v59 = vadd.f32 %v1481_v35, %v1350_v11 }
 0x3fb   :  { %v1620_v60 = vadd.f32 %v1616_v33, %v1485_v59 }
 0x3fd   :  { %v1755_v48 = vadd.f32 %v1751_v8, %v1620_v60  ;;  %v2232_v54 = vld [vmem:[#allocation2] ss:$0 sm:$0xff] }
 0x3ff   :  { %v1890_v51 = vadd.f32 %v1886_v34, %v1755_v48 }
 0x401   :  { %2539 = vmatmul.mubr.msk.f32.gmra.mrb[26].mxu1 %vm45_vm0, %v1890_v51 }
 0x4c4   :  { %v2537_v23 = vpop.f32.mrb[24].mxu1 }
 0x4c5   :  { %v1986_v3 = vadd.f32 %v2537_v23, %v2226_v25  ;;  %v1980_v53 = vpop.f32.mrb[25].mxu1 }
 0x4c6   :  { %v1981_v1 = vadd.f32 %v2226_v25, %v1980_v53 }
 0x4c7   :  { %vm2000_vm1 = vcmp.ge.f32.partialorder %v1986_v3, 0.0  ;;  %v2004_v38 = vmul.f32 0.2, %v1986_v3 }
 0x4c8   :  { %vm1999_vm0 = vcmp.ge.f32.partialorder %v1981_v1, 0.0  ;;  %v2003_v13 = vmul.f32 0.2, %v1981_v1 }
 0x4c9   :  { %v2008_v2 = vsel %vm2000_vm1, %v1986_v3, %v2004_v38 }
 0x4ca   :  { %v2019_v55 = vmul.f32 %v2231_v0, %v2008_v2  ;;  %v2007_v6 = vsel %vm1999_vm0, %v1981_v1, %v2003_v13 }
 0x4cb   :  { %v2018_v26 = vmul.f32 %v2231_v0, %v2007_v6 }
 0x4cc   :  { %v2026_v12 = vsel %vm2022_vm2, %v2019_v55, 0.0 }
 0x4cd   :  { %2027 = vadd.xlane.f32.xlu1 %v2026_v12  ;;  %v2023_v50 = vsel %vm2022_vm2, %v2018_v26, 0.0 }
 0x4ce   :  { %2024 = vadd.xlane.f32.xlu0 %v2023_v50 }
 0x4d4   :  { %v2540_v20 = vpop.f32.mrb[26].mxu1 }
 0x4d5   :  { %v1996_v27 = vadd.f32 %v2540_v20, %v2226_v25  ;;  %v1990_v9 = vpop.f32.mrb[27].mxu1 }
 0x4d6   :  { %v1991_v4 = vadd.f32 %v2226_v25, %v1990_v9 }
 0x4d7   :  { %vm2002_vm3 = vcmp.ge.f32.partialorder %v1996_v27, 0.0  ;;  %v2006_v56 = vmul.f32 0.2, %v1996_v27 }
 0x4d8   :  { %vm2001_vm4 = vcmp.ge.f32.partialorder %v1991_v4, 0.0  ;;  %v2005_v15 = vmul.f32 0.2, %v1991_v4 }
 0x4d9   :  { %v2010_v63 = vsel %vm2002_vm3, %v1996_v27, %v2006_v56 }
 0x4da   :  { %v2021_v52 = vmul.f32 %v2231_v0, %v2010_v63  ;;  %v2009_v40 = vsel %vm2001_vm4, %v1991_v4, %v2005_v15 }
 0x4db   :  { %v2020_v28 = vmul.f32 %v2231_v0, %v2009_v40 }
 0x4dc   :  { %v2032_v46 = vsel %vm2022_vm2, %v2021_v52, 0.0 }
 0x4dd   :  { %2033 = vadd.xlane.f32.xlu1 %v2032_v46  ;;  %v2029_v37 = vsel %vm2022_vm2, %v2020_v28, 0.0 }
 0x4de   :  { %2030 = vadd.xlane.f32.xlu0 %v2029_v37 }
 0x55a   :  { %v2028_v18 = vpop.xlane.xlu1 %2027 }
 0x55b   :  { %v2043_v22 = vadd.f32 %v2232_v54, %v2028_v18  ;;  %v2025_v45 = vpop.xlane.xlu0 %2024 }
 0x55c   :  { %v2042_v16 = vadd.f32 %v2232_v54, %v2025_v45 }
 0x55d   :  { %2048 = vst.msk [vmem:[%s3667_s11 + $0x8] sm:$0xff] %vm2046_vm5, %v2043_v22 }
 0x55e   :  { %2047 = vst.msk [vmem:[%s3667_s11] sm:$0xff] %vm2046_vm5, %v2042_v16 }
 0x56a   :  { %v2034_v61 = vpop.xlane.xlu1 %2033 }
 0x56b   :  { %v2045_v17 = vadd.f32 %v2232_v54, %v2034_v61  ;;  %v2031_v62 = vpop.xlane.xlu0 %2030 }
 0x56c   :  { %v2044_v39 = vadd.f32 %v2232_v54, %v2031_v62 }
 0x56d   :  { %2050 = vst.msk [vmem:[%s3667_s11 + $0x18] sm:$0xff] %vm2046_vm5, %v2045_v17 }
 0x56e   :  { %2049 = vst.msk [vmem:[%s3667_s11 + $0x10] sm:$0xff] %vm2046_vm5, %v2044_v39 }

// kernel: mod_forward.2
= control target key start
LH: loop header
LB: loop body
LE: loop exit
PB: predicated region body
PF: predicated region fallthrough
CT: control target
= control target key end

     0   :  { %s7887_s0 = inlined_call_operand.vmem [shape: f32[2,16,48], index: 0, kind: input, shape index: {}]   ;;  %s7888_s1 = inlined_call_operand.vmem [shape: f32[3,16,16], index: 1, kind: input, shape index: {}]   ;;  %s7889_s2 = inlined_call_operand.vmem [shape: f32[3,48,128], index: 2, kind: input, shape index: {}]   ;;  %s7890_s3 = inlined_call_operand.vmem [shape: f32[1,128], index: 3, kind: input, shape index: {}]   ;;  %s7891_s4 = inlined_call_operand.vmem [shape: f32[4,8,16], index: 4, kind: input, shape index: {}]   ;;  %s7892_s5 = inlined_call_operand.vmem [shape: f32[4,128,64], index: 5, kind: input, shape index: {}]   ;;  %s7893_s6 = inlined_call_operand.vmem [shape: f32[1,64], index: 6, kind: input, shape index: {}]   ;;  %s7894_s7 = inlined_call_operand.vmem [shape: f32[3,8,8], index: 7, kind: input, shape index: {}]   ;;  %s7895_s8 = inlined_call_operand.vmem [shape: f32[3,64,128], index: 8, kind: input, shape index: {}]   ;;  %s7896_s9 = inlined_call_operand.vmem [shape: f32[1,128], index: 9, kind: input, shape index: {}]   ;;  %s7897_s10 = inlined_call_operand.vmem [shape: f32[4,4,8], index: 10, kind: input, shape index: {}]   ;;  %s7898_s11 = inlined_call_operand.vmem [shape: f32[4,128,64], index: 11, kind: input, shape index: {}]   ;;  %s7899_s12 = inlined_call_operand.vmem [shape: f32[1,64], index: 12, kind: input, shape index: {}]   ;;  %s7900_s13 = inlined_call_operand.vmem [shape: f32[3,4,4], index: 13, kind: input, shape index: {}, may-alias: {13,16,19}]   ;;  %s7901_s14 = inlined_call_operand.vmem [shape: f32[3,64,128], index: 14, kind: input, shape index: {}]   ;;  %s7902_s15 = inlined_call_operand.vmem [shape: f32[1,128], index: 15, kind: input, shape index: {}]   ;;  %s7903_s16 = inlined_call_operand.vmem [shape: f32[3,4,4], index: 16, kind: input, shape index: {}, may-alias: {13,16,19}]   ;;  %s7904_s17 = inlined_call_operand.vmem [shape: f32[3,128,128], index: 17, kind: input, shape index: {}]   ;;  %s7905_s18 = inlined_call_operand.vmem [shape: f32[1,128], index: 18, kind: input, shape index: {}]   ;;  %s7906_s19 = inlined_call_operand.vmem [shape: f32[3,4,4], index: 19, kind: input, shape index: {}, may-alias: {13,16,19}]   ;;  %s7907_s20 = inlined_call_operand.vmem [shape: f32[3,128,128], index: 20, kind: input, shape index: {}]   ;;  %s7908_s21 = inlined_call_operand.vmem [shape: f32[1,128], index: 21, kind: input, shape index: {}]   ;;  %s7909_s22 = inlined_call_operand.vmem [shape: f32[2,4,128], index: 22, kind: output, shape index: {}]  }
   0x1   :  { %7915 = sst [smem:[#allocation2_spill]] %s7887_s0 }
   0x2   :  { %7916 = sst [smem:[#allocation3_spill]] %s7888_s1 }
   0x3   :  { %7917 = sst [smem:[#allocation4_spill]] %s7889_s2 }
   0x4   :  { %7918 = sst [smem:[#allocation5_spill]] %s7890_s3  ;;  %s6602_s3 = smov 0  }
   0x5   :  { %7919 = sst [smem:[#allocation6_spill]] %s7891_s4 }
   0x6   :  { %7920 = sst [smem:[#allocation7_spill]] %s7892_s5 }
   0x7   :  { %7921 = sst [smem:[#allocation8_spill]] %s7893_s6 }
   0x8 LB: > { %s4556_s28 = sadd.s32 4294967295, %s6482_s3   ;;  %p4560_p0 = scmp.ge.s32.totalorder %s6482_s3, 1  ;;  %s6482_s3 = sphi %s6602_s3, %s32_s3  }
   0x9   : > { %p612_p1 = scmp.lt.s32.totalorder %s6482_s3, 3 }
   0xb   : > { %p613_p2 = pnand %p4560_p0, %p612_p1 }
   0xc   : > { %p673_p3 = scmp.lt.s32.totalorder (!%p613_p2), %s4556_s28, 1  ;;  %s7922_s4 = sld [smem:[#allocation3_spill]] (!%p613_p2)  ;;  %vm686_vm0 = vcmask (!%p613_p2), 130048   ;;  %vm865_vm1 = vcmask (!%p613_p2), 392192   ;;  %v6484_v42 = vmov (!%p613_p2), 0.0|0.0   ;;  %vm6485_vm2 = vmmov (!%p613_p2), 0  }
   0xd   : > { %616 = sbr.rel (%p613_p2) target bundleno = 4627 (0x1213), region = 108  ;;  %s7923_s1 = sld [smem:[#allocation4_spill]] (!%p613_p2)  ;;  %v6486_v43 = vmov (!%p613_p2), 0.0   ;;  %vm1877_vm6 = vcmask (!%p613_p2), 64512   ;;  %vm2043_vm7 = vcmask (!%p613_p2), 523264   ;;  %vm3023_vm10 = vcmask (!%p613_p2), 1043456  }
   0xe   : > { %s7924_s0 = sld [smem:[#allocation2_spill]] (!%p613_p2)  ;;  %s7925_s29 = sld [smem:[#allocation7_spill]] (!%p613_p2)  ;;  %vm3019_vm11 = vcmask (!%p613_p2), 31744  }
   0xf   : > { %s7927_s6 = sld [smem:[#allocation6_spill]] (!%p613_p2) }
  0x12   : > { %v684_v0 = vld [vmem:[%s7922_s4] sm:$0xff] (!%p613_p2)  ;;  %v685_v10 = vld [vmem:[%s7922_s4 + $0x8] sm:$0xff] (!%p613_p2)  ;;  %v4566_v11 = vld [vmem:[%s7922_s4 + $0x10] sm:$0xff] (!%p613_p2) }
  0x13   : > { %5219 = vmatprep.mubr.msk.f32.mxu1 (!%p613_p2), %vm686_vm0, %v684_v0  ;;  %v4570_v1 = vld [vmem:[%s7923_s1 + $0x30] sm:$0xff] (!%p613_p2)  ;;  %v4571_v2 = vld [vmem:[%s7923_s1 + $0x38] sm:$0xff] (!%p613_p2)  ;;  %v4572_v3 = vld [vmem:[%s7923_s1 + $0x40] sm:$0xff] (!%p613_p2) }
  0x14   : > { %s7930_s28 = smov (!%p673_p3, %s4556_s28), 1  ;;  %v6001_v4 = vpack.c.bf16 %v4571_v2, %v4570_v1  ;;  %v4573_v5 = vld [vmem:[%s7923_s1 + $0x48] sm:$0xff]  ;;  %v4567_v12 = vld [vmem:[%s7922_s4 + $0x18] sm:$0xff]  ;;  %v4580_v13 = vld [vmem:[%s7922_s4 + $0x20] sm:$0xff] }
  0x15   : > { %s4842_s27 = sshll.u32 %s7930_s28, 4  ;;  %v6005_v6 = vpack.c.bf16 %v4573_v5, %v4572_v3  ;;  %v4581_v14 = vld [vmem:[%s7922_s4 + $0x28] sm:$0xff]  ;;  %v4574_v15 = vld [vmem:[%s7923_s1 + $0x50] sm:$0xff]  ;;  %v4575_v16 = vld [vmem:[%s7923_s1 + $0x58] sm:$0xff]  ;;  %s4563_s25 = sshll.u32 %s7930_s28, 2 }
  0x16   : > { %s677_s23 = scalar_lea.vmem %s7924_s0, %s4842_s27  ;;  %6002 = vmatprep.subr.bf16.mxu0 %v6001_v4  ;;  %v6009_v17 = vpack.c.bf16 %v4575_v16, %v4574_v15  ;;  %v768_v18 = vld [vmem:[%s7923_s1] sm:$0xff]  ;;  %v769_v19 = vld [vmem:[%s7923_s1 + $0x8] sm:$0xff]  ;;  %v770_v23 = vld [vmem:[%s7923_s1 + $0x10] sm:$0xff]  ;;  %s681_s27 = scalar_lea.vmem %s7909_s22, %s4563_s25 }
  0x17   : > { %v682_v7 = vld [vmem:[%s677_s23] sm:$0xff]  ;;  %v683_v8 = vld [vmem:[%s677_s23 + $0x8] sm:$0xff]  ;;  %6004 = vmatpush3.bf16.msra.mxu0 %v6001_v4  ;;  %v6013_v20 = vpack.c.bf16 %v769_v19, %v768_v18  ;;  %v771_v24 = vld [vmem:[%s7923_s1 + $0x18] sm:$0xff]  ;;  %s7926_s23 = sld [smem:[#allocation5_spill]] }
  0x18   : > { %v5993_v9 = vpack.c.bf16 %v683_v8, %v682_v7  ;;  %6006 = vmatprep.subr.bf16.mxu0 %v6005_v6  ;;  %v6017_v27 = vpack.c.bf16 %v771_v24, %v770_v23  ;;  %v772_v28 = vld [vmem:[%s7923_s1 + $0x20] sm:$0xff]  ;;  %v773_v29 = vld [vmem:[%s7923_s1 + $0x28] sm:$0xff]  ;;  %v4586_v36 = vld [vmem:[%s7923_s1 + $0x70] sm:$0xff] }
  0x19   : > { %v6021_v31 = vpack.c.bf16 %v773_v29, %v772_v28  ;;  %v4584_v33 = vld [vmem:[%s7923_s1 + $0x60] sm:$0xff]  ;;  %v4585_v34 = vld [vmem:[%s7923_s1 + $0x68] sm:$0xff]  ;;  %v4587_v37 = vld [vmem:[%s7923_s1 + $0x78] sm:$0xff] }
  0x1a   : > { %5994 = vmatprep.subr.bf16.mxu1 %v5993_v9  ;;  %v6029_v35 = vpack.c.bf16 %v4585_v34, %v4584_v33  ;;  %v6033_v38 = vpack.c.bf16 %v4587_v37, %v4586_v36  ;;  %v4588_v39 = vld [vmem:[%s7923_s1 + $0x80] sm:$0xff]  ;;  %v4589_v40 = vld [vmem:[%s7923_s1 + $0x88] sm:$0xff]  ;;  %v1293_v47 = vld [vmem:[%s7925_s29 + $0x10] sm:$0xff]  ;;  %s7928_s1 = sld [smem:[#allocation8_spill]] }
  0x1b   : > { %5996 = vmatpush3.bf16.msra.mxu1 %v5993_v9  ;;  %6008 = vmatpush3.bf16.msra.mxu0 %v6005_v6  ;;  %v6037_v41 = vpack.c.bf16 %v4589_v40, %v4588_v39  ;;  %v1291_v44 = vld [vmem:[%s7925_s29] sm:$0xff]  ;;  %v1292_v45 = vld [vmem:[%s7925_s29 + $0x8] sm:$0xff]  ;;  %v1294_v48 = vld [vmem:[%s7925_s29 + $0x18] sm:$0xff] }
  0x1c   : > { %5998 = vmatprep.subr.bf16.mxu1 %v5993_v9  ;;  %6010 = vmatprep.subr.bf16.mxu0 %v6009_v17  ;;  %v6072_v46 = vpack.c.bf16 %v1292_v45, %v1291_v44  ;;  %v6075_v49 = vpack.c.bf16 %v1294_v48, %v1293_v47  ;;  %v1295_v50 = vld [vmem:[%s7925_s29 + $0x20] sm:$0xff]  ;;  %v1296_v51 = vld [vmem:[%s7925_s29 + $0x28] sm:$0xff]  ;;  %v1297_v53 = vld [vmem:[%s7925_s29 + $0x30] sm:$0xff] }
  0x1d   : > { %v6078_v52 = vpack.c.bf16 %v1296_v51, %v1295_v50  ;;  %v1298_v54 = vld [vmem:[%s7925_s29 + $0x38] sm:$0xff]  ;;  %v1299_v56 = vld [vmem:[%s7925_s29 + $0x40] sm:$0xff]  ;;  %v1300_v57 = vld [vmem:[%s7925_s29 + $0x48] sm:$0xff] }
  0x1e   : > { %5220 = vmatmul.mubr.msk.f32.vlgmr.msra.gmra.mrb[0].mxu1 %vm686_vm0, %v685_v10  ;;  %v6081_v55 = vpack.c.bf16 %v1298_v54, %v1297_v53  ;;  %v6084_v58 = vpack.c.bf16 %v1300_v57, %v1299_v56  ;;  %v1301_v59 = vld [vmem:[%s7925_s29 + $0x50] sm:$0xff]  ;;  %v1302_v60 = vld [vmem:[%s7925_s29 + $0x58] sm:$0xff]  ;;  %v1303_v62 = vld [vmem:[%s7925_s29 + $0x60] sm:$0xff] }
  0x1f   : > { %6000 = vmatpush3.bf16.msra.mxu1 %v5993_v9  ;;  %5226 = vmatprep.mubr.msk.f32.mxu1 %vm686_vm0, %v4566_v11  ;;  %v6087_v61 = vpack.c.bf16 %v1302_v60, %v1301_v59  ;;  %v1304_v63 = vld [vmem:[%s7925_s29 + $0x68] sm:$0xff]  ;;  %v1305_v1 = vld [vmem:[%s7925_s29 + $0x70] sm:$0xff]  ;;  %v1306_v2 = vld [vmem:[%s7925_s29 + $0x78] sm:$0xff] }
  0x20   : > { %6026 = vmatprep.subr.bf16.mxu1 %v5993_v9  ;;  %6012 = vmatpush3.bf16.msra.mxu0 %v6009_v17  ;;  %v6090_v0 = vpack.c.bf16 %v1304_v63, %v1303_v62  ;;  %v6093_v3 = vpack.c.bf16 %v1306_v2, %v1305_v1  ;;  %v4592_v4 = vld [vmem:[%s7926_s23] ss:$0 sm:$0xff]  ;;  %v4597_v16 = vld [vmem:[%s7925_s29 + $0x88] sm:$0xff]  ;;  %v4598_v19 = vld [vmem:[%s7925_s29 + $0x90] sm:$0xff] }
  0x21   : > { %6014 = vmatprep.subr.bf16.mxu0 %v6013_v20  ;;  %v4596_v15 = vld [vmem:[%s7925_s29 + $0x80] sm:$0xff]  ;;  %v4594_v17 = vld [vmem:[%s7927_s6 + $0x8] sm:$0xff]  ;;  %v4610_v37 = vld [vmem:[%s7925_s29 + $0xf0] sm:$0xff] }
  0x22   : > { %5227 = vmatmul.mubr.msk.f32.vlgmr.msra.gmra.mrb[2].mxu1 %vm686_vm0, %v4567_v12  ;;  %v6048_v18 = vpack.c.bf16 %v4597_v16, %v4596_v15  ;;  %v4601_v23 = vld [vmem:[%s7925_s29 + $0xa8] sm:$0xff]  ;;  %v4604_v28 = vld [vmem:[%s7925_s29 + $0xc0] sm:$0xff]  ;;  %v4612_v48 = vld [vmem:[%s7927_s6 + $0x10] sm:$0xff] }
  0x23   : > { %6028 = vmatpush3.bf16.msra.mxu1 %v5993_v9  ;;  %5263 = vmatprep.mubr.msk.f32.mxu1 %vm686_vm0, %v4580_v13  ;;  %v4605_v29 = vld [vmem:[%s7925_s29 + $0xc8] sm:$0xff]  ;;  %v4608_v34 = vld [vmem:[%s7925_s29 + $0xe0] sm:$0xff]  ;;  %v4616_v50 = vld [vmem:[%s7925_s29 + $0x110] sm:$0xff] }
  0x24   : > { %6041 = vmatprep.subr.bf16.mxu1 %v6484_v42  ;;  %v4614_v44 = vld [vmem:[%s7925_s29 + $0x100] sm:$0xff]  ;;  %v4615_v45 = vld [vmem:[%s7925_s29 + $0x108] sm:$0xff]  ;;  %v4617_v51 = vld [vmem:[%s7925_s29 + $0x118] sm:$0xff] }
  0x25   : > { %v4618_v53 = vld [vmem:[%s7925_s29 + $0x120] sm:$0xff]  ;;  %v4619_v54 = vld [vmem:[%s7925_s29 + $0x128] sm:$0xff]  ;;  %v4620_v56 = vld [vmem:[%s7925_s29 + $0x130] sm:$0xff] }
  0x26   : > { %5264 = vmatmul.mubr.msk.f32.vlgmr.msra.gmra.mrb[4].mxu1 %vm686_vm0, %v4581_v14  ;;  %v1217_v14 = vld [vmem:[%s7927_s6] sm:$0xff]  ;;  %v4621_v57 = vld [vmem:[%s7925_s29 + $0x138] sm:$0xff]  ;;  %v4623_v60 = vld [vmem:[%s7925_s29 + $0x148] sm:$0xff] }
  0x27   : > { %5285 = vmatprep.mubr.msk.f32.mxu1 %vm6485_vm2, %v6486_v43  ;;  %v4622_v59 = vld [vmem:[%s7925_s29 + $0x140] sm:$0xff]  ;;  %v4624_v62 = vld [vmem:[%s7925_s29 + $0x150] sm:$0xff]  ;;  %v4625_v63 = vld [vmem:[%s7925_s29 + $0x158] sm:$0xff] }
  0x28   : > { %v4626_v1 = vld [vmem:[%s7925_s29 + $0x160] sm:$0xff]  ;;  %v4627_v2 = vld [vmem:[%s7925_s29 + $0x168] sm:$0xff] }
  0x29   : > { %v4637_v15 = vld [vmem:[%s7925_s29 + $0x1a8] sm:$0xff] }
  0xf1   : > { %v5221_v21 = vpop.f32.mrb[0].mxu1 }
  0xf2   : > { %v759_v22 = vpop.f32.mrb[1].mxu1 }
  0xf5   : > { %v5228_v25 = vpop.f32.mrb[2].mxu1 }
  0xf6   : > { %v849_v26 = vpop.f32.mrb[3].mxu1 }
  0xf7   : > { %5241 = vmatprep.mubr.msk.f32.mxu0 %vm865_vm1, %v849_v26  ;;  %v4603_v26 = vld [vmem:[%s7925_s29 + $0xb8] sm:$0xff] }
  0xf8   : > { %5242 = vmatmul.mubr.msk.f32.vlgmr.msra.gmra.mrb[0].mxu0 %vm865_vm1, %v5228_v25  ;;  %v4602_v25 = vld [vmem:[%s7925_s29 + $0xb0] sm:$0xff] }
  0xf9   : > { %6016 = vmatpush3.bf16.msra.mxu0 %v6013_v20  ;;  %5256 = vmatprep.mubr.msk.f32.mxu0 %vm865_vm1, %v759_v22  ;;  %v5265_v30 = vpop.f32.mrb[4].mxu1  ;;  %v4599_v20 = vld [vmem:[%s7925_s29 + $0x98] sm:$0xff]  ;;  %v4600_v22 = vld [vmem:[%s7925_s29 + $0xa0] sm:$0xff] }
  0xfa   : > { %6018 = vmatprep.subr.bf16.mxu0 %v6017_v27  ;;  %v1103_v32 = vpop.f32.mrb[5].mxu1  ;;  %v6054_v24 = vpack.c.bf16 %v4601_v23, %v4600_v22  ;;  %v4642_v23 = vld [vmem:[%s7925_s29 + $0x1d0] sm:$0xff] }
  0xfd   : > { %6020 = vmatpush3.bf16.msra.mxu0 %v6017_v27  ;;  %v6057_v27 = vpack.c.bf16 %v4603_v26, %v4602_v25  ;;  %v4644_v26 = vld [vmem:[%s7925_s29 + $0x1e0] sm:$0xff] }
  0xfe   : > { %6022 = vmatprep.subr.bf16.mxu0 %v6021_v31 }
 0x101   : > { %6024 = vmatpush3.bf16.msra.mxu0 %v6021_v31  ;;  %v4606_v31 = vld [vmem:[%s7925_s29 + $0xd0] sm:$0xff] }
 0x102   : > { %6030 = vmatprep.subr.bf16.mxu0 %v6029_v35 }
 0x104   : > { %5257 = vmatmul.mubr.msk.f32.vlgmr.msra.gmra.mrb[0].mxu0 %vm865_vm1, %v5221_v21  ;;  %v6051_v21 = vpack.c.bf16 %v4599_v20, %v4598_v19  ;;  %v4640_v20 = vld [vmem:[%s7925_s29 + $0x1c0] sm:$0xff] }
 0x105   : > { %6032 = vmatpush3.bf16.msra.mxu0 %v6029_v35  ;;  %5278 = vmatprep.mubr.msk.f32.mxu0 %vm865_vm1, %v1103_v32  ;;  %v4607_v32 = vld [vmem:[%s7925_s29 + $0xd8] sm:$0xff]  ;;  %v4609_v35 = vld [vmem:[%s7925_s29 + $0xe8] sm:$0xff] }
 0x106   : > { %6034 = vmatprep.subr.bf16.mxu0 %v6033_v38  ;;  %v6063_v33 = vpack.c.bf16 %v4607_v32, %v4606_v31  ;;  %v6066_v36 = vpack.c.bf16 %v4609_v35, %v4608_v34 }
 0x109   : > { %6036 = vmatpush3.bf16.msra.mxu0 %v6033_v38  ;;  %v4611_v38 = vld [vmem:[%s7925_s29 + $0xf8] sm:$0xff] }
 0x10a   : > { %6038 = vmatprep.subr.bf16.mxu0 %v6037_v41  ;;  %v6069_v39 = vpack.c.bf16 %v4611_v38, %v4610_v37  ;;  %v4646_v37 = vld [vmem:[%s7925_s29 + $0x1f0] sm:$0xff] }
 0x10d   : > { %6040 = vmatpush3.bf16.msra.mxu0 %v6037_v41 }
 0x10e   : > { %6071 = vmatprep.subr.bf16.mxu0 %v6484_v42 }
 0x110   : > { %5279 = vmatmul.mubr.msk.f32.vlgmr.msra.gmra.mrb[0].mxu0 %vm865_vm1, %v5265_v30  ;;  %v6060_v30 = vpack.c.bf16 %v4605_v29, %v4604_v28 }
 0x111   : > { %5362 = vmatprep.mubr.msk.f32.mxu0 %vm6485_vm2, %v6486_v43  ;;  %6073 = vmatpush3.bf16.msra.mxu0 %v6072_v46 }
 0x112   : > { %6074 = vmatprep.subr.bf16.mxu0 %v6484_v42 }
 0x115   : > { %6076 = vmatpush3.bf16.msra.mxu0 %v6075_v49  ;;  %v6099_v49 = vpack.c.bf16 %v4615_v45, %v4614_v44 }
 0x116   : > { %6077 = vmatprep.subr.bf16.mxu0 %v6484_v42 }
 0x119   : > { %6079 = vmatpush3.bf16.msra.mxu0 %v6078_v52  ;;  %v6102_v52 = vpack.c.bf16 %v4617_v51, %v4616_v50  ;;  %v1954_v50 = vld [vmem:[%s7895_s8 + $0x18] sm:$0xff] }
 0x11a   : > { %6080 = vmatprep.subr.bf16.mxu0 %v6484_v42 }
 0x11d   : > { %6082 = vmatpush3.bf16.msra.mxu0 %v6081_v55  ;;  %v6105_v55 = vpack.c.bf16 %v4619_v54, %v4618_v53  ;;  %v1956_v53 = vld [vmem:[%s7895_s8 + $0x28] sm:$0xff] }
 0x11e   : > { %6083 = vmatprep.subr.bf16.mxu0 %v6484_v42 }
 0x121   : > { %6085 = vmatpush3.bf16.msra.mxu0 %v6084_v58  ;;  %v6108_v58 = vpack.c.bf16 %v4621_v57, %v4620_v56  ;;  %v1958_v56 = vld [vmem:[%s7895_s8 + $0x38] sm:$0xff] }
 0x122   : > { %6086 = vmatprep.subr.bf16.mxu0 %v6484_v42 }
 0x125   : > { %6088 = vmatpush3.bf16.msra.mxu0 %v6087_v61  ;;  %v6111_v61 = vpack.c.bf16 %v4623_v60, %v4622_v59  ;;  %v4648_v59 = vld [vmem:[%s7928_s1] ss:$0 sm:$0xff] }
 0x126   : > { %6089 = vmatprep.subr.bf16.mxu0 %v6484_v42 }
 0x129   : > { %6091 = vmatpush3.bf16.msra.mxu0 %v6090_v0  ;;  %v6114_v0 = vpack.c.bf16 %v4625_v63, %v4624_v62 }
 0x12a   : > { %6092 = vmatprep.subr.bf16.mxu0 %v6484_v42 }
 0x12d   : > { %6094 = vmatpush3.bf16.msra.mxu0 %v6093_v3  ;;  %v6117_v3 = vpack.c.bf16 %v4627_v2, %v4626_v1  ;;  %v4652_v2 = vld [vmem:[%s7895_s8 + $0x40] sm:$0xff] }
 0x12e   : > { %6125 = vmatprep.subr.bf16.mxu0 %v6484_v42 }
 0x1e3   : > { %v5280_v5 = vpop.f32.mrb[0].mxu0 }
 0x1e4   : > { %v1210_v6 = vadd.f32 %v5280_v5, %v4592_v4  ;;  %v1191_v7 = vpop.f32.mrb[1].mxu0  ;;  %v4629_v5 = vld [vmem:[%s7925_s29 + $0x178] sm:$0xff] }
 0x1e5   : > { %v1209_v8 = vadd.f32 %v4592_v4, %v1191_v7  ;;  %v4628_v4 = vld [vmem:[%s7925_s29 + $0x170] sm:$0xff]  ;;  %v4632_v7 = vld [vmem:[%s7925_s29 + $0x180] sm:$0xff] }
 0x1e6   : > { %vm1212_vm3 = vcmp.ge.f32.partialorder %v1210_v6, 0.0  ;;  %v1214_v9 = vmul.f32 0.2, %v1210_v6 }
 0x1e7   : > { %vm1211_vm4 = vcmp.ge.f32.partialorder %v1209_v8, 0.0  ;;  %v1213_v10 = vmul.f32 0.2, %v1209_v8 }
 0x1e8   : > { %v1216_v11 = vsel %vm1212_vm3, %v1210_v6, %v1214_v9  ;;  %v6120_v6 = vpack.c.bf16 %v4629_v5, %v4628_v4  ;;  %v4634_v9 = vld [vmem:[%s7925_s29 + $0x190] sm:$0xff]  ;;  %v4650_v4 = vld [vmem:[%s7894_s7 + $0x8] sm:$0xff] }
 0x1e9   : > { %v1215_v12 = vsel %vm1211_vm4, %v1209_v8, %v1213_v10  ;;  %v4633_v8 = vld [vmem:[%s7925_s29 + $0x188] sm:$0xff] }
 0x1ea   : > { %v6765_v13 = vpack.c.bf16 %v1216_v11, %v1215_v12  ;;  %v6126_v10 = vpack.c.bf16 %v4633_v8, %v4632_v7  ;;  %v4635_v11 = vld [vmem:[%s7925_s29 + $0x198] sm:$0xff] }
 0x1eb   : > { %v6129_v12 = vpack.c.bf16 %v4635_v11, %v4634_v9  ;;  %v4655_v7 = vld [vmem:[%s7895_s8 + $0x58] sm:$0xff]  ;;  %v4656_v9 = vld [vmem:[%s7895_s8 + $0x60] sm:$0xff] }
 0x1ec   : > { %6043 = vmatpush3.bf16.msra.mxu1 %v6765_v13 }
 0x1ed   : > { %6044 = vmatprep.subr.bf16.mxu1 %v6484_v42 }
 0x1ef   : > { %5286 = vmatmul.mubr.msk.f32.vlgmr.msra.gmra.mrb[6].mxu1 %vm686_vm0, %v1217_v14  ;;  %v4636_v14 = vld [vmem:[%s7925_s29 + $0x1a0] sm:$0xff] }
 0x1f0   : > { %6046 = vmatpush3.bf16.msra.mxu1 %v6765_v13  ;;  %5292 = vmatprep.mubr.msk.f32.mxu1 %vm6485_vm2, %v6486_v43  ;;  %v6132_v16 = vpack.c.bf16 %v4637_v15, %v4636_v14  ;;  %v4659_v14 = vld [vmem:[%s7895_s8 + $0x78] sm:$0xff] }
 0x1f1   : > { %6047 = vmatprep.subr.bf16.mxu1 %v6484_v42 }
 0x1f3   : > { %5293 = vmatmul.mubr.msk.f32.vlgmr.msra.gmra.mrb[8].mxu1 %vm686_vm0, %v4594_v17  ;;  %v4638_v17 = vld [vmem:[%s7925_s29 + $0x1b0] sm:$0xff] }
 0x1f4   : > { %6049 = vmatpush3.bf16.msra.mxu1 %v6048_v18  ;;  %5327 = vmatprep.mubr.msk.f32.mxu1 %vm6485_vm2, %v6486_v43  ;;  %v4639_v18 = vld [vmem:[%s7925_s29 + $0x1b8] sm:$0xff] }
 0x1f5   : > { %6050 = vmatprep.subr.bf16.mxu1 %v6484_v42  ;;  %v6135_v19 = vpack.c.bf16 %v4639_v18, %v4638_v17  ;;  %v4664_v18 = vld [vmem:[%s7895_s8 + $0x80] sm:$0xff] }
 0x1f8   : > { %6052 = vmatpush3.bf16.msra.mxu1 %v6051_v21  ;;  %v4641_v21 = vld [vmem:[%s7925_s29 + $0x1c8] sm:$0xff] }
 0x1f9   : > { %6053 = vmatprep.subr.bf16.mxu1 %v6484_v42  ;;  %v6138_v22 = vpack.c.bf16 %v4641_v21, %v4640_v20 }
 0x1fc   : > { %6055 = vmatpush3.bf16.msra.mxu1 %v6054_v24  ;;  %v4643_v24 = vld [vmem:[%s7925_s29 + $0x1d8] sm:$0xff] }
 0x1fd   : > { %6056 = vmatprep.subr.bf16.mxu1 %v6484_v42  ;;  %v6141_v25 = vpack.c.bf16 %v4643_v24, %v4642_v23  ;;  %v4666_v24 = vld [vmem:[%s7895_s8 + $0x90] sm:$0xff] }
 0x200   : > { %6058 = vmatpush3.bf16.msra.mxu1 %v6057_v27  ;;  %v4645_v27 = vld [vmem:[%s7925_s29 + $0x1e8] sm:$0xff] }
 0x201   : > { %6059 = vmatprep.subr.bf16.mxu1 %v6484_v42  ;;  %v6144_v28 = vpack.c.bf16 %v4645_v27, %v4644_v26  ;;  %v4668_v27 = vld [vmem:[%s7895_s8 + $0xa0] sm:$0xff] }
 0x204   : > { %6061 = vmatpush3.bf16.msra.mxu1 %v6060_v30 }
 0x205   : > { %6062 = vmatprep.subr.bf16.mxu1 %v6484_v42 }
 0x208   : > { %6064 = vmatpush3.bf16.msra.mxu1 %v6063_v33 }
 0x209   : > { %6065 = vmatprep.subr.bf16.mxu1 %v6484_v42 }
 0x20c   : > { %6067 = vmatpush3.bf16.msra.mxu1 %v6066_v36  ;;  %v4630_v36 = vld [vmem:[%s7927_s6 + $0x18] sm:$0xff] }
 0x20d   : > { %6068 = vmatprep.subr.bf16.mxu1 %v6484_v42 }
 0x210   : > { %6070 = vmatpush3.bf16.msra.mxu1 %v6069_v39 }
 0x211   : > { %6095 = vmatprep.subr.bf16.mxu1 %v6484_v42 }
 0x2c2   : > { %v1287_v40 = vpop.f32.mrb[6].mxu1 }
 0x2c3   : > { %v5287_v41 = vpop.f32.mrb[7].mxu1  ;;  %5363 = vmatmul.mubr.f32.vlgmr.msra.gmra.mrb[2].mxu0 %v1287_v40 }
 0x2c4   : > { %5446 = vmatprep.mubr.msk.f32.mxu0 %vm6485_vm2, %v6486_v43  ;;  %6127 = vmatpush3.bf16.msra.mxu0 %v6126_v10  ;;  %v4657_v10 = vld [vmem:[%s7895_s8 + $0x68] sm:$0xff] }
 0x2c5   : > { %6128 = vmatprep.subr.bf16.mxu0 %v6484_v42  ;;  %v6156_v11 = vpack.c.bf16 %v4657_v10, %v4656_v9  ;;  %v2435_v10 = vld [vmem:[%s7898_s11 + $0x10] sm:$0xff] }
 0x2c6   : > { %v1378_v46 = vpop.f32.mrb[8].mxu1 }
 0x2c7   : > { %v5294_v47 = vpop.f32.mrb[9].mxu1  ;;  %5328 = vmatmul.mubr.f32.vlgmr.msra.gmra.mrb[10].mxu1 %v1378_v46  ;;  %v1951_v46 = vld [vmem:[%s7895_s8] sm:$0xff] }
 0x2c8   : > { %6097 = vmatpush3.bf16.msra.mxu1 %v6765_v13  ;;  %5369 = vmatprep.mubr.msk.f32.mxu1 %vm6485_vm2, %v6486_v43  ;;  %v1952_v47 = vld [vmem:[%s7895_s8 + $0x8] sm:$0xff] }
 0x2c9   : > { %6098 = vmatprep.subr.bf16.mxu1 %v6484_v42  ;;  %6130 = vmatpush3.bf16.msra.mxu0 %v6129_v12  ;;  %v4658_v12 = vld [vmem:[%s7895_s8 + $0x70] sm:$0xff] }
 0x2ca   : > { %6131 = vmatprep.subr.bf16.mxu0 %v6484_v42  ;;  %v6159_v15 = vpack.c.bf16 %v4659_v14, %v4658_v12  ;;  %v2437_v14 = vld [vmem:[%s7898_s11 + $0x20] sm:$0xff] }
 0x2cb   : > { %5370 = vmatmul.mubr.msk.f32.vlgmr.msra.gmra.mrb[12].mxu1 %vm686_vm0, %v4612_v48  ;;  %v6162_v48 = vpack.c.bf16 %v1952_v47, %v1951_v46  ;;  %v4681_v47 = vld [vmem:[%s7898_s11 + $0xa0] sm:$0xff] }
 0x2cc   : > { %6100 = vmatpush3.bf16.msra.mxu1 %v6099_v49  ;;  %5404 = vmatprep.mubr.msk.f32.mxu1 %vm6485_vm2, %v6486_v43  ;;  %v1953_v49 = vld [vmem:[%s7895_s8 + $0x10] sm:$0xff] }
 0x2cd   : > { %6101 = vmatprep.subr.bf16.mxu1 %v6484_v42  ;;  %6133 = vmatpush3.bf16.msra.mxu0 %v6132_v16  ;;  %v6165_v51 = vpack.c.bf16 %v1954_v50, %v1953_v49  ;;  %v4683_v50 = vld [vmem:[%s7898_s11 + $0xb0] sm:$0xff] }
 0x2ce   : > { %6134 = vmatprep.subr.bf16.mxu0 %v6484_v42 }
 0x2d0   : > { %6103 = vmatpush3.bf16.msra.mxu1 %v6102_v52  ;;  %v1955_v52 = vld [vmem:[%s7895_s8 + $0x20] sm:$0xff] }
 0x2d1   : > { %6104 = vmatprep.subr.bf16.mxu1 %v6484_v42  ;;  %6136 = vmatpush3.bf16.msra.mxu0 %v6135_v19  ;;  %v6168_v54 = vpack.c.bf16 %v1956_v53, %v1955_v52  ;;  %v4665_v19 = vld [vmem:[%s7895_s8 + $0x88] sm:$0xff]  ;;  %v4685_v53 = vld [vmem:[%s7898_s11 + $0xc0] sm:$0xff] }
 0x2d2   : > { %6137 = vmatprep.subr.bf16.mxu0 %v6484_v42  ;;  %v6174_v23 = vpack.c.bf16 %v4665_v19, %v4664_v18  ;;  %v2440_v18 = vld [vmem:[%s7898_s11 + $0x38] sm:$0xff] }
 0x2d4   : > { %6106 = vmatpush3.bf16.msra.mxu1 %v6105_v55  ;;  %v1957_v55 = vld [vmem:[%s7895_s8 + $0x30] sm:$0xff] }
 0x2d5   : > { %6107 = vmatprep.subr.bf16.mxu1 %v6484_v42  ;;  %6139 = vmatpush3.bf16.msra.mxu0 %v6138_v22  ;;  %v6171_v57 = vpack.c.bf16 %v1958_v56, %v1957_v55  ;;  %v4662_v22 = vld [vmem:[%s7894_s7 + $0x10] sm:$0xff] }
 0x2d6   : > { %6140 = vmatprep.subr.bf16.mxu0 %v6484_v42  ;;  %v4687_v56 = vld [vmem:[%s7898_s11 + $0xd0] sm:$0xff] }
 0x2d8   : > { %6109 = vmatpush3.bf16.msra.mxu1 %v6108_v58 }
 0x2d9   : > { %6110 = vmatprep.subr.bf16.mxu1 %v6484_v42  ;;  %6142 = vmatpush3.bf16.msra.mxu0 %v6141_v25  ;;  %v4667_v25 = vld [vmem:[%s7895_s8 + $0x98] sm:$0xff] }
 0x2da   : > { %6143 = vmatprep.subr.bf16.mxu0 %v6484_v42  ;;  %v6177_v26 = vpack.c.bf16 %v4667_v25, %v4666_v24  ;;  %v2444_v24 = vld [vmem:[%s7898_s11 + $0x58] sm:$0xff] }
 0x2dc   : > { %6112 = vmatpush3.bf16.msra.mxu1 %v6111_v61 }
 0x2dd   : > { %6113 = vmatprep.subr.bf16.mxu1 %v6484_v42  ;;  %6145 = vmatpush3.bf16.msra.mxu0 %v6144_v28  ;;  %v4669_v28 = vld [vmem:[%s7895_s8 + $0xa8] sm:$0xff] }
 0x2de   : > { %6146 = vmatprep.subr.bf16.mxu0 %v6484_v42 }
 0x2e0   : > { %6115 = vmatpush3.bf16.msra.mxu1 %v6114_v0  ;;  %v1876_v0 = vld [vmem:[%s7894_s7] sm:$0xff] }
 0x2e1   : > { %6116 = vmatprep.subr.bf16.mxu1 %v6484_v42 }
 0x2e4   : > { %6118 = vmatpush3.bf16.msra.mxu1 %v6117_v3  ;;  %v4653_v3 = vld [vmem:[%s7895_s8 + $0x48] sm:$0xff] }
 0x2e5   : > { %6119 = vmatprep.subr.bf16.mxu1 %v6484_v42  ;;  %v6150_v5 = vpack.c.bf16 %v4653_v3, %v4652_v2 }
 0x2e8   : > { %6121 = vmatpush3.bf16.msra.mxu1 %v6120_v6  ;;  %v4654_v6 = vld [vmem:[%s7895_s8 + $0x50] sm:$0xff] }
 0x2e9   : > { %6122 = vmatprep.subr.bf16.mxu1 %v6484_v42  ;;  %v6153_v8 = vpack.c.bf16 %v4655_v7, %v4654_v6  ;;  %v2433_v6 = vld [vmem:[%s7898_s11] sm:$0xff]  ;;  %v2434_v7 = vld [vmem:[%s7898_s11 + $0x8] sm:$0xff] }
 0x2ea   : > { %v6210_v9 = vpack.c.bf16 %v2434_v7, %v2433_v6 }
 0x396   : > { %v1535_v29 = vpop.f32.mrb[2].mxu0 }
 0x397   : > { %v5364_v30 = vpop.f32.mrb[3].mxu0 }
 0x398   : > { %v4670_v30 = vld [vmem:[%s7895_s8 + $0xb0] sm:$0xff] }
 0x39a   : > { %v1465_v31 = vpop.f32.mrb[10].mxu1 }
 0x39b   : > { %v1536_v32 = vadd.f32 %v1535_v29, %v1465_v31  ;;  %v5329_v33 = vpop.f32.mrb[11].mxu1  ;;  %v6180_v29 = vpack.c.bf16 %v4669_v28, %v4668_v27  ;;  %v4671_v31 = vld [vmem:[%s7895_s8 + $0xb8] sm:$0xff]  ;;  %v2446_v27 = vld [vmem:[%s7898_s11 + $0x68] sm:$0xff] }
 0x39e   : > { %v1610_v34 = vpop.f32.mrb[12].mxu1 }
 0x39f   : > { %v5371_v35 = vpop.f32.mrb[13].mxu1  ;;  %5405 = vmatmul.mubr.f32.vlgmr.msra.gmra.mrb[14].mxu1 %v1610_v34 }
 0x3a0   : > { %6124 = vmatpush3.bf16.msra.mxu1 %v6765_v13  ;;  %5411 = vmatprep.mubr.msk.f32.mxu1 %vm6485_vm2, %v6486_v43  ;;  %v4647_v13 = vld [vmem:[%s7925_s29 + $0x1f8] sm:$0xff] }
 0x3a1   : > { %5449 = vmatprep.subr.mxu1 %v6486_v43  ;;  %v6147_v38 = vpack.c.bf16 %v4647_v13, %v4646_v37 }
 0x3a3   : > { %5412 = vmatmul.mubr.msk.f32.vlgmr.msra.gmra.mrb[16].mxu1 %vm686_vm0, %v4630_v36  ;;  %6148 = vmatpush3.bf16.msra.mxu0 %v6147_v38 }
 0x3a4   : > { %5451 = vmatprep.mubr.msk.f32.mxu1 %vm6485_vm2, %v6486_v43  ;;  %6161 = vmatprep.subr.bf16.mxu0 %v6484_v42 }
 0x472   : > { %v1697_v39 = vpop.f32.mrb[14].mxu1 }
 0x473   : > { %v1701_v40 = vadd.f32 %v1697_v39, %v1536_v32  ;;  %v5406_v41 = vpop.f32.mrb[15].mxu1  ;;  %v6183_v32 = vpack.c.bf16 %v4671_v31, %v4670_v30  ;;  %v4677_v39 = vld [vmem:[%s7898_s11 + $0x80] sm:$0xff]  ;;  %v2448_v30 = vld [vmem:[%s7898_s11 + $0x78] sm:$0xff] }
 0x476   : > { %v1773_v44 = vpop.f32.mrb[16].mxu1 }
 0x477   : > { %v5413_v45 = vpop.f32.mrb[17].mxu1  ;;  %5447 = vmatmul.mubr.f32.vlgmr.msra.gmra.mrb[4].mxu0 %v1773_v44  ;;  %v4679_v44 = vld [vmem:[%s7898_s11 + $0x90] sm:$0xff] }
 0x478   : > { %5494 = vmatprep.mubr.msk.f32.mxu0 %vm6485_vm2, %v6486_v43  ;;  %6163 = vmatpush3.bf16.msra.mxu0 %v6162_v48  ;;  %v4680_v45 = vld [vmem:[%s7898_s11 + $0x98] sm:$0xff]  ;;  %v4682_v48 = vld [vmem:[%s7898_s11 + $0xa8] sm:$0xff] }
 0x479   : > { %6164 = vmatprep.subr.bf16.mxu0 %v6484_v42  ;;  %v6189_v46 = vpack.c.bf16 %v4680_v45, %v4679_v44  ;;  %v6192_v49 = vpack.c.bf16 %v4682_v48, %v4681_v47  ;;  %v4699_v45 = vld [vmem:[%s7898_s11 + $0x120] sm:$0xff]  ;;  %v4693_v48 = vld [vmem:[%s7897_s10 + $0x8] sm:$0xf] }
 0x47c   : > { %6166 = vmatpush3.bf16.msra.mxu0 %v6165_v51  ;;  %v4684_v51 = vld [vmem:[%s7898_s11 + $0xb8] sm:$0xff] }
 0x47d   : > { %6167 = vmatprep.subr.bf16.mxu0 %v6484_v42  ;;  %v6195_v52 = vpack.c.bf16 %v4684_v51, %v4683_v50  ;;  %v4714_v50 = vld [vmem:[%s7898_s11 + $0x188] sm:$0xff] }
 0x480   : > { %6169 = vmatpush3.bf16.msra.mxu0 %v6168_v54  ;;  %v4686_v54 = vld [vmem:[%s7898_s11 + $0xc8] sm:$0xff] }
 0x481   : > { %6170 = vmatprep.subr.bf16.mxu0 %v6484_v42  ;;  %v6198_v55 = vpack.c.bf16 %v4686_v54, %v4685_v53  ;;  %v4702_v53 = vld [vmem:[%s7898_s11 + $0x138] sm:$0xff]  ;;  %v4711_v54 = vld [vmem:[%s7897_s10 + $0xc] sm:$0xf] }
 0x484   : > { %6172 = vmatpush3.bf16.msra.mxu0 %v6171_v57  ;;  %v4688_v57 = vld [vmem:[%s7898_s11 + $0xd8] sm:$0xff] }
 0x485   : > { %5521 = vmatprep.subr.mxu0 %v6486_v43 }
 0x54a   : > { %v1860_v58 = vpop.f32.mrb[4].mxu0 }
 0x54b   : > { %v1864_v60 = vadd.f32 %v1860_v58, %v1701_v40  ;;  %v5448_v61 = vpop.f32.mrb[5].mxu0  ;;  %v4678_v40 = vld [vmem:[%s7898_s11 + $0x88] sm:$0xff]  ;;  %v6201_v58 = vpack.c.bf16 %v4688_v57, %v4687_v56  ;;  %v4715_v56 = vld [vmem:[%s7898_s11 + $0x190] sm:$0xff]  ;;  %v4716_v57 = vld [vmem:[%s7898_s11 + $0x198] sm:$0xff] }
 0x54c   : > { %v6186_v41 = vpack.c.bf16 %v4678_v40, %v4677_v39  ;;  %v4698_v39 = vld [vmem:[%s7898_s11 + $0x118] sm:$0xff] }
 0x54d   : > { %v1872_v62 = vadd.f32 %v4648_v59, %v1864_v60  ;;  %v4689_v59 = vld [vmem:[%s7898_s11 + $0xe0] sm:$0xff]  ;;  %v4690_v60 = vld [vmem:[%s7898_s11 + $0xe8] sm:$0xff] }
 0x54e   : > { %v6204_v61 = vpack.c.bf16 %v4690_v60, %v4689_v59  ;;  %v4703_v59 = vld [vmem:[%s7898_s11 + $0x140] sm:$0xff]  ;;  %v4704_v60 = vld [vmem:[%s7898_s11 + $0x148] sm:$0xff] }
 0x54f   : > { %v1874_v63 = vmul.f32 0.2, %v1872_v62  ;;  %vm1873_vm5 = vcmp.ge.f32.partialorder %v1872_v62, 0.0 }
 0x551   : > { %v1875_v1 = vsel %vm1873_vm5, %v1872_v62, %v1874_v63  ;;  %v4673_v63 = vld [vmem:[%s7896_s9] ss:$0 sm:$0xff] }
 0x552   : > { %5450 = vmatpush3.msra.mxu1 %v1875_v1 }
 0x553   : > { %5452 = vmatmul.mubr.msk.f32.vlgmr.msra.gmra.mrb[18].mxu1 %vm1877_vm6, %v1876_v0  ;;  %5454 = vmatprep.subr.mxu1 %v6486_v43 }
 0x554   : > { %5455 = vmatpush3.msra.mxu1 %v1875_v1  ;;  %5456 = vmatprep.mubr.msk.f32.mxu1 %vm6485_vm2, %v6486_v43 }
 0x555   : > { %6149 = vmatprep.subr.bf16.mxu1 %v6484_v42 }
 0x557   : > { %5457 = vmatmul.mubr.msk.f32.vlgmr.msra.gmra.mrb[20].mxu1 %vm1877_vm6, %v4650_v4  ;;  %v2359_v4 = vld [vmem:[%s7897_s10] sm:$0xf] }
 0x558   : > { %6151 = vmatpush3.bf16.msra.mxu1 %v6150_v5  ;;  %5475 = vmatprep.mubr.msk.f32.mxu1 %vm6485_vm2, %v6486_v43 }
 0x559   : > { %6152 = vmatprep.subr.bf16.mxu1 %v6484_v42 }
 0x55c   : > { %6154 = vmatpush3.bf16.msra.mxu1 %v6153_v8  ;;  %v4675_v8 = vld [vmem:[%s7897_s10 + $0x4] sm:$0xf] }
 0x55d   : > { %6155 = vmatprep.subr.bf16.mxu1 %v6484_v42 }
 0x560   : > { %6157 = vmatpush3.bf16.msra.mxu1 %v6156_v11  ;;  %v2436_v11 = vld [vmem:[%s7898_s11 + $0x18] sm:$0xff] }
 0x561   : > { %6158 = vmatprep.subr.bf16.mxu1 %v6484_v42  ;;  %v6213_v12 = vpack.c.bf16 %v2436_v11, %v2435_v10  ;;  %v4707_v11 = vld [vmem:[%s7898_s11 + $0x160] sm:$0xff] }
 0x564   : > { %6160 = vmatpush3.bf16.msra.mxu1 %v6159_v15  ;;  %v2438_v15 = vld [vmem:[%s7898_s11 + $0x28] sm:$0xff] }
 0x565   : > { %5497 = vmatprep.subr.mxu1 %v6486_v43 }
 0x626   : > { %v1947_v16 = vpop.f32.mrb[18].mxu1 }
 0x627   : > { %v5453_v17 = vpop.f32.mrb[19].mxu1  ;;  %5495 = vmatmul.mubr.msk.f32.vlgmr.msra.gmra.mrb[6].mxu0 %vm2043_vm7, %v1947_v16  ;;  %v6216_v16 = vpack.c.bf16 %v2438_v15, %v2437_v14  ;;  %v4723_v14 = vld [vmem:[%s7898_s11 + $0x1d0] sm:$0xff] }
 0x628   : > { %5523 = vmatprep.mubr.msk.f32.mxu0 %vm6485_vm2, %v6486_v43  ;;  %v2439_v17 = vld [vmem:[%s7898_s11 + $0x30] sm:$0xff] }
 0x629   : > { %v6219_v19 = vpack.c.bf16 %v2440_v18, %v2439_v17  ;;  %v4709_v18 = vld [vmem:[%s7898_s11 + $0x170] sm:$0xff] }
 0x62a   : > { %v2030_v20 = vpop.f32.mrb[20].mxu1 }
 0x62b   : > { %v5458_v21 = vpop.f32.mrb[21].mxu1  ;;  %5476 = vmatmul.mubr.msk.f32.vlgmr.msra.gmra.mrb[22].mxu1 %vm2043_vm7, %v2030_v20  ;;  %v2441_v20 = vld [vmem:[%s7898_s11 + $0x40] sm:$0xff] }
 0x62c   : > { %5498 = vmatpush3.msra.mxu1 %v1875_v1  ;;  %5499 = vmatprep.mubr.msk.f32.mxu1 %vm6485_vm2, %v6486_v43  ;;  %v2442_v21 = vld [vmem:[%s7898_s11 + $0x48] sm:$0xff] }
 0x62d   : > { %6173 = vmatprep.subr.bf16.mxu1 %v6484_v42 }
 0x62f   : > { %5500 = vmatmul.mubr.msk.f32.vlgmr.msra.gmra.mrb[24].mxu1 %vm1877_vm6, %v4662_v22  ;;  %v6222_v22 = vpack.c.bf16 %v2442_v21, %v2441_v20  ;;  %v4725_v20 = vld [vmem:[%s7898_s11 + $0x1e0] sm:$0xff] }
 0x630   : > { %6175 = vmatpush3.bf16.msra.mxu1 %v6174_v23  ;;  %5518 = vmatprep.mubr.msk.f32.mxu1 %vm6485_vm2, %v6486_v43  ;;  %v2443_v23 = vld [vmem:[%s7898_s11 + $0x50] sm:$0xff] }
 0x631   : > { %6176 = vmatprep.subr.bf16.mxu1 %v6484_v42  ;;  %v6225_v25 = vpack.c.bf16 %v2444_v24, %v2443_v23  ;;  %v4727_v24 = vld [vmem:[%s7898_s11 + $0x1f0] sm:$0xff] }
 0x634   : > { %6178 = vmatpush3.bf16.msra.mxu1 %v6177_v26  ;;  %v2445_v26 = vld [vmem:[%s7898_s11 + $0x60] sm:$0xff] }
 0x635   : > { %6179 = vmatprep.subr.bf16.mxu1 %v6484_v42  ;;  %v6228_v28 = vpack.c.bf16 %v2446_v27, %v2445_v26 }
 0x638   : > { %6181 = vmatpush3.bf16.msra.mxu1 %v6180_v29  ;;  %v2447_v29 = vld [vmem:[%s7898_s11 + $0x70] sm:$0xff] }
 0x639   : > { %6182 = vmatprep.subr.bf16.mxu1 %v6484_v42  ;;  %v6231_v31 = vpack.c.bf16 %v2448_v30, %v2447_v29 }
 0x63c   : > { %6184 = vmatpush3.bf16.msra.mxu1 %v6183_v32  ;;  %v4691_v32 = vld [vmem:[%s7898_s11 + $0xf0] sm:$0xff] }
 0x63d   : > { %6185 = vmatprep.subr.bf16.mxu1 %v6484_v42 }
 0x6fa   : > { %v2186_v33 = vpop.f32.mrb[6].mxu0 }
 0x6fb   : > { %v5496_v34 = vpop.f32.mrb[7].mxu0 }
 0x6fe   : > { %v2113_v35 = vpop.f32.mrb[22].mxu1 }
 0x6ff   : > { %v2187_v36 = vadd.f32 %v2186_v33, %v2113_v35  ;;  %v5477_v37 = vpop.f32.mrb[23].mxu1  ;;  %v4692_v33 = vld [vmem:[%s7898_s11 + $0xf8] sm:$0xff]  ;;  %v4695_v35 = vld [vmem:[%s7898_s11 + $0x100] sm:$0xff] }
 0x700   : > { %v6207_v34 = vpack.c.bf16 %v4692_v33, %v4691_v32 }
 0x702   : > { %v2261_v13 = vpop.f32.mrb[24].mxu1 }
 0x703   : > { %v5501_v38 = vpop.f32.mrb[25].mxu1  ;;  %5519 = vmatmul.mubr.msk.f32.vlgmr.msra.gmra.mrb[26].mxu1 %vm2043_vm7, %v2261_v13 }
 0x704   : > { %5563 = vmatprep.mubr.msk.f32.mxu1 %vm6485_vm2, %v6486_v43  ;;  %6187 = vmatpush3.bf16.msra.mxu1 %v6186_v41  ;;  %v4697_v38 = vld [vmem:[%s7898_s11 + $0x110] sm:$0xff] }
 0x705   : > { %6188 = vmatprep.subr.bf16.mxu1 %v6484_v42  ;;  %v6237_v41 = vpack.c.bf16 %v4698_v39, %v4697_v38  ;;  %v4737_v38 = vld [vmem:[%s7901_s14 + $0x50] sm:$0xff]  ;;  %v4738_v39 = vld [vmem:[%s7901_s14 + $0x58] sm:$0xff] }
 0x708   : > { %6190 = vmatpush3.bf16.msra.mxu1 %v6189_v46  ;;  %v4700_v46 = vld [vmem:[%s7898_s11 + $0x128] sm:$0xff] }
 0x709   : > { %6191 = vmatprep.subr.bf16.mxu1 %v6484_v42  ;;  %v6240_v51 = vpack.c.bf16 %v4700_v46, %v4699_v45 }
 0x70c   : > { %6193 = vmatpush3.bf16.msra.mxu1 %v6192_v49  ;;  %v4713_v49 = vld [vmem:[%s7898_s11 + $0x180] sm:$0xff] }
 0x70d   : > { %6194 = vmatprep.subr.bf16.mxu1 %v6484_v42 }
 0x710   : > { %6196 = vmatpush3.bf16.msra.mxu1 %v6195_v52  ;;  %v4701_v52 = vld [vmem:[%s7898_s11 + $0x130] sm:$0xff] }
 0x711   : > { %6197 = vmatprep.subr.bf16.mxu1 %v6484_v42 }
 0x714   : > { %6199 = vmatpush3.bf16.msra.mxu1 %v6198_v55  ;;  %v6258_v55 = vpack.c.bf16 %v4714_v50, %v4713_v49  ;;  %v4729_v50 = vld [vmem:[%s7899_s12] ss:$0 sm:$0xff] }
 0x715   : > { %6200 = vmatprep.subr.bf16.mxu1 %v6484_v42 }
 0x718   : > { %6202 = vmatpush3.bf16.msra.mxu1 %v6201_v58  ;;  %v6243_v58 = vpack.c.bf16 %v4702_v53, %v4701_v52 }
 0x719   : > { %6203 = vmatprep.subr.bf16.mxu1 %v6484_v42 }
 0x71c   : > { %6205 = vmatpush3.bf16.msra.mxu1 %v6204_v61  ;;  %v6261_v61 = vpack.c.bf16 %v4716_v57, %v4715_v56  ;;  %v3097_v57 = vld [vmem:[%s7901_s14] sm:$0xff] }
 0x71d   : > { %6206 = vmatprep.subr.bf16.mxu1 %v6484_v42 }
 0x720   : > { %6208 = vmatpush3.bf16.msra.mxu1 %v6207_v34 }
 0x721   : > { %5601 = vmatprep.subr.mxu1 %v6486_v43 }
 0x7d6   : > { %v2343_v62 = vpop.f32.mrb[26].mxu1 }
 0x7d7   : > { %v2347_v0 = vadd.f32 %v2343_v62, %v2187_v36  ;;  %v5520_v1 = vpop.f32.mrb[27].mxu1  ;;  %v4696_v36 = vld [vmem:[%s7898_s11 + $0x108] sm:$0xff]  ;;  %v4717_v62 = vld [vmem:[%s7898_s11 + $0x1a0] sm:$0xff] }
 0x7d8   : > { %v6234_v37 = vpack.c.bf16 %v4696_v36, %v4695_v35  ;;  %v4705_v1 = vld [vmem:[%s7898_s11 + $0x150] sm:$0xff]  ;;  %v4735_v36 = vld [vmem:[%s7901_s14 + $0x40] sm:$0xff] }
 0x7d9   : > { %v2355_v2 = vadd.f32 %v4673_v63, %v2347_v0  ;;  %v4718_v63 = vld [vmem:[%s7898_s11 + $0x1a8] sm:$0xff]  ;;  %v6246_v0 = vpack.c.bf16 %v4704_v60, %v4703_v59  ;;  %v4732_v59 = vld [vmem:[%s7900_s13 + $0x4] sm:$0xf] }
 0x7db   : > { %v2357_v3 = vmul.f32 0.2, %v2355_v2  ;;  %vm2356_vm8 = vcmp.ge.f32.partialorder %v2355_v2, 0.0 }
 0x7dd   : > { %v7147_v5 = vsel %vm2356_vm8, %v2355_v2, %v2357_v3  ;;  %v4706_v2 = vld [vmem:[%s7898_s11 + $0x158] sm:$0xff]  ;;  %v6264_v3 = vpack.c.bf16 %v4718_v63, %v4717_v62 }
 0x7de   : > { %5522 = vmatpush3.msra.mxu0 %v7147_v5  ;;  %v6249_v6 = vpack.c.bf16 %v4706_v2, %v4705_v1  ;;  %v3100_v62 = vld [vmem:[%s7901_s14 + $0x18] sm:$0xff]  ;;  %v3102_v1 = vld [vmem:[%s7901_s14 + $0x28] sm:$0xff] }
 0x7df   : > { %5524 = vmatmul.mubr.msk.f32.vlgmr.msra.gmra.mrb[8].mxu0 %vm1877_vm6, %v2359_v4  ;;  %5526 = vmatprep.subr.mxu0 %v6486_v43  ;;  %v4719_v4 = vld [vmem:[%s7898_s11 + $0x1b0] sm:$0xff] }
 0x7e0   : > { %5527 = vmatpush3.msra.mxu0 %v7147_v5  ;;  %5528 = vmatprep.mubr.msk.f32.mxu0 %vm6485_vm2, %v6486_v43 }
 0x7e1   : > { %6209 = vmatprep.subr.bf16.mxu0 %v6484_v42 }
 0x7e3   : > { %5529 = vmatmul.mubr.msk.f32.vlgmr.msra.gmra.mrb[10].mxu0 %vm1877_vm6, %v4675_v8  ;;  %v4721_v8 = vld [vmem:[%s7898_s11 + $0x1c0] sm:$0xff] }
 0x7e4   : > { %6211 = vmatpush3.bf16.msra.mxu0 %v6210_v9  ;;  %5598 = vmatprep.mubr.msk.f32.mxu0 %vm6485_vm2, %v6486_v43  ;;  %v4722_v9 = vld [vmem:[%s7898_s11 + $0x1c8] sm:$0xff] }
 0x7e5   : > { %6212 = vmatprep.subr.bf16.mxu0 %v6484_v42  ;;  %v6270_v10 = vpack.c.bf16 %v4722_v9, %v4721_v8  ;;  %v4748_v9 = vld [vmem:[%s7901_s14 + $0x80] sm:$0xff] }
 0x7e8   : > { %6214 = vmatpush3.bf16.msra.mxu0 %v6213_v12  ;;  %v4708_v12 = vld [vmem:[%s7898_s11 + $0x168] sm:$0xff] }
 0x7e9   : > { %6215 = vmatprep.subr.bf16.mxu0 %v6484_v42  ;;  %v6252_v15 = vpack.c.bf16 %v4708_v12, %v4707_v11 }
 0x7ec   : > { %6217 = vmatpush3.bf16.msra.mxu0 %v6216_v16  ;;  %v4724_v16 = vld [vmem:[%s7898_s11 + $0x1d8] sm:$0xff] }
 0x7ed   : > { %6218 = vmatprep.subr.bf16.mxu0 %v6484_v42  ;;  %v6273_v17 = vpack.c.bf16 %v4724_v16, %v4723_v14  ;;  %v4750_v14 = vld [vmem:[%s7901_s14 + $0x90] sm:$0xff] }
 0x7f0   : > { %6220 = vmatpush3.bf16.msra.mxu0 %v6219_v19  ;;  %v4710_v19 = vld [vmem:[%s7898_s11 + $0x178] sm:$0xff] }
 0x7f1   : > { %6221 = vmatprep.subr.bf16.mxu0 %v6484_v42  ;;  %v6255_v21 = vpack.c.bf16 %v4710_v19, %v4709_v18 }
 0x7f4   : > { %6223 = vmatpush3.bf16.msra.mxu0 %v6222_v22  ;;  %v4726_v22 = vld [vmem:[%s7898_s11 + $0x1e8] sm:$0xff] }
 0x7f5   : > { %6224 = vmatprep.subr.bf16.mxu0 %v6484_v42  ;;  %v6276_v23 = vpack.c.bf16 %v4726_v22, %v4725_v20  ;;  %v4745_v20 = vld [vmem:[%s7900_s13 + $0x8] sm:$0xf] }
 0x7f6   : > { %v4753_v22 = vld [vmem:[%s7901_s14 + $0xa8] sm:$0xff] }
 0x7f8   : > { %6226 = vmatpush3.bf16.msra.mxu0 %v6225_v25  ;;  %v4728_v25 = vld [vmem:[%s7898_s11 + $0x1f8] sm:$0xff] }
 0x7f9   : > { %6227 = vmatprep.subr.bf16.mxu0 %v6484_v42  ;;  %v6279_v26 = vpack.c.bf16 %v4728_v25, %v4727_v24  ;;  %v4754_v24 = vld [vmem:[%s7901_s14 + $0xb0] sm:$0xff]  ;;  %v4755_v25 = vld [vmem:[%s7901_s14 + $0xb8] sm:$0xff] }
 0x7fc   : > { %6229 = vmatpush3.bf16.msra.mxu0 %v6228_v28 }
 0x7fd   : > { %6230 = vmatprep.subr.bf16.mxu0 %v6484_v42 }
 0x800   : > { %6232 = vmatpush3.bf16.msra.mxu0 %v6231_v31 }
 0x801   : > { %6233 = vmatprep.subr.bf16.mxu0 %v6484_v42 }
 0x8b2   : > { %v2429_v13 = vpop.f32.mrb[8].mxu0 }
 0x8b3   : > { %v5525_v40 = vpop.f32.mrb[9].mxu0  ;;  %5599 = vmatmul.mubr.f32.vlgmr.msra.gmra.mrb[12].mxu0 %v2429_v13 }
 0x8b4   : > { %6235 = vmatpush3.bf16.msra.mxu0 %v6234_v37  ;;  %5638 = vmatprep.mubr.msk.f32.mxu0 %vm6485_vm2, %v6486_v43  ;;  %v4736_v37 = vld [vmem:[%s7901_s14 + $0x48] sm:$0xff]  ;;  %v6285_v40 = vpack.c.bf16 %v4738_v39, %v4737_v38  ;;  %v3585_v39 = vld [vmem:[%s7904_s17 + $0x20] sm:$0xff] }
 0x8b5   : > { %6236 = vmatprep.subr.bf16.mxu0 %v6484_v42  ;;  %v6282_v13 = vpack.c.bf16 %v4736_v37, %v4735_v36  ;;  %v3583_v37 = vld [vmem:[%s7904_s17 + $0x10] sm:$0xff] }
 0x8b6   : > { %v2520_v44 = vpop.f32.mrb[10].mxu0 }
 0x8b7   : > { %v5530_v47 = vpop.f32.mrb[11].mxu0  ;;  %5564 = vmatmul.mubr.f32.vlgmr.msra.gmra.mrb[28].mxu1 %v2520_v44  ;;  %v4740_v44 = vld [vmem:[%s7901_s14 + $0x68] sm:$0xff] }
 0x8b8   : > { %5602 = vmatpush3.msra.mxu1 %v7147_v5  ;;  %5603 = vmatprep.mubr.msk.f32.mxu1 %vm6485_vm2, %v6486_v43 }
 0x8b9   : > { %5641 = vmatprep.subr.mxu1 %v6486_v43  ;;  %6238 = vmatpush3.bf16.msra.mxu0 %v6237_v41  ;;  %v4739_v41 = vld [vmem:[%s7901_s14 + $0x60] sm:$0xff] }
 0x8ba   : > { %6239 = vmatprep.subr.bf16.mxu0 %v6484_v42  ;;  %v6288_v45 = vpack.c.bf16 %v4740_v44, %v4739_v41  ;;  %v3587_v44 = vld [vmem:[%s7904_s17 + $0x30] sm:$0xff] }
 0x8bb   : > { %5604 = vmatmul.mubr.msk.f32.vlgmr.msra.gmra.mrb[30].mxu1 %vm1877_vm6, %v4693_v48 }
 0x8bc   : > { %5642 = vmatpush3.msra.mxu1 %v7147_v5  ;;  %5643 = vmatprep.mubr.msk.f32.mxu1 %vm6485_vm2, %v6486_v43  ;;  %v4720_v5 = vld [vmem:[%s7898_s11 + $0x1b8] sm:$0xff] }
 0x8bd   : > { %6257 = vmatprep.subr.bf16.mxu1 %v6484_v42  ;;  %6241 = vmatpush3.bf16.msra.mxu0 %v6240_v51  ;;  %v6267_v7 = vpack.c.bf16 %v4720_v5, %v4719_v4  ;;  %v3104_v4 = vld [vmem:[%s7901_s14 + $0x38] sm:$0xff] }
 0x8be   : > { %6242 = vmatprep.subr.bf16.mxu0 %v6484_v42 }
 0x8bf   : > { %5644 = vmatmul.mubr.msk.f32.vlgmr.msra.gmra.mrb[32].mxu1 %vm1877_vm6, %v4711_v54 }
 0x8c0   : > { %6259 = vmatpush3.bf16.msra.mxu1 %v6258_v55  ;;  %5678 = vmatprep.mubr.msk.f32.mxu1 %vm6485_vm2, %v6486_v43  ;;  %v3018_v55 = vld [vmem:[%s7900_s13] sm:$0xf] }
 0x8c1   : > { %6260 = vmatprep.subr.bf16.mxu1 %v6484_v42  ;;  %6244 = vmatpush3.bf16.msra.mxu0 %v6243_v58  ;;  %v3098_v58 = vld [vmem:[%s7901_s14 + $0x8] sm:$0xff] }
 0x8c2   : > { %6245 = vmatprep.subr.bf16.mxu0 %v6484_v42  ;;  %v6294_v60 = vpack.c.bf16 %v3098_v58, %v3097_v57  ;;  %v3596_v57 = vld [vmem:[%s7904_s17 + $0x78] sm:$0xff] }
 0x8c4   : > { %6262 = vmatpush3.bf16.msra.mxu1 %v6261_v61  ;;  %v3099_v61 = vld [vmem:[%s7901_s14 + $0x10] sm:$0xff] }
 0x8c5   : > { %6263 = vmatprep.subr.bf16.mxu1 %v6484_v42  ;;  %6247 = vmatpush3.bf16.msra.mxu0 %v6246_v0  ;;  %v6297_v63 = vpack.c.bf16 %v3100_v62, %v3099_v61  ;;  %v3101_v0 = vld [vmem:[%s7901_s14 + $0x20] sm:$0xff] }
 0x8c6   : > { %6248 = vmatprep.subr.bf16.mxu0 %v6484_v42  ;;  %v6300_v2 = vpack.c.bf16 %v3102_v1, %v3101_v0  ;;  %v3504_v1 = vld [vmem:[%s7903_s16] sm:$0xf] }
 0x8c8   : > { %6265 = vmatpush3.bf16.msra.mxu1 %v6264_v3  ;;  %v3103_v3 = vld [vmem:[%s7901_s14 + $0x30] sm:$0xff] }
 0x8c9   : > { %6266 = vmatprep.subr.bf16.mxu1 %v6484_v42  ;;  %6250 = vmatpush3.bf16.msra.mxu0 %v6249_v6  ;;  %v6303_v5 = vpack.c.bf16 %v3104_v4, %v3103_v3  ;;  %v4741_v6 = vld [vmem:[%s7901_s14 + $0x70] sm:$0xff]  ;;  %v4763_v3 = vld [vmem:[%s7904_s17 + $0x80] sm:$0xff]  ;;  %v4764_v4 = vld [vmem:[%s7904_s17 + $0x88] sm:$0xff] }
 0x8ca   : > { %6251 = vmatprep.subr.bf16.mxu0 %v6484_v42 }
 0x8cc   : > { %6268 = vmatpush3.bf16.msra.mxu1 %v6267_v7  ;;  %v4742_v7 = vld [vmem:[%s7901_s14 + $0x78] sm:$0xff] }
 0x8cd   : > { %6269 = vmatprep.subr.bf16.mxu1 %v6484_v42  ;;  %6253 = vmatpush3.bf16.msra.mxu0 %v6252_v15  ;;  %v6291_v8 = vpack.c.bf16 %v4742_v7, %v4741_v6  ;;  %v4751_v15 = vld [vmem:[%s7901_s14 + $0x98] sm:$0xff]  ;;  %v6318_v6 = vpack.c.bf16 %v4764_v4, %v4763_v3  ;;  %v4765_v7 = vld [vmem:[%s7904_s17 + $0x90] sm:$0xff]  ;;  %v4081_v3 = vld [vmem:[%s7907_s20 + $0x8] sm:$0xff] }
 0x8ce   : > { %6254 = vmatprep.subr.bf16.mxu0 %v6484_v42 }
 0x8d0   : > { %6271 = vmatpush3.bf16.msra.mxu1 %v6270_v10  ;;  %v4749_v10 = vld [vmem:[%s7901_s14 + $0x88] sm:$0xff] }
 0x8d1   : > { %6272 = vmatprep.subr.bf16.mxu1 %v6484_v42  ;;  %6256 = vmatpush3.bf16.msra.mxu0 %v6255_v21  ;;  %v6306_v11 = vpack.c.bf16 %v4749_v10, %v4748_v9  ;;  %v4752_v21 = vld [vmem:[%s7901_s14 + $0xa0] sm:$0xff] }
 0x8d2   : > { %5681 = vmatprep.subr.mxu0 %v6486_v43  ;;  %v4767_v10 = vld [vmem:[%s7904_s17 + $0xa0] sm:$0xff] }
 0x8d4   : > { %6274 = vmatpush3.bf16.msra.mxu1 %v6273_v17  ;;  %v6309_v17 = vpack.c.bf16 %v4751_v15, %v4750_v14  ;;  %v4769_v14 = vld [vmem:[%s7904_s17 + $0xb0] sm:$0xff]  ;;  %v4770_v15 = vld [vmem:[%s7904_s17 + $0xb8] sm:$0xff] }
 0x8d5   : > { %6275 = vmatprep.subr.bf16.mxu1 %v6484_v42 }
 0x8d8   : > { %6277 = vmatpush3.bf16.msra.mxu1 %v6276_v23  ;;  %v6312_v23 = vpack.c.bf16 %v4753_v22, %v4752_v21  ;;  %v4774_v21 = vld [vmem:[%s7904_s17 + $0xd8] sm:$0xff] }
 0x8d9   : > { %6278 = vmatprep.subr.bf16.mxu1 %v6484_v42 }
 0x8dc   : > { %6280 = vmatpush3.bf16.msra.mxu1 %v6279_v26  ;;  %v6315_v26 = vpack.c.bf16 %v4755_v25, %v4754_v24  ;;  %v4776_v24 = vld [vmem:[%s7904_s17 + $0xe8] sm:$0xff] }
 0x8dd   : > { %6281 = vmatprep.subr.bf16.mxu1 %v6484_v42 }
 0x986   : > { %v2677_v27 = vpop.f32.mrb[12].mxu0 }
 0x987   : > { %v5600_v28 = vpop.f32.mrb[13].mxu0 }
 0x98a   : > { %v2607_v29 = vpop.f32.mrb[28].mxu1 }
 0x98b   : > { %v2678_v30 = vadd.f32 %v2677_v27, %v2607_v29  ;;  %v5565_v31 = vpop.f32.mrb[29].mxu1 }
 0x98e   : > { %v2752_v32 = vpop.f32.mrb[30].mxu1 }
 0x98f   : > { %v5605_v33 = vpop.f32.mrb[31].mxu1  ;;  %5639 = vmatmul.mubr.f32.vlgmr.msra.gmra.mrb[14].mxu0 %v2752_v32 }
 0x990   : > { %5683 = vmatprep.mubr.msk.f32.mxu0 %vm6485_vm2, %v6486_v43 }
 0x992   : > { %v2915_v34 = vpop.f32.mrb[32].mxu1 }
 0x993   : > { %v5645_v35 = vpop.f32.mrb[33].mxu1  ;;  %5679 = vmatmul.mubr.f32.vlgmr.msra.gmra.mrb[34].mxu1 %v2915_v34  ;;  %v3581_v34 = vld [vmem:[%s7904_s17] sm:$0xff] }
 0x994   : > { %5707 = vmatprep.mubr.msk.f32.mxu1 %vm6485_vm2, %v6486_v43  ;;  %6283 = vmatpush3.bf16.msra.mxu1 %v6282_v13  ;;  %v3582_v35 = vld [vmem:[%s7904_s17 + $0x8] sm:$0xff]  ;;  %v3584_v13 = vld [vmem:[%s7904_s17 + $0x18] sm:$0xff] }
 0x995   : > { %6284 = vmatprep.subr.bf16.mxu1 %v6484_v42  ;;  %v6342_v36 = vpack.c.bf16 %v3582_v35, %v3581_v34  ;;  %v6345_v38 = vpack.c.bf16 %v3584_v13, %v3583_v37  ;;  %v4779_v35 = vld [vmem:[%s7903_s16 + $0x8] sm:$0xf]  ;;  %v4784_v37 = vld [vmem:[%s7904_s17 + $0x110] sm:$0xff]  ;;  %v4785_v13 = vld [vmem:[%s7904_s17 + $0x118] sm:$0xff] }
 0x998   : > { %6286 = vmatpush3.bf16.msra.mxu1 %v6285_v40  ;;  %v3586_v40 = vld [vmem:[%s7904_s17 + $0x28] sm:$0xff] }
 0x999   : > { %6287 = vmatprep.subr.bf16.mxu1 %v6484_v42  ;;  %v6348_v41 = vpack.c.bf16 %v3586_v40, %v3585_v39  ;;  %v4786_v39 = vld [vmem:[%s7904_s17 + $0x120] sm:$0xff]  ;;  %v4787_v40 = vld [vmem:[%s7904_s17 + $0x128] sm:$0xff] }
 0x99c   : > { %6289 = vmatpush3.bf16.msra.mxu1 %v6288_v45  ;;  %v3588_v45 = vld [vmem:[%s7904_s17 + $0x38] sm:$0xff] }
 0x99d   : > { %6290 = vmatprep.subr.bf16.mxu1 %v6484_v42 }
 0x9a0   : > { %6292 = vmatpush3.bf16.msra.mxu1 %v6291_v8  ;;  %v4766_v8 = vld [vmem:[%s7904_s17 + $0x98] sm:$0xff] }
 0x9a1   : > { %5729 = vmatprep.subr.mxu1 %v6486_v43  ;;  %v6321_v9 = vpack.c.bf16 %v4766_v8, %v4765_v7  ;;  %v4084_v8 = vld [vmem:[%s7907_s20 + $0x20] sm:$0xff] }
 0xa62   : > { %v2839_v46 = vpop.f32.mrb[14].mxu0 }
 0xa63   : > { %v2843_v47 = vadd.f32 %v2839_v46, %v2678_v30  ;;  %v5640_v48 = vpop.f32.mrb[15].mxu0  ;;  %v6351_v46 = vpack.c.bf16 %v3588_v45, %v3587_v44  ;;  %v4788_v44 = vld [vmem:[%s7904_s17 + $0x130] sm:$0xff]  ;;  %v4789_v45 = vld [vmem:[%s7904_s17 + $0x138] sm:$0xff] }
 0xa64   : > { %v3590_v48 = vld [vmem:[%s7904_s17 + $0x48] sm:$0xff] }
 0xa66   : > { %v3002_v49 = vpop.f32.mrb[34].mxu1 }
 0xa67   : > { %v3006_v51 = vadd.f32 %v3002_v49, %v2843_v47  ;;  %v5680_v52 = vpop.f32.mrb[35].mxu1  ;;  %v3589_v47 = vld [vmem:[%s7904_s17 + $0x40] sm:$0xff] }
 0xa68   : > { %v6354_v49 = vpack.c.bf16 %v3590_v48, %v3589_v47  ;;  %v4790_v47 = vld [vmem:[%s7904_s17 + $0x140] sm:$0xff]  ;;  %v4791_v48 = vld [vmem:[%s7904_s17 + $0x148] sm:$0xff] }
 0xa69   : > { %v3014_v53 = vadd.f32 %v4729_v50, %v3006_v51  ;;  %v3591_v50 = vld [vmem:[%s7904_s17 + $0x50] sm:$0xff]  ;;  %v3592_v51 = vld [vmem:[%s7904_s17 + $0x58] sm:$0xff] }
 0xa6a   : > { %v6357_v52 = vpack.c.bf16 %v3592_v51, %v3591_v50  ;;  %v4792_v50 = vld [vmem:[%s7904_s17 + $0x150] sm:$0xff]  ;;  %v4793_v51 = vld [vmem:[%s7904_s17 + $0x158] sm:$0xff] }
 0xa6b   : > { %vm3015_vm9 = vcmp.ge.f32.partialorder %v3014_v53, 0.0  ;;  %v3016_v54 = vmul.f32 0.2, %v3014_v53 }
 0xa6d   : > { %v3017_v56 = vsel %vm3015_vm9, %v3014_v53, %v3016_v54  ;;  %v3593_v53 = vld [vmem:[%s7904_s17 + $0x60] sm:$0xff]  ;;  %v3594_v54 = vld [vmem:[%s7904_s17 + $0x68] sm:$0xff] }
 0xa6e   : > { %5682 = vmatpush3.msk.msra.mxu0 %vm3023_vm10, %v3017_v56 }
 0xa6f   : > { %5684 = vmatmul.mubr.msk.f32.vlgmr.msra.gmra.mrb[16].mxu0 %vm3019_vm11, %v3018_v55  ;;  %5686 = vmatprep.subr.mxu0 %v6486_v43  ;;  %v6360_v55 = vpack.c.bf16 %v3594_v54, %v3593_v53  ;;  %v4794_v53 = vld [vmem:[%s7904_s17 + $0x160] sm:$0xff]  ;;  %v4795_v54 = vld [vmem:[%s7904_s17 + $0x168] sm:$0xff] }
 0xa70   : > { %5687 = vmatpush3.msk.msra.mxu0 %vm3023_vm10, %v3017_v56  ;;  %5688 = vmatprep.mubr.msk.f32.mxu0 %vm6485_vm2, %v6486_v43 }
 0xa71   : > { %6293 = vmatprep.subr.bf16.mxu0 %v6484_v42 }
 0xa73   : > { %5689 = vmatmul.mubr.msk.f32.vlgmr.msra.gmra.mrb[18].mxu0 %vm3019_vm11, %v4732_v59 }
 0xa74   : > { %6295 = vmatpush3.bf16.msra.mxu0 %v6294_v60  ;;  %5726 = vmatprep.mubr.msk.f32.mxu0 %vm6485_vm2, %v6486_v43  ;;  %v4757_v60 = vld [vmem:[%s7902_s15] ss:$0 sm:$0xff] }
 0xa75   : > { %6296 = vmatprep.subr.bf16.mxu0 %v6484_v42 }
 0xa78   : > { %6298 = vmatpush3.bf16.msra.mxu0 %v6297_v63 }
 0xa79   : > { %6299 = vmatprep.subr.bf16.mxu0 %v6484_v42 }
 0xa7c   : > { %6301 = vmatpush3.bf16.msra.mxu0 %v6300_v2 }
 0xa7d   : > { %6302 = vmatprep.subr.bf16.mxu0 %v6484_v42 }
 0xa80   : > { %6304 = vmatpush3.bf16.msra.mxu0 %v6303_v5  ;;  %v4760_v5 = vld [vmem:[%s7903_s16 + $0x4] sm:$0xf] }
 0xa81   : > { %6305 = vmatprep.subr.bf16.mxu0 %v6484_v42 }
 0xb42   : > { %v3093_v12 = vpop.f32.mrb[16].mxu0 }
 0xb43   : > { %v5685_v16 = vpop.f32.mrb[17].mxu0  ;;  %5727 = vmatmul.mubr.msk.f32.vlgmr.msra.gmra.mrb[20].mxu0 %vm2043_vm7, %v3093_v12 }
 0xb44   : > { %6307 = vmatpush3.bf16.msra.mxu0 %v6306_v11  ;;  %5750 = vmatprep.mubr.msk.f32.mxu0 %vm6485_vm2, %v6486_v43  ;;  %v4768_v11 = vld [vmem:[%s7904_s17 + $0xa8] sm:$0xff]  ;;  %v6327_v16 = vpack.c.bf16 %v4770_v15, %v4769_v14  ;;  %v4088_v15 = vld [vmem:[%s7907_s20 + $0x40] sm:$0xff] }
 0xb45   : > { %6308 = vmatprep.subr.bf16.mxu0 %v6484_v42  ;;  %v6324_v12 = vpack.c.bf16 %v4768_v11, %v4767_v10  ;;  %v4086_v11 = vld [vmem:[%s7907_s20 + $0x30] sm:$0xff] }
 0xb46   : > { %v3176_v18 = vpop.f32.mrb[18].mxu0 }
 0xb47   : > { %v5690_v19 = vpop.f32.mrb[19].mxu0  ;;  %5708 = vmatmul.mubr.msk.f32.vlgmr.msra.gmra.mrb[36].mxu1 %vm2043_vm7, %v3176_v18  ;;  %v4772_v18 = vld [vmem:[%s7904_s17 + $0xc8] sm:$0xff] }
 0xb48   : > { %5730 = vmatpush3.msk.msra.mxu1 %vm3023_vm10, %v3017_v56  ;;  %5731 = vmatprep.mubr.msk.f32.mxu1 %vm6485_vm2, %v6486_v43  ;;  %v3595_v56 = vld [vmem:[%s7904_s17 + $0x70] sm:$0xff] }
 0xb49   : > { %6310 = vmatpush3.bf16.msra.mxu0 %v6309_v17  ;;  %5753 = vmatprep.subr.mxu1 %v6486_v43  ;;  %v6363_v58 = vpack.c.bf16 %v3596_v57, %v3595_v56  ;;  %v4771_v17 = vld [vmem:[%s7904_s17 + $0xc0] sm:$0xff]  ;;  %v4796_v56 = vld [vmem:[%s7904_s17 + $0x170] sm:$0xff]  ;;  %v4797_v57 = vld [vmem:[%s7904_s17 + $0x178] sm:$0xff] }
 0xb4a   : > { %6311 = vmatprep.subr.bf16.mxu0 %v6484_v42  ;;  %v6330_v19 = vpack.c.bf16 %v4772_v18, %v4771_v17  ;;  %v4090_v18 = vld [vmem:[%s7907_s20 + $0x50] sm:$0xff] }
 0xb4b   : > { %5732 = vmatmul.mubr.msk.f32.vlgmr.msra.gmra.mrb[38].mxu1 %vm3019_vm11, %v4745_v20  ;;  %v4773_v20 = vld [vmem:[%s7904_s17 + $0xd0] sm:$0xff] }
 0xb4c   : > { %5755 = vmatprep.mubr.msk.f32.mxu1 %vm6485_vm2, %v6486_v43  ;;  %v6333_v22 = vpack.c.bf16 %v4774_v21, %v4773_v20  ;;  %v4092_v21 = vld [vmem:[%s7907_s20 + $0x60] sm:$0xff] }
 0xb4d   : > { %6313 = vmatpush3.bf16.msra.mxu0 %v6312_v23  ;;  %v4775_v23 = vld [vmem:[%s7904_s17 + $0xe0] sm:$0xff] }
 0xb4e   : > { %6314 = vmatprep.subr.bf16.mxu0 %v6484_v42  ;;  %v6336_v25 = vpack.c.bf16 %v4776_v24, %v4775_v23  ;;  %v4094_v24 = vld [vmem:[%s7907_s20 + $0x70] sm:$0xff] }
 0xb51   : > { %6316 = vmatpush3.bf16.msra.mxu0 %v6315_v26  ;;  %v4777_v26 = vld [vmem:[%s7904_s17 + $0xf0] sm:$0xff] }
 0xb52   : > { %6341 = vmatprep.subr.bf16.mxu0 %v6484_v42 }
 0xc16   : > { %v3331_v27 = vpop.f32.mrb[20].mxu0 }
 0xc17   : > { %v5728_v28 = vpop.f32.mrb[21].mxu0 }
 0xc1a   : > { %v3258_v29 = vpop.f32.mrb[36].mxu1 }
 0xc1b   : > { %v3332_v30 = vadd.f32 %v3331_v27, %v3258_v29  ;;  %v5709_v31 = vpop.f32.mrb[37].mxu1  ;;  %v4778_v27 = vld [vmem:[%s7904_s17 + $0xf8] sm:$0xff] }
 0xc1c   : > { %v6339_v28 = vpack.c.bf16 %v4778_v27, %v4777_v26  ;;  %v4782_v31 = vld [vmem:[%s7904_s17 + $0x100] sm:$0xff] }
 0xc1e   : > { %v3406_v32 = vpop.f32.mrb[38].mxu1 }
 0xc1f   : > { %v5733_v33 = vpop.f32.mrb[39].mxu1  ;;  %5751 = vmatmul.mubr.msk.f32.vlgmr.msra.gmra.mrb[22].mxu0 %vm2043_vm7, %v3406_v32  ;;  %v4783_v32 = vld [vmem:[%s7904_s17 + $0x108] sm:$0xff] }
 0xc20   : > { %5830 = vmatprep.mubr.msk.f32.mxu0 %vm6485_vm2, %v6486_v43  ;;  %6343 = vmatpush3.bf16.msra.mxu0 %v6342_v36  ;;  %v6366_v36 = vpack.c.bf16 %v4783_v32, %v4782_v31 }
 0xc21   : > { %6344 = vmatprep.subr.bf16.mxu0 %v6484_v42 }
 0xc24   : > { %6346 = vmatpush3.bf16.msra.mxu0 %v6345_v38  ;;  %v6369_v38 = vpack.c.bf16 %v4785_v13, %v4784_v37  ;;  %v4801_v37 = vld [vmem:[%s7906_s19 + $0x4] sm:$0xf] }
 0xc25   : > { %6347 = vmatprep.subr.bf16.mxu0 %v6484_v42 }
 0xc28   : > { %6349 = vmatpush3.bf16.msra.mxu0 %v6348_v41  ;;  %v6372_v41 = vpack.c.bf16 %v4787_v40, %v4786_v39  ;;  %v4807_v39 = vld [vmem:[%s7907_s20 + $0x98] sm:$0xff] }
 0xc29   : > { %6350 = vmatprep.subr.bf16.mxu0 %v6484_v42 }
 0xc2c   : > { %6352 = vmatpush3.bf16.msra.mxu0 %v6351_v46  ;;  %v6375_v46 = vpack.c.bf16 %v4789_v45, %v4788_v44  ;;  %v4809_v44 = vld [vmem:[%s7907_s20 + $0xa8] sm:$0xff] }
 0xc2d   : > { %6353 = vmatprep.subr.bf16.mxu0 %v6484_v42 }
 0xc30   : > { %6355 = vmatpush3.bf16.msra.mxu0 %v6354_v49  ;;  %v6378_v49 = vpack.c.bf16 %v4791_v48, %v4790_v47  ;;  %v4811_v47 = vld [vmem:[%s7907_s20 + $0xb8] sm:$0xff] }
 0xc31   : > { %6356 = vmatprep.subr.bf16.mxu0 %v6484_v42 }
 0xc34   : > { %6358 = vmatpush3.bf16.msra.mxu0 %v6357_v52  ;;  %v6381_v52 = vpack.c.bf16 %v4793_v51, %v4792_v50  ;;  %v4813_v50 = vld [vmem:[%s7907_s20 + $0xc8] sm:$0xff] }
 0xc35   : > { %6359 = vmatprep.subr.bf16.mxu0 %v6484_v42 }
 0xc38   : > { %6361 = vmatpush3.bf16.msra.mxu0 %v6360_v55  ;;  %v6384_v55 = vpack.c.bf16 %v4795_v54, %v4794_v53  ;;  %v4815_v53 = vld [vmem:[%s7907_s20 + $0xd8] sm:$0xff] }
 0xc39   : > { %6362 = vmatprep.subr.bf16.mxu0 %v6484_v42 }
 0xc3c   : > { %6364 = vmatpush3.bf16.msra.mxu0 %v6363_v58  ;;  %v6387_v58 = vpack.c.bf16 %v4797_v57, %v4796_v56  ;;  %v4817_v56 = vld [vmem:[%s7907_s20 + $0xe8] sm:$0xff] }
 0xc3d   : > { %5873 = vmatprep.subr.mxu0 %v6486_v43 }
 0xcf2   : > { %v3488_v59 = vpop.f32.mrb[22].mxu0 }
 0xcf3   : > { %v3492_v61 = vadd.f32 %v3488_v59, %v3332_v30  ;;  %v5752_v62 = vpop.f32.mrb[23].mxu0 }
 0xcf5   : > { %v3500_v63 = vadd.f32 %v4757_v60, %v3492_v61 }
 0xcf7   : > { %vm3501_vm12 = vcmp.ge.f32.partialorder %v3500_v63, 0.0  ;;  %v3502_v0 = vmul.f32 0.2, %v3500_v63 }
 0xcf9   : > { %v3503_v2 = vsel %vm3501_vm12, %v3500_v63, %v3502_v0 }
 0xcfa   : > { %5754 = vmatpush3.msk.msra.mxu1 %vm3023_vm10, %v3503_v2 }
 0xcfb   : > { %5756 = vmatmul.mubr.msk.f32.vlgmr.msra.gmra.mrb[40].mxu1 %vm3019_vm11, %v3504_v1  ;;  %5758 = vmatprep.subr.mxu1 %v6486_v43 }
 0xcfc   : > { %5759 = vmatpush3.msk.msra.mxu1 %vm3023_vm10, %v3503_v2  ;;  %5760 = vmatprep.mubr.msk.f32.mxu1 %vm6485_vm2, %v6486_v43 }
 0xcfd   : > { %6317 = vmatprep.subr.bf16.mxu1 %v6484_v42 }
 0xcff   : > { %5761 = vmatmul.mubr.msk.f32.vlgmr.msra.gmra.mrb[42].mxu1 %vm3019_vm11, %v4760_v5  ;;  %v4082_v5 = vld [vmem:[%s7907_s20 + $0x10] sm:$0xff] }
 0xd00   : > { %6319 = vmatpush3.bf16.msra.mxu1 %v6318_v6  ;;  %5795 = vmatprep.mubr.msk.f32.mxu1 %vm6485_vm2, %v6486_v43  ;;  %v4083_v6 = vld [vmem:[%s7907_s20 + $0x18] sm:$0xff] }
 0xd01   : > { %6320 = vmatprep.subr.bf16.mxu1 %v6484_v42  ;;  %v6417_v7 = vpack.c.bf16 %v4083_v6, %v4082_v5  ;;  %v4825_v5 = vld [vmem:[%s7907_s20 + $0x110] sm:$0xff]  ;;  %v4826_v6 = vld [vmem:[%s7907_s20 + $0x118] sm:$0xff] }
 0xd04   : > { %6322 = vmatpush3.bf16.msra.mxu1 %v6321_v9  ;;  %v4085_v9 = vld [vmem:[%s7907_s20 + $0x28] sm:$0xff] }
 0xd05   : > { %6323 = vmatprep.subr.bf16.mxu1 %v6484_v42  ;;  %v6420_v10 = vpack.c.bf16 %v4085_v9, %v4084_v8  ;;  %v4827_v8 = vld [vmem:[%s7907_s20 + $0x120] sm:$0xff]  ;;  %v4828_v9 = vld [vmem:[%s7907_s20 + $0x128] sm:$0xff] }
 0xd08   : > { %6325 = vmatpush3.bf16.msra.mxu1 %v6324_v12  ;;  %v4087_v12 = vld [vmem:[%s7907_s20 + $0x38] sm:$0xff] }
 0xd09   : > { %6326 = vmatprep.subr.bf16.mxu1 %v6484_v42  ;;  %v6423_v14 = vpack.c.bf16 %v4087_v12, %v4086_v11  ;;  %v4829_v11 = vld [vmem:[%s7907_s20 + $0x130] sm:$0xff] }
 0xd0c   : > { %6328 = vmatpush3.bf16.msra.mxu1 %v6327_v16  ;;  %v4089_v16 = vld [vmem:[%s7907_s20 + $0x48] sm:$0xff] }
 0xd0d   : > { %6329 = vmatprep.subr.bf16.mxu1 %v6484_v42  ;;  %v6426_v17 = vpack.c.bf16 %v4089_v16, %v4088_v15  ;;  %v4832_v15 = vld [vmem:[%s7907_s20 + $0x148] sm:$0xff] }
 0xd10   : > { %6331 = vmatpush3.bf16.msra.mxu1 %v6330_v19  ;;  %v4091_v19 = vld [vmem:[%s7907_s20 + $0x58] sm:$0xff] }
 0xd11   : > { %6332 = vmatprep.subr.bf16.mxu1 %v6484_v42  ;;  %v6429_v20 = vpack.c.bf16 %v4091_v19, %v4090_v18  ;;  %v4834_v18 = vld [vmem:[%s7907_s20 + $0x158] sm:$0xff] }
 0xd14   : > { %6334 = vmatpush3.bf16.msra.mxu1 %v6333_v22  ;;  %v4093_v22 = vld [vmem:[%s7907_s20 + $0x68] sm:$0xff] }
 0xd15   : > { %6335 = vmatprep.subr.bf16.mxu1 %v6484_v42  ;;  %v6432_v23 = vpack.c.bf16 %v4093_v22, %v4092_v21  ;;  %v4836_v21 = vld [vmem:[%s7907_s20 + $0x168] sm:$0xff] }
 0xd18   : > { %6337 = vmatpush3.bf16.msra.mxu1 %v6336_v25  ;;  %v4095_v25 = vld [vmem:[%s7907_s20 + $0x78] sm:$0xff] }
 0xd19   : > { %6338 = vmatprep.subr.bf16.mxu1 %v6484_v42  ;;  %v6435_v26 = vpack.c.bf16 %v4095_v25, %v4094_v24  ;;  %v4838_v24 = vld [vmem:[%s7907_s20 + $0x178] sm:$0xff] }
 0xd1c   : > { %6340 = vmatpush3.bf16.msra.mxu1 %v6339_v28  ;;  %v4798_v28 = vld [vmem:[%s7905_s18] ss:$0 sm:$0xff] }
 0xd1d   : > { %5833 = vmatprep.subr.mxu1 %v6486_v43 }
 0xdce   : > { %v3577_v29 = vpop.f32.mrb[40].mxu1 }
 0xdcf   : > { %v5757_v30 = vpop.f32.mrb[41].mxu1  ;;  %5831 = vmatmul.mubr.f32.vlgmr.msra.gmra.mrb[24].mxu0 %v3577_v29 }
 0xdd0   : > { %5875 = vmatprep.mubr.msk.f32.mxu0 %vm6485_vm2, %v6486_v43 }
 0xdd2   : > { %v3668_v33 = vpop.f32.mrb[42].mxu1 }
 0xdd3   : > { %v5762_v34 = vpop.f32.mrb[43].mxu1  ;;  %5796 = vmatmul.mubr.f32.vlgmr.msra.gmra.mrb[44].mxu1 %v3668_v33  ;;  %v4003_v33 = vld [vmem:[%s7906_s19] sm:$0xf] }
 0xdd4   : > { %5834 = vmatpush3.msk.msra.mxu1 %vm3023_vm10, %v3503_v2  ;;  %5835 = vmatprep.mubr.msk.f32.mxu1 %vm6485_vm2, %v6486_v43  ;;  %v4080_v2 = vld [vmem:[%s7907_s20] sm:$0xff] }
 0xdd5   : > { %6365 = vmatprep.subr.bf16.mxu1 %v6484_v42  ;;  %v6414_v4 = vpack.c.bf16 %v4081_v3, %v4080_v2  ;;  %v4820_v3 = vld [vmem:[%s7906_s19 + $0x8] sm:$0xf] }
 0xdd7   : > { %5836 = vmatmul.mubr.msk.f32.vlgmr.msra.gmra.mrb[46].mxu1 %vm3019_vm11, %v4779_v35  ;;  %v4804_v35 = vld [vmem:[%s7907_s20 + $0x80] sm:$0xff] }
 0xdd8   : > { %6367 = vmatpush3.bf16.msra.mxu1 %v6366_v36  ;;  %5870 = vmatprep.mubr.msk.f32.mxu1 %vm6485_vm2, %v6486_v43  ;;  %v4805_v36 = vld [vmem:[%s7907_s20 + $0x88] sm:$0xff] }
 0xdd9   : > { %6368 = vmatprep.subr.bf16.mxu1 %v6484_v42  ;;  %v6390_v13 = vpack.c.bf16 %v4805_v36, %v4804_v35 }
 0xddc   : > { %6370 = vmatpush3.bf16.msra.mxu1 %v6369_v38  ;;  %v4806_v38 = vld [vmem:[%s7907_s20 + $0x90] sm:$0xff] }
 0xddd   : > { %6371 = vmatprep.subr.bf16.mxu1 %v6484_v42  ;;  %v6393_v40 = vpack.c.bf16 %v4807_v39, %v4806_v38 }
 0xde0   : > { %6373 = vmatpush3.bf16.msra.mxu1 %v6372_v41  ;;  %v4808_v41 = vld [vmem:[%s7907_s20 + $0xa0] sm:$0xff] }
 0xde1   : > { %6374 = vmatprep.subr.bf16.mxu1 %v6484_v42  ;;  %v6396_v45 = vpack.c.bf16 %v4809_v44, %v4808_v41 }
 0xde4   : > { %6376 = vmatpush3.bf16.msra.mxu1 %v6375_v46  ;;  %v4810_v46 = vld [vmem:[%s7907_s20 + $0xb0] sm:$0xff] }
 0xde5   : > { %6377 = vmatprep.subr.bf16.mxu1 %v6484_v42  ;;  %v6399_v48 = vpack.c.bf16 %v4811_v47, %v4810_v46 }
 0xde8   : > { %6379 = vmatpush3.bf16.msra.mxu1 %v6378_v49  ;;  %v4812_v49 = vld [vmem:[%s7907_s20 + $0xc0] sm:$0xff] }
 0xde9   : > { %6380 = vmatprep.subr.bf16.mxu1 %v6484_v42  ;;  %v6402_v51 = vpack.c.bf16 %v4813_v50, %v4812_v49 }
 0xdec   : > { %6382 = vmatpush3.bf16.msra.mxu1 %v6381_v52  ;;  %v4814_v52 = vld [vmem:[%s7907_s20 + $0xd0] sm:$0xff] }
 0xded   : > { %6383 = vmatprep.subr.bf16.mxu1 %v6484_v42  ;;  %v6405_v54 = vpack.c.bf16 %v4815_v53, %v4814_v52 }
 0xdf0   : > { %6385 = vmatpush3.bf16.msra.mxu1 %v6384_v55  ;;  %v4816_v55 = vld [vmem:[%s7907_s20 + $0xe0] sm:$0xff] }
 0xdf1   : > { %6386 = vmatprep.subr.bf16.mxu1 %v6484_v42  ;;  %v6408_v57 = vpack.c.bf16 %v4817_v56, %v4816_v55 }
 0xdf4   : > { %6388 = vmatpush3.bf16.msra.mxu1 %v6387_v58  ;;  %v4818_v58 = vld [vmem:[%s7907_s20 + $0xf0] sm:$0xff] }
 0xdf5   : > { %6413 = vmatprep.subr.bf16.mxu1 %v6484_v42 }
 0xea2   : > { %v3825_v59 = vpop.f32.mrb[24].mxu0 }
 0xea3   : > { %v5832_v60 = vpop.f32.mrb[25].mxu0 }
 0xea6   : > { %v3755_v61 = vpop.f32.mrb[44].mxu1 }
 0xea7   : > { %v3826_v62 = vadd.f32 %v3825_v59, %v3755_v61  ;;  %v5797_v63 = vpop.f32.mrb[45].mxu1  ;;  %v4819_v59 = vld [vmem:[%s7907_s20 + $0xf8] sm:$0xff] }
 0xea8   : > { %v6411_v60 = vpack.c.bf16 %v4819_v59, %v4818_v58  ;;  %v4823_v63 = vld [vmem:[%s7907_s20 + $0x100] sm:$0xff] }
 0xeaa   : > { %v3900_v0 = vpop.f32.mrb[46].mxu1 }
 0xeab   : > { %v5837_v1 = vpop.f32.mrb[47].mxu1  ;;  %5871 = vmatmul.mubr.f32.vlgmr.msra.gmra.mrb[48].mxu1 %v3900_v0  ;;  %v4824_v0 = vld [vmem:[%s7907_s20 + $0x108] sm:$0xff] }
 0xeac   : > { %5950 = vmatprep.mubr.msk.f32.mxu1 %vm6485_vm2, %v6486_v43  ;;  %6415 = vmatpush3.bf16.msra.mxu1 %v6414_v4  ;;  %v6438_v4 = vpack.c.bf16 %v4824_v0, %v4823_v63 }
 0xead   : > { %6416 = vmatprep.subr.bf16.mxu1 %v6484_v42 }
 0xeb0   : > { %6418 = vmatpush3.bf16.msra.mxu1 %v6417_v7  ;;  %v6441_v7 = vpack.c.bf16 %v4826_v6, %v4825_v5 }
 0xeb1   : > { %6419 = vmatprep.subr.bf16.mxu1 %v6484_v42 }
 0xeb4   : > { %6421 = vmatpush3.bf16.msra.mxu1 %v6420_v10  ;;  %v6444_v10 = vpack.c.bf16 %v4828_v9, %v4827_v8 }
 0xeb5   : > { %6422 = vmatprep.subr.bf16.mxu1 %v6484_v42 }
 0xeb8   : > { %6424 = vmatpush3.bf16.msra.mxu1 %v6423_v14  ;;  %v4831_v14 = vld [vmem:[%s7907_s20 + $0x140] sm:$0xff] }
 0xeb9   : > { %6425 = vmatprep.subr.bf16.mxu1 %v6484_v42  ;;  %v6450_v16 = vpack.c.bf16 %v4832_v15, %v4831_v14 }
 0xebc   : > { %6427 = vmatpush3.bf16.msra.mxu1 %v6426_v17  ;;  %v4833_v17 = vld [vmem:[%s7907_s20 + $0x150] sm:$0xff] }
 0xebd   : > { %6428 = vmatprep.subr.bf16.mxu1 %v6484_v42  ;;  %v6453_v19 = vpack.c.bf16 %v4834_v18, %v4833_v17 }
 0xec0   : > { %6430 = vmatpush3.bf16.msra.mxu1 %v6429_v20  ;;  %v4835_v20 = vld [vmem:[%s7907_s20 + $0x160] sm:$0xff] }
 0xec1   : > { %6431 = vmatprep.subr.bf16.mxu1 %v6484_v42  ;;  %v6456_v22 = vpack.c.bf16 %v4836_v21, %v4835_v20 }
 0xec4   : > { %6433 = vmatpush3.bf16.msra.mxu1 %v6432_v23  ;;  %v4837_v23 = vld [vmem:[%s7907_s20 + $0x170] sm:$0xff] }
 0xec5   : > { %6434 = vmatprep.subr.bf16.mxu1 %v6484_v42  ;;  %v6459_v25 = vpack.c.bf16 %v4838_v24, %v4837_v23 }
 0xec8   : > { %6436 = vmatpush3.bf16.msra.mxu1 %v6435_v26 }
 0xf7e   : > { %v3987_v27 = vpop.f32.mrb[48].mxu1 }
 0xf7f   : > { %v3991_v29 = vadd.f32 %v3987_v27, %v3826_v62  ;;  %v5872_v30 = vpop.f32.mrb[49].mxu1 }
 0xf81   : > { %v3999_v31 = vadd.f32 %v4798_v28, %v3991_v29 }
 0xf83   : > { %vm4000_vm13 = vcmp.ge.f32.partialorder %v3999_v31, 0.0  ;;  %v4001_v32 = vmul.f32 0.2, %v3999_v31 }
 0xf85   : > { %v4002_v34 = vsel %vm4000_vm13, %v3999_v31, %v4001_v32 }
 0xf86   : > { %5874 = vmatpush3.msk.msra.mxu0 %vm3023_vm10, %v4002_v34 }
 0xf87   : > { %5876 = vmatmul.mubr.msk.f32.vlgmr.msra.gmra.mrb[26].mxu0 %vm3019_vm11, %v4003_v33  ;;  %5878 = vmatprep.subr.mxu0 %v6486_v43  ;;  %v4839_v33 = vld [vmem:[%s7908_s21] ss:$0 sm:$0xff] }
 0xf88   : > { %5879 = vmatpush3.msk.msra.mxu0 %vm3023_vm10, %v4002_v34  ;;  %5880 = vmatprep.mubr.msk.f32.mxu0 %vm6485_vm2, %v6486_v43 }
 0xf89   : > { %6389 = vmatprep.subr.bf16.mxu0 %v6484_v42 }
 0xf8b   : > { %5881 = vmatmul.mubr.msk.f32.vlgmr.msra.gmra.mrb[28].mxu0 %vm3019_vm11, %v4801_v37 }
 0xf8c   : > { %6391 = vmatpush3.bf16.msra.mxu0 %v6390_v13  ;;  %5915 = vmatprep.mubr.msk.f32.mxu0 %vm6485_vm2, %v6486_v43 }
 0xf8d   : > { %6392 = vmatprep.subr.bf16.mxu0 %v6484_v42 }
 0xf90   : > { %6394 = vmatpush3.bf16.msra.mxu0 %v6393_v40 }
 0xf91   : > { %6395 = vmatprep.subr.bf16.mxu0 %v6484_v42 }
 0xf94   : > { %6397 = vmatpush3.bf16.msra.mxu0 %v6396_v45 }
 0xf95   : > { %6398 = vmatprep.subr.bf16.mxu0 %v6484_v42 }
 0xf98   : > { %6400 = vmatpush3.bf16.msra.mxu0 %v6399_v48 }
 0xf99   : > { %6401 = vmatprep.subr.bf16.mxu0 %v6484_v42 }
 0xf9c   : > { %6403 = vmatpush3.bf16.msra.mxu0 %v6402_v51 }
 0xf9d   : > { %6404 = vmatprep.subr.bf16.mxu0 %v6484_v42 }
 0xfa0   : > { %6406 = vmatpush3.bf16.msra.mxu0 %v6405_v54 }
 0xfa1   : > { %6407 = vmatprep.subr.bf16.mxu0 %v6484_v42 }
 0xfa4   : > { %6409 = vmatpush3.bf16.msra.mxu0 %v6408_v57 }
 0xfa5   : > { %6410 = vmatprep.subr.bf16.mxu0 %v6484_v42 }
 0xfa8   : > { %6412 = vmatpush3.bf16.msra.mxu0 %v6411_v60 }
 0xfa9   : > { %5953 = vmatprep.subr.mxu0 %v6486_v43 }
0x105a   : > { %v4076_v61 = vpop.f32.mrb[26].mxu0 }
0x105b   : > { %v5877_v62 = vpop.f32.mrb[27].mxu0  ;;  %5951 = vmatmul.mubr.f32.vlgmr.msra.gmra.mrb[50].mxu1 %v4076_v61 }
0x105e   : > { %v4167_v1 = vpop.f32.mrb[28].mxu0 }
0x105f   : > { %5916 = vmatmul.mubr.f32.vlgmr.msra.gmra.mrb[30].mxu0 %v4167_v1  ;;  %v5882_v2 = vpop.f32.mrb[29].mxu0 }
0x1060   : > { %5954 = vmatpush3.msk.msra.mxu0 %vm3023_vm10, %v4002_v34  ;;  %5955 = vmatprep.mubr.msk.f32.mxu0 %vm6485_vm2, %v6486_v43 }
0x1061   : > { %6437 = vmatprep.subr.bf16.mxu0 %v6484_v42 }
0x1063   : > { %5956 = vmatmul.mubr.msk.f32.vlgmr.msra.gmra.mrb[32].mxu0 %vm3019_vm11, %v4820_v3 }
0x1064   : > { %6439 = vmatpush3.bf16.msra.mxu0 %v6438_v4  ;;  %5990 = vmatprep.mubr.msk.f32.mxu0 %vm6485_vm2, %v6486_v43  ;;  %v4830_v43 = vld [vmem:[%s7907_s20 + $0x138] sm:$0xff] }
0x1065   : > { %6440 = vmatprep.subr.bf16.mxu0 %v6484_v42  ;;  %v6447_v12 = vpack.c.bf16 %v4830_v43, %v4829_v11 }
0x1068   : > { %6442 = vmatpush3.bf16.msra.mxu0 %v6441_v7 }
0x1069   : > { %6443 = vmatprep.subr.bf16.mxu0 %v6484_v42 }
0x106c   : > { %6445 = vmatpush3.bf16.msra.mxu0 %v6444_v10 }
0x106d   : > { %6446 = vmatprep.subr.bf16.mxu0 %v6484_v42 }
0x1070   : > { %6448 = vmatpush3.bf16.msra.mxu0 %v6447_v12 }
0x1071   : > { %6449 = vmatprep.subr.bf16.mxu0 %v6484_v42 }
0x1074   : > { %6451 = vmatpush3.bf16.msra.mxu0 %v6450_v16 }
0x1075   : > { %6452 = vmatprep.subr.bf16.mxu0 %v6484_v42 }
0x1078   : > { %6454 = vmatpush3.bf16.msra.mxu0 %v6453_v19 }
0x1079   : > { %6455 = vmatprep.subr.bf16.mxu0 %v6484_v42 }
0x107c   : > { %6457 = vmatpush3.bf16.msra.mxu0 %v6456_v22 }
0x107d   : > { %6458 = vmatprep.subr.bf16.mxu0 %v6484_v42 }
0x1080   : > { %6460 = vmatpush3.bf16.msra.mxu0 %v6459_v25 }
0x112e   : > { %v4324_v26 = vpop.f32.mrb[50].mxu1 }
0x112f   : > { %v5952_v27 = vpop.f32.mrb[51].mxu1 }
0x1132   : > { %v4254_v28 = vpop.f32.mrb[30].mxu0 }
0x1133   : > { %v4325_v29 = vadd.f32 %v4324_v26, %v4254_v28  ;;  %v5917_v30 = vpop.f32.mrb[31].mxu0 }
0x1136   : > { %v4399_v31 = vpop.f32.mrb[32].mxu0 }
0x1137   : > { %5991 = vmatmul.mubr.f32.vlgmr.msra.gmra.mrb[34].mxu0 %v4399_v31  ;;  %v5957_v32 = vpop.f32.mrb[33].mxu0 }
0x120a   : > { %v4486_v42 = vpop.f32.mrb[34].mxu0 }
0x120b   : > { %v4490_v34 = vadd.f32 %v4486_v42, %v4325_v29  ;;  %v5992_v35 = vpop.f32.mrb[35].mxu0 }
0x120d   : > { %v4498_v36 = vadd.f32 %v4839_v33, %v4490_v34 }
0x120f   : > { %vm4499_vm14 = vcmp.ge.f32.partialorder %v4498_v36, 0.0  ;;  %v4500_v37 = vmul.f32 0.2, %v4498_v36 }
0x1211   : > { %v4501_v13 = vsel %vm4499_vm14, %v4498_v36, %v4500_v37 }
0x1212   : > { %4502 = vst [vmem:[%s681_s27] sm:$0xf] %v4501_v13 }
0x1213 PF: > { %s32_s3 = sadd.s32 1, %s6482_s3  }
0x1214   : > { %p29_p4 = scmp.ge.s32.totalorder %s32_s3, 4  }
0x1216   :  { %31 = sbr.rel (!%p29_p4) target bundleno = 8 (0x8), region = 170 }

</bundles_post_ra>
